<compile_context>
chip_gen: v5e
topology: v5e:2x2
jax: 0.10.0
libtpu: 0.0.40
codegen_flags: <defaults>
</compile_context>

<pallas_src>
import jax
import jax.numpy as jnp
from jax.experimental import pallas as pl
from jax.experimental.pallas import tpu as pltpu

H = 68            # true hidden size
HP = 128          # lane-padded hidden size
GP = 3 * HP       # packed gate width per layer (r | z | n), each 128 lanes
OUT = 5           # fc output features
OUTP = 128        # lane-padded fc output width


# ----------------------------- Pallas kernel --------------------------------
def gru_fc_kernel(x_ref,                       # (T, B, 1) whole sequence, VMEM, f32
                  wih0_ref, bih0_ref,          # (1, GP) f32, (1, GP) f32
                  wrec_ref, brec_ref,          # (2*HP, 2*GP) bf16, (1, 2*GP) f32
                  wih1_ref, bih1_ref,          # (HP, GP) bf16, (1, GP) f32
                  wfc_ref, bfc_ref,            # (HP, OUTP) bf16, (1, OUTP) f32
                  out_ref,                     # (B, OUTP) f32
                  gi0_ref):                    # (T, B, GP) f32 VMEM scratch
    T = x_ref.shape[0]
    B = x_ref.shape[1]

    # ---- hoisted layer-0 input transform (independent of the carry): one VPU pass
    # gi0_all[t] = x[t] * W_ih0_row + b_ih0, for all t, off the serial chain.
    gi0_ref[...] = x_ref[...] * wih0_ref[...] + bih0_ref[...]   # (T,B,1)*(1,GP)->(T,B,GP)

    # Small f32 constants hoisted out of the loop (few vregs each).
    brec = brec_ref[...]        # (1, 2*GP)
    bih1 = bih1_ref[...]        # (1, GP)

    def step(t, h12):
        # h12: (B, 2*HP) f32 carry = [h1 | h2] on 128-lane boundaries.
        h1 = h12[:, :HP]
        h2 = h12[:, HP:]

        # Fused block-diagonal recurrent matmul for BOTH layers (depends only on
        # the previous state).  bf16 operands, f32 accumulate.
        gh = jnp.dot(h12.astype(jnp.bfloat16), wrec_ref[...],
                     preferred_element_type=jnp.float32) + brec   # (B, 2*GP)
        gh0 = gh[:, :GP]
        gh1 = gh[:, GP:]

        # ---- layer 0 (input path precomputed)
        gi0 = gi0_ref[t]                                          # (B, GP)
        rz0 = jax.nn.sigmoid(gi0[:, :2 * HP] + gh0[:, :2 * HP])
        r0 = rz0[:, :HP]
        z0 = rz0[:, HP:]
        n0 = jnp.tanh(gi0[:, 2 * HP:] + r0 * gh0[:, 2 * HP:])
        h1n = n0 + z0 * (h1 - n0)                                 # == (1-z)*n + z*h

        # ---- layer 1: input is h1n (K=128 MXU matmul, bf16 operands)
        gi1 = jnp.dot(h1n.astype(jnp.bfloat16), wih1_ref[...],
                      preferred_element_type=jnp.float32) + bih1  # (B, GP)
        rz1 = jax.nn.sigmoid(gi1[:, :2 * HP] + gh1[:, :2 * HP])
        r1 = rz1[:, :HP]
        z1 = rz1[:, HP:]
        n1 = jnp.tanh(gi1[:, 2 * HP:] + r1 * gh1[:, 2 * HP:])
        h2n = n1 + z1 * (h2 - n1)

        return jnp.concatenate([h1n, h2n], axis=-1)               # lane-aligned

    h12_0 = jnp.zeros((B, 2 * HP), jnp.float32)
    h12_f = jax.lax.fori_loop(0, T, step, h12_0, unroll=True)

    h2_f = h12_f[:, HP:]
    out_ref[...] = (jnp.dot(h2_f.astype(jnp.bfloat16), wfc_ref[...],
                            preferred_element_type=jnp.float32) + bfc_ref[...])


# ------------------------------ wrapper --------------------------------------
def pack_gate_weight(w_torch, in_pad):
    """w_torch: (3H, in_dim) torch layout -> (in_pad, GP); gate g at lanes [g*HP, g*HP+H)."""
    in_dim = w_torch.shape[1]
    out = jnp.zeros((in_pad, GP), jnp.float32)
    for g in range(3):
        out = out.at[:in_dim, g * HP:g * HP + H].set(w_torch[g * H:(g + 1) * H, :].T)
    return out


def pack_gate_bias(b_torch):
    out = jnp.zeros((1, GP), jnp.float32)
    for g in range(3):
        out = out.at[0, g * HP:g * HP + H].set(b_torch[g * H:(g + 1) * H])
    return out


def my_rnn_pallas(x, params):
    """x: (B, T, 1) float32 (batch_first, like PyTorch). Returns (B, 5)."""
    B, T, _ = x.shape
    x_tm = jnp.transpose(x, (1, 0, 2))                 # time-major (T, B, 1)

    # layer 0 input path (input_size = 1) — stays f32 (VPU path, hoisted in-kernel)
    wih0 = pack_gate_weight(params["w_ih_l0"], 1)      # (1, GP)
    bih0 = pack_gate_bias(params["b_ih_l0"])           # (1, GP)

    # fused block-diagonal recurrent weights for both layers (bf16 MXU operand)
    whh0 = pack_gate_weight(params["w_hh_l0"], HP)     # (HP, GP)
    whh1 = pack_gate_weight(params["w_hh_l1"], HP)     # (HP, GP)
    wrec = jnp.zeros((2 * HP, 2 * GP), jnp.float32)
    wrec = wrec.at[:HP, :GP].set(whh0).at[HP:, GP:].set(whh1)
    wrec = wrec.astype(jnp.bfloat16)
    brec = jnp.concatenate([pack_gate_bias(params["b_hh_l0"]),
                            pack_gate_bias(params["b_hh_l1"])], axis=1)  # (1, 2*GP) f32

    # layer 1 input path (bf16 MXU operand; bias f32)
    wih1 = pack_gate_weight(params["w_ih_l1"], HP).astype(jnp.bfloat16)  # (HP, GP)
    bih1 = pack_gate_bias(params["b_ih_l1"])                             # (1, GP)

    # fc head, lane-padded to 128 output lanes (lane-dense final store)
    wfc = jnp.zeros((HP, OUTP), jnp.float32).at[:H, :OUT].set(params["fc_w"].T)
    wfc = wfc.astype(jnp.bfloat16)
    bfc = jnp.zeros((1, OUTP), jnp.float32).at[0, :OUT].set(params["fc_b"])

    full = lambda shape: pl.BlockSpec(shape, lambda i: (0,) * len(shape))

    out_full = pl.pallas_call(
        gru_fc_kernel,
        out_shape=jax.ShapeDtypeStruct((B, OUTP), jnp.float32),
        grid_spec=pltpu.PrefetchScalarGridSpec(
            num_scalar_prefetch=0,
            grid=(1,),                                   # single invocation; time loop is internal
            in_specs=[
                full((T, B, 1)),                         # whole sequence resident in VMEM
                full((1, GP)), full((1, GP)),            # wih0, bih0
                full((2 * HP, 2 * GP)), full((1, 2 * GP)),   # wrec (bf16), brec
                full((HP, GP)), full((1, GP)),           # wih1 (bf16), bih1
                full((HP, OUTP)), full((1, OUTP)),       # wfc (bf16), bfc
            ],
            out_specs=pl.BlockSpec((B, OUTP), lambda i: (0, 0)),
            scratch_shapes=[pltpu.VMEM((T, B, GP), jnp.float32)],   # hoisted gi0_all
        ),
        compiler_params=pltpu.CompilerParams(dimension_semantics=("arbitrary",)),
    )(x_tm, wih0, bih0, wrec, brec, wih1, bih1, wfc, bfc)
    return out_full[:, :OUT]


# --------------------------- pure-JAX reference -------------------------------
def my_rnn_ref(x, params):
    B = x.shape[0]

    def cell(x_t, h, w_ih, w_hh, b_ih, b_hh):
        gi = x_t @ w_ih.T + b_ih
        gh = h @ w_hh.T + b_hh
        i_r, i_z, i_n = jnp.split(gi, 3, axis=-1)
        h_r, h_z, h_n = jnp.split(gh, 3, axis=-1)
        r = jax.nn.sigmoid(i_r + h_r)
        z = jax.nn.sigmoid(i_z + h_z)
        n = jnp.tanh(i_n + r * h_n)
        return (1.0 - z) * n + z * h

    def step(carry, x_t):
        h1, h2 = carry
        h1 = cell(x_t, h1, params["w_ih_l0"], params["w_hh_l0"],
                  params["b_ih_l0"], params["b_hh_l0"])
        h2 = cell(h1, h2, params["w_ih_l1"], params["w_hh_l1"],
                  params["b_ih_l1"], params["b_hh_l1"])
        return (h1, h2), None

    h0 = (jnp.zeros((B, H), jnp.float32), jnp.zeros((B, H), jnp.float32))
    (h1, h2), _ = jax.lax.scan(step, h0, jnp.transpose(x, (1, 0, 2)))
    return h2 @ params["fc_w"].T + params["fc_b"]


# ------------------------------ main ------------------------------------------
if __name__ == "__main__":
    key = jax.random.PRNGKey(0)
    ks = jax.random.split(key, 11)
    s = 1.0 / (H ** 0.5)
    uni = lambda k, shape: jax.random.uniform(k, shape, jnp.float32, -s, s)

    params = {
        "w_ih_l0": uni(ks[0], (3 * H, 1)),
        "w_hh_l0": uni(ks[1], (3 * H, H)),
        "b_ih_l0": uni(ks[2], (3 * H,)),
        "b_hh_l0": uni(ks[3], (3 * H,)),
        "w_ih_l1": uni(ks[4], (3 * H, H)),
        "w_hh_l1": uni(ks[5], (3 * H, H)),
        "b_ih_l1": uni(ks[6], (3 * H,)),
        "b_hh_l1": uni(ks[7], (3 * H,)),
        "fc_w":    uni(ks[8], (OUT, H)),
        "fc_b":    uni(ks[9], (OUT,)),
    }

    B, T = 2, 8
    x = jax.random.normal(ks[10], (B, T, 1), jnp.float32)

    out = my_rnn_pallas(x, params)
    out = jax.block_until_ready(out)

    ref = my_rnn_ref(x, params)
    assert out.shape == (B, OUT)
    # bf16 MXU operands -> tolerance loosened vs. a pure-f32 path.
    assert jnp.allclose(out, ref, atol=2e-2, rtol=2e-2), (out, ref)

    print("KERNEL_OK")
</pallas_src>

<mosaic_0001>
module attributes {stable_mosaic.version = 11 : i64} {
  func.func @gru_fc_kernel(%arg0: i32, %arg1: memref<8x2x1xf32, #tpu.memory_space<vmem>>, %arg2: memref<1x384xf32, #tpu.memory_space<vmem>>, %arg3: memref<1x384xf32, #tpu.memory_space<vmem>>, %arg4: memref<256x768xbf16, #tpu.memory_space<vmem>>, %arg5: memref<1x768xf32, #tpu.memory_space<vmem>>, %arg6: memref<128x384xbf16, #tpu.memory_space<vmem>>, %arg7: memref<1x384xf32, #tpu.memory_space<vmem>>, %arg8: memref<128x128xbf16, #tpu.memory_space<vmem>>, %arg9: memref<1x128xf32, #tpu.memory_space<vmem>>, %arg10: memref<2x128xf32, #tpu.memory_space<vmem>>, %arg11: memref<8x2x384xf32, #tpu.memory_space<vmem>>) attributes {dimension_semantics = [#tpu.dimension_semantics<arbitrary>], iteration_bounds = array<i64: 1>, scalar_prefetch = 0 : i64, scratch_operands = 1 : i64, tpu.core_type = #tpu.core_type<tc>, window_params = [{pipeline_mode = #tpu.pipeline_mode<synchronous>, transform_indices = @transform_0, window_bounds = array<i64: 8, 2, 1>}, {pipeline_mode = #tpu.pipeline_mode<synchronous>, transform_indices = @transform_1, window_bounds = array<i64: 1, 384>}, {pipeline_mode = #tpu.pipeline_mode<synchronous>, transform_indices = @transform_2, window_bounds = array<i64: 1, 384>}, {pipeline_mode = #tpu.pipeline_mode<synchronous>, transform_indices = @transform_3, window_bounds = array<i64: 256, 768>}, {pipeline_mode = #tpu.pipeline_mode<synchronous>, transform_indices = @transform_4, window_bounds = array<i64: 1, 768>}, {pipeline_mode = #tpu.pipeline_mode<synchronous>, transform_indices = @transform_5, window_bounds = array<i64: 128, 384>}, {pipeline_mode = #tpu.pipeline_mode<synchronous>, transform_indices = @transform_6, window_bounds = array<i64: 1, 384>}, {pipeline_mode = #tpu.pipeline_mode<synchronous>, transform_indices = @transform_7, window_bounds = array<i64: 128, 128>}, {pipeline_mode = #tpu.pipeline_mode<synchronous>, transform_indices = @transform_8, window_bounds = array<i64: 1, 128>}, {pipeline_mode = #tpu.pipeline_mode<synchronous>, transform_indices = @transform_9, window_bounds = array<i64: 2, 128>}]} {
    %c0 = arith.constant 0 : index
    %c0_0 = arith.constant 0 : index
    %c0_1 = arith.constant 0 : index
    %0 = vector.load %arg1[%c0, %c0_0, %c0_1] : memref<8x2x1xf32, #tpu.memory_space<vmem>>, vector<8x2x1xf32>
    %c0_2 = arith.constant 0 : index
    %c0_3 = arith.constant 0 : index
    %1 = vector.load %arg2[%c0_2, %c0_3] : memref<1x384xf32, #tpu.memory_space<vmem>>, vector<1x384xf32>
    %2 = vector.shape_cast %1 : vector<1x384xf32> to vector<1x1x384xf32>
    %3 = vector.broadcast %0 : vector<8x2x1xf32> to vector<8x2x384xf32>
    %4 = vector.broadcast %2 : vector<1x1x384xf32> to vector<8x2x384xf32>
    %5 = arith.mulf %3, %4 : vector<8x2x384xf32>
    %c0_4 = arith.constant 0 : index
    %c0_5 = arith.constant 0 : index
    %6 = vector.load %arg3[%c0_4, %c0_5] : memref<1x384xf32, #tpu.memory_space<vmem>>, vector<1x384xf32>
    %7 = vector.shape_cast %6 : vector<1x384xf32> to vector<1x1x384xf32>
    %8 = vector.broadcast %7 : vector<1x1x384xf32> to vector<8x2x384xf32>
    %9 = arith.addf %5, %8 : vector<8x2x384xf32>
    %c0_6 = arith.constant 0 : index
    %c0_7 = arith.constant 0 : index
    %c0_8 = arith.constant 0 : index
    %10 = vector.load %arg11[%c0_6, %c0_7, %c0_8] : memref<8x2x384xf32, #tpu.memory_space<vmem>>, vector<8x2x384xf32>
    tpu.vector_store %arg11[%c0_6, %c0_7, %c0_8], %9 {strides = array<i32>} : memref<8x2x384xf32, #tpu.memory_space<vmem>>, vector<8x2x384xf32>,
    %c0_9 = arith.constant 0 : index
    %c0_10 = arith.constant 0 : index
    %11 = vector.load %arg5[%c0_9, %c0_10] : memref<1x768xf32, #tpu.memory_space<vmem>>, vector<1x768xf32>
    %c0_11 = arith.constant 0 : index
    %c0_12 = arith.constant 0 : index
    %12 = vector.load %arg7[%c0_11, %c0_12] : memref<1x384xf32, #tpu.memory_space<vmem>>, vector<1x384xf32>
    %cst = arith.constant 0.000000e+00 : f32
    %13 = vector.broadcast %cst : f32 to vector<2x256xf32>
    %c0_i32 = arith.constant 0 : i32
    %14 = vector.extract_strided_slice %13 {offsets = [0, 0], sizes = [2, 128], strides = [1, 1]} : vector<2x256xf32> to vector<2x128xf32>
    %15 = vector.extract_strided_slice %13 {offsets = [0, 128], sizes = [2, 128], strides = [1, 1]} : vector<2x256xf32> to vector<2x128xf32>
    %16 = arith.truncf %13 : vector<2x256xf32> to vector<2x256xbf16>
    %c0_13 = arith.constant 0 : index
    %c0_14 = arith.constant 0 : index
    %17 = vector.load %arg4[%c0_13, %c0_14] : memref<256x768xbf16, #tpu.memory_space<vmem>>, vector<256x768xbf16>
    %cst_15 = arith.constant dense<0.000000e+00> : vector<2x768xf32>
    %18 = tpu.matmul %16, %17, %cst_15 {dimension_numbers = #tpu.dot_dimension_numbers<[1], [0], [0], [1], [0, 0, 1, 1], [], []>} : vector<2x256xbf16>, vector<256x768xbf16>, vector<2x768xf32> -> vector<2x768xf32>
    %19 = vector.broadcast %11 : vector<1x768xf32> to vector<2x768xf32>
    %20 = arith.addf %18, %19 : vector<2x768xf32>
    %21 = vector.extract_strided_slice %20 {offsets = [0, 0], sizes = [2, 384], strides = [1, 1]} : vector<2x768xf32> to vector<2x384xf32>
    %22 = vector.extract_strided_slice %20 {offsets = [0, 384], sizes = [2, 384], strides = [1, 1]} : vector<2x768xf32> to vector<2x384xf32>
    %23 = arith.index_cast %c0_i32 : i32 to index
    %c0_16 = arith.constant 0 : index
    %c0_17 = arith.constant 0 : index
    %24 = vector.load %arg11[%23, %c0_16, %c0_17] : memref<8x2x384xf32, #tpu.memory_space<vmem>>, vector<1x2x384xf32>
    %25 = vector.shape_cast %24 : vector<1x2x384xf32> to vector<2x384xf32>
    %26 = vector.extract_strided_slice %25 {offsets = [0, 0], sizes = [2, 256], strides = [1, 1]} : vector<2x384xf32> to vector<2x256xf32>
    %27 = vector.extract_strided_slice %21 {offsets = [0, 0], sizes = [2, 256], strides = [1, 1]} : vector<2x384xf32> to vector<2x256xf32>
    %28 = arith.addf %26, %27 : vector<2x256xf32>
    %29 = arith.negf %28 : vector<2x256xf32>
    %30 = math.exp %29 : vector<2x256xf32>
    %cst_18 = arith.constant 1.000000e+00 : f32
    %31 = vector.broadcast %cst_18 : f32 to vector<2x256xf32>
    %32 = arith.addf %31, %30 : vector<2x256xf32>
    %33 = arith.divf %31, %32 : vector<2x256xf32>
    %34 = vector.extract_strided_slice %33 {offsets = [0, 0], sizes = [2, 128], strides = [1, 1]} : vector<2x256xf32> to vector<2x128xf32>
    %35 = vector.extract_strided_slice %33 {offsets = [0, 128], sizes = [2, 128], strides = [1, 1]} : vector<2x256xf32> to vector<2x128xf32>
    %36 = vector.extract_strided_slice %25 {offsets = [0, 256], sizes = [2, 128], strides = [1, 1]} : vector<2x384xf32> to vector<2x128xf32>
    %37 = vector.extract_strided_slice %21 {offsets = [0, 256], sizes = [2, 128], strides = [1, 1]} : vector<2x384xf32> to vector<2x128xf32>
    %38 = arith.mulf %34, %37 : vector<2x128xf32>
    %39 = arith.addf %36, %38 : vector<2x128xf32>
    %40 = math.tanh %39 : vector<2x128xf32>
    %41 = arith.subf %14, %40 : vector<2x128xf32>
    %42 = arith.mulf %35, %41 : vector<2x128xf32>
    %43 = arith.addf %40, %42 : vector<2x128xf32>
    %44 = arith.truncf %43 : vector<2x128xf32> to vector<2x128xbf16>
    %c0_19 = arith.constant 0 : index
    %c0_20 = arith.constant 0 : index
    %45 = vector.load %arg6[%c0_19, %c0_20] : memref<128x384xbf16, #tpu.memory_space<vmem>>, vector<128x384xbf16>
    %cst_21 = arith.constant dense<0.000000e+00> : vector<2x384xf32>
    %46 = tpu.matmul %44, %45, %cst_21 {dimension_numbers = #tpu.dot_dimension_numbers<[1], [0], [0], [1], [0, 0, 1, 1], [], []>} : vector<2x128xbf16>, vector<128x384xbf16>, vector<2x384xf32> -> vector<2x384xf32>
    %47 = vector.broadcast %12 : vector<1x384xf32> to vector<2x384xf32>
    %48 = arith.addf %46, %47 : vector<2x384xf32>
    %49 = vector.extract_strided_slice %48 {offsets = [0, 0], sizes = [2, 256], strides = [1, 1]} : vector<2x384xf32> to vector<2x256xf32>
    %50 = vector.extract_strided_slice %22 {offsets = [0, 0], sizes = [2, 256], strides = [1, 1]} : vector<2x384xf32> to vector<2x256xf32>
    %51 = arith.addf %49, %50 : vector<2x256xf32>
    %52 = arith.negf %51 : vector<2x256xf32>
    %53 = math.exp %52 : vector<2x256xf32>
    %cst_22 = arith.constant 1.000000e+00 : f32
    %54 = vector.broadcast %cst_22 : f32 to vector<2x256xf32>
    %55 = arith.addf %54, %53 : vector<2x256xf32>
    %56 = arith.divf %54, %55 : vector<2x256xf32>
    %57 = vector.extract_strided_slice %56 {offsets = [0, 0], sizes = [2, 128], strides = [1, 1]} : vector<2x256xf32> to vector<2x128xf32>
    %58 = vector.extract_strided_slice %56 {offsets = [0, 128], sizes = [2, 128], strides = [1, 1]} : vector<2x256xf32> to vector<2x128xf32>
    %59 = vector.extract_strided_slice %48 {offsets = [0, 256], sizes = [2, 128], strides = [1, 1]} : vector<2x384xf32> to vector<2x128xf32>
    %60 = vector.extract_strided_slice %22 {offsets = [0, 256], sizes = [2, 128], strides = [1, 1]} : vector<2x384xf32> to vector<2x128xf32>
    %61 = arith.mulf %57, %60 : vector<2x128xf32>
    %62 = arith.addf %59, %61 : vector<2x128xf32>
    %63 = math.tanh %62 : vector<2x128xf32>
    %64 = arith.subf %15, %63 : vector<2x128xf32>
    %65 = arith.mulf %58, %64 : vector<2x128xf32>
    %66 = arith.addf %63, %65 : vector<2x128xf32>
    %67 = tpu.concatenate %43, %66 in 1 : vector<2x128xf32>, vector<2x128xf32> -> vector<2x256xf32>
    %c1_i32 = arith.constant 1 : i32
    %68 = vector.extract_strided_slice %67 {offsets = [0, 0], sizes = [2, 128], strides = [1, 1]} : vector<2x256xf32> to vector<2x128xf32>
    %69 = vector.extract_strided_slice %67 {offsets = [0, 128], sizes = [2, 128], strides = [1, 1]} : vector<2x256xf32> to vector<2x128xf32>
    %70 = arith.truncf %67 : vector<2x256xf32> to vector<2x256xbf16>
    %c0_23 = arith.constant 0 : index
    %c0_24 = arith.constant 0 : index
    %71 = vector.load %arg4[%c0_23, %c0_24] : memref<256x768xbf16, #tpu.memory_space<vmem>>, vector<256x768xbf16>
    %cst_25 = arith.constant dense<0.000000e+00> : vector<2x768xf32>
    %72 = tpu.matmul %70, %71, %cst_25 {dimension_numbers = #tpu.dot_dimension_numbers<[1], [0], [0], [1], [0, 0, 1, 1], [], []>} : vector<2x256xbf16>, vector<256x768xbf16>, vector<2x768xf32> -> vector<2x768xf32>
    %73 = vector.broadcast %11 : vector<1x768xf32> to vector<2x768xf32>
    %74 = arith.addf %72, %73 : vector<2x768xf32>
    %75 = vector.extract_strided_slice %74 {offsets = [0, 0], sizes = [2, 384], strides = [1, 1]} : vector<2x768xf32> to vector<2x384xf32>
    %76 = vector.extract_strided_slice %74 {offsets = [0, 384], sizes = [2, 384], strides = [1, 1]} : vector<2x768xf32> to vector<2x384xf32>
    %77 = arith.index_cast %c1_i32 : i32 to index
    %c0_26 = arith.constant 0 : index
    %c0_27 = arith.constant 0 : index
    %78 = vector.load %arg11[%77, %c0_26, %c0_27] : memref<8x2x384xf32, #tpu.memory_space<vmem>>, vector<1x2x384xf32>
    %79 = vector.shape_cast %78 : vector<1x2x384xf32> to vector<2x384xf32>
    %80 = vector.extract_strided_slice %79 {offsets = [0, 0], sizes = [2, 256], strides = [1, 1]} : vector<2x384xf32> to vector<2x256xf32>
    %81 = vector.extract_strided_slice %75 {offsets = [0, 0], sizes = [2, 256], strides = [1, 1]} : vector<2x384xf32> to vector<2x256xf32>
    %82 = arith.addf %80, %81 : vector<2x256xf32>
    %83 = arith.negf %82 : vector<2x256xf32>
    %84 = math.exp %83 : vector<2x256xf32>
    %cst_28 = arith.constant 1.000000e+00 : f32
    %85 = vector.broadcast %cst_28 : f32 to vector<2x256xf32>
    %86 = arith.addf %85, %84 : vector<2x256xf32>
    %87 = arith.divf %85, %86 : vector<2x256xf32>
    %88 = vector.extract_strided_slice %87 {offsets = [0, 0], sizes = [2, 128], strides = [1, 1]} : vector<2x256xf32> to vector<2x128xf32>
    %89 = vector.extract_strided_slice %87 {offsets = [0, 128], sizes = [2, 128], strides = [1, 1]} : vector<2x256xf32> to vector<2x128xf32>
    %90 = vector.extract_strided_slice %79 {offsets = [0, 256], sizes = [2, 128], strides = [1, 1]} : vector<2x384xf32> to vector<2x128xf32>
    %91 = vector.extract_strided_slice %75 {offsets = [0, 256], sizes = [2, 128], strides = [1, 1]} : vector<2x384xf32> to vector<2x128xf32>
    %92 = arith.mulf %88, %91 : vector<2x128xf32>
    %93 = arith.addf %90, %92 : vector<2x128xf32>
    %94 = math.tanh %93 : vector<2x128xf32>
    %95 = arith.subf %68, %94 : vector<2x128xf32>
    %96 = arith.mulf %89, %95 : vector<2x128xf32>
    %97 = arith.addf %94, %96 : vector<2x128xf32>
    %98 = arith.truncf %97 : vector<2x128xf32> to vector<2x128xbf16>
    %c0_29 = arith.constant 0 : index
    %c0_30 = arith.constant 0 : index
    %99 = vector.load %arg6[%c0_29, %c0_30] : memref<128x384xbf16, #tpu.memory_space<vmem>>, vector<128x384xbf16>
    %cst_31 = arith.constant dense<0.000000e+00> : vector<2x384xf32>
    %100 = tpu.matmul %98, %99, %cst_31 {dimension_numbers = #tpu.dot_dimension_numbers<[1], [0], [0], [1], [0, 0, 1, 1], [], []>} : vector<2x128xbf16>, vector<128x384xbf16>, vector<2x384xf32> -> vector<2x384xf32>
    %101 = vector.broadcast %12 : vector<1x384xf32> to vector<2x384xf32>
    %102 = arith.addf %100, %101 : vector<2x384xf32>
    %103 = vector.extract_strided_slice %102 {offsets = [0, 0], sizes = [2, 256], strides = [1, 1]} : vector<2x384xf32> to vector<2x256xf32>
    %104 = vector.extract_strided_slice %76 {offsets = [0, 0], sizes = [2, 256], strides = [1, 1]} : vector<2x384xf32> to vector<2x256xf32>
    %105 = arith.addf %103, %104 : vector<2x256xf32>
    %106 = arith.negf %105 : vector<2x256xf32>
    %107 = math.exp %106 : vector<2x256xf32>
    %cst_32 = arith.constant 1.000000e+00 : f32
    %108 = vector.broadcast %cst_32 : f32 to vector<2x256xf32>
    %109 = arith.addf %108, %107 : vector<2x256xf32>
    %110 = arith.divf %108, %109 : vector<2x256xf32>
    %111 = vector.extract_strided_slice %110 {offsets = [0, 0], sizes = [2, 128], strides = [1, 1]} : vector<2x256xf32> to vector<2x128xf32>
    %112 = vector.extract_strided_slice %110 {offsets = [0, 128], sizes = [2, 128], strides = [1, 1]} : vector<2x256xf32> to vector<2x128xf32>
    %113 = vector.extract_strided_slice %102 {offsets = [0, 256], sizes = [2, 128], strides = [1, 1]} : vector<2x384xf32> to vector<2x128xf32>
    %114 = vector.extract_strided_slice %76 {offsets = [0, 256], sizes = [2, 128], strides = [1, 1]} : vector<2x384xf32> to vector<2x128xf32>
    %115 = arith.mulf %111, %114 : vector<2x128xf32>
    %116 = arith.addf %113, %115 : vector<2x128xf32>
    %117 = math.tanh %116 : vector<2x128xf32>
    %118 = arith.subf %69, %117 : vector<2x128xf32>
    %119 = arith.mulf %112, %118 : vector<2x128xf32>
    %120 = arith.addf %117, %119 : vector<2x128xf32>
    %121 = tpu.concatenate %97, %120 in 1 : vector<2x128xf32>, vector<2x128xf32> -> vector<2x256xf32>
    %c2_i32 = arith.constant 2 : i32
    %122 = vector.extract_strided_slice %121 {offsets = [0, 0], sizes = [2, 128], strides = [1, 1]} : vector<2x256xf32> to vector<2x128xf32>
    %123 = vector.extract_strided_slice %121 {offsets = [0, 128], sizes = [2, 128], strides = [1, 1]} : vector<2x256xf32> to vector<2x128xf32>
    %124 = arith.truncf %121 : vector<2x256xf32> to vector<2x256xbf16>
    %c0_33 = arith.constant 0 : index
    %c0_34 = arith.constant 0 : index
    %125 = vector.load %arg4[%c0_33, %c0_34] : memref<256x768xbf16, #tpu.memory_space<vmem>>, vector<256x768xbf16>
    %cst_35 = arith.constant dense<0.000000e+00> : vector<2x768xf32>
    %126 = tpu.matmul %124, %125, %cst_35 {dimension_numbers = #tpu.dot_dimension_numbers<[1], [0], [0], [1], [0, 0, 1, 1], [], []>} : vector<2x256xbf16>, vector<256x768xbf16>, vector<2x768xf32> -> vector<2x768xf32>
    %127 = vector.broadcast %11 : vector<1x768xf32> to vector<2x768xf32>
    %128 = arith.addf %126, %127 : vector<2x768xf32>
    %129 = vector.extract_strided_slice %128 {offsets = [0, 0], sizes = [2, 384], strides = [1, 1]} : vector<2x768xf32> to vector<2x384xf32>
    %130 = vector.extract_strided_slice %128 {offsets = [0, 384], sizes = [2, 384], strides = [1, 1]} : vector<2x768xf32> to vector<2x384xf32>
    %131 = arith.index_cast %c2_i32 : i32 to index
    %c0_36 = arith.constant 0 : index
    %c0_37 = arith.constant 0 : index
    %132 = vector.load %arg11[%131, %c0_36, %c0_37] : memref<8x2x384xf32, #tpu.memory_space<vmem>>, vector<1x2x384xf32>
    %133 = vector.shape_cast %132 : vector<1x2x384xf32> to vector<2x384xf32>
    %134 = vector.extract_strided_slice %133 {offsets = [0, 0], sizes = [2, 256], strides = [1, 1]} : vector<2x384xf32> to vector<2x256xf32>
    %135 = vector.extract_strided_slice %129 {offsets = [0, 0], sizes = [2, 256], strides = [1, 1]} : vector<2x384xf32> to vector<2x256xf32>
    %136 = arith.addf %134, %135 : vector<2x256xf32>
    %137 = arith.negf %136 : vector<2x256xf32>
    %138 = math.exp %137 : vector<2x256xf32>
    %cst_38 = arith.constant 1.000000e+00 : f32
    %139 = vector.broadcast %cst_38 : f32 to vector<2x256xf32>
    %140 = arith.addf %139, %138 : vector<2x256xf32>
    %141 = arith.divf %139, %140 : vector<2x256xf32>
    %142 = vector.extract_strided_slice %141 {offsets = [0, 0], sizes = [2, 128], strides = [1, 1]} : vector<2x256xf32> to vector<2x128xf32>
    %143 = vector.extract_strided_slice %141 {offsets = [0, 128], sizes = [2, 128], strides = [1, 1]} : vector<2x256xf32> to vector<2x128xf32>
    %144 = vector.extract_strided_slice %133 {offsets = [0, 256], sizes = [2, 128], strides = [1, 1]} : vector<2x384xf32> to vector<2x128xf32>
    %145 = vector.extract_strided_slice %129 {offsets = [0, 256], sizes = [2, 128], strides = [1, 1]} : vector<2x384xf32> to vector<2x128xf32>
    %146 = arith.mulf %142, %145 : vector<2x128xf32>
    %147 = arith.addf %144, %146 : vector<2x128xf32>
    %148 = math.tanh %147 : vector<2x128xf32>
    %149 = arith.subf %122, %148 : vector<2x128xf32>
    %150 = arith.mulf %143, %149 : vector<2x128xf32>
    %151 = arith.addf %148, %150 : vector<2x128xf32>
    %152 = arith.truncf %151 : vector<2x128xf32> to vector<2x128xbf16>
    %c0_39 = arith.constant 0 : index
    %c0_40 = arith.constant 0 : index
    %153 = vector.load %arg6[%c0_39, %c0_40] : memref<128x384xbf16, #tpu.memory_space<vmem>>, vector<128x384xbf16>
    %cst_41 = arith.constant dense<0.000000e+00> : vector<2x384xf32>
    %154 = tpu.matmul %152, %153, %cst_41 {dimension_numbers = #tpu.dot_dimension_numbers<[1], [0], [0], [1], [0, 0, 1, 1], [], []>} : vector<2x128xbf16>, vector<128x384xbf16>, vector<2x384xf32> -> vector<2x384xf32>
    %155 = vector.broadcast %12 : vector<1x384xf32> to vector<2x384xf32>
    %156 = arith.addf %154, %155 : vector<2x384xf32>
    %157 = vector.extract_strided_slice %156 {offsets = [0, 0], sizes = [2, 256], strides = [1, 1]} : vector<2x384xf32> to vector<2x256xf32>
    %158 = vector.extract_strided_slice %130 {offsets = [0, 0], sizes = [2, 256], strides = [1, 1]} : vector<2x384xf32> to vector<2x256xf32>
    %159 = arith.addf %157, %158 : vector<2x256xf32>
    %160 = arith.negf %159 : vector<2x256xf32>
    %161 = math.exp %160 : vector<2x256xf32>
    %cst_42 = arith.constant 1.000000e+00 : f32
    %162 = vector.broadcast %cst_42 : f32 to vector<2x256xf32>
    %163 = arith.addf %162, %161 : vector<2x256xf32>
    %164 = arith.divf %162, %163 : vector<2x256xf32>
    %165 = vector.extract_strided_slice %164 {offsets = [0, 0], sizes = [2, 128], strides = [1, 1]} : vector<2x256xf32> to vector<2x128xf32>
    %166 = vector.extract_strided_slice %164 {offsets = [0, 128], sizes = [2, 128], strides = [1, 1]} : vector<2x256xf32> to vector<2x128xf32>
    %167 = vector.extract_strided_slice %156 {offsets = [0, 256], sizes = [2, 128], strides = [1, 1]} : vector<2x384xf32> to vector<2x128xf32>
    %168 = vector.extract_strided_slice %130 {offsets = [0, 256], sizes = [2, 128], strides = [1, 1]} : vector<2x384xf32> to vector<2x128xf32>
    %169 = arith.mulf %165, %168 : vector<2x128xf32>
    %170 = arith.addf %167, %169 : vector<2x128xf32>
    %171 = math.tanh %170 : vector<2x128xf32>
    %172 = arith.subf %123, %171 : vector<2x128xf32>
    %173 = arith.mulf %166, %172 : vector<2x128xf32>
    %174 = arith.addf %171, %173 : vector<2x128xf32>
    %175 = tpu.concatenate %151, %174 in 1 : vector<2x128xf32>, vector<2x128xf32> -> vector<2x256xf32>
    %c3_i32 = arith.constant 3 : i32
    %176 = vector.extract_strided_slice %175 {offsets = [0, 0], sizes = [2, 128], strides = [1, 1]} : vector<2x256xf32> to vector<2x128xf32>
    %177 = vector.extract_strided_slice %175 {offsets = [0, 128], sizes = [2, 128], strides = [1, 1]} : vector<2x256xf32> to vector<2x128xf32>
    %178 = arith.truncf %175 : vector<2x256xf32> to vector<2x256xbf16>
    %c0_43 = arith.constant 0 : index
    %c0_44 = arith.constant 0 : index
    %179 = vector.load %arg4[%c0_43, %c0_44] : memref<256x768xbf16, #tpu.memory_space<vmem>>, vector<256x768xbf16>
    %cst_45 = arith.constant dense<0.000000e+00> : vector<2x768xf32>
    %180 = tpu.matmul %178, %179, %cst_45 {dimension_numbers = #tpu.dot_dimension_numbers<[1], [0], [0], [1], [0, 0, 1, 1], [], []>} : vector<2x256xbf16>, vector<256x768xbf16>, vector<2x768xf32> -> vector<2x768xf32>
    %181 = vector.broadcast %11 : vector<1x768xf32> to vector<2x768xf32>
    %182 = arith.addf %180, %181 : vector<2x768xf32>
    %183 = vector.extract_strided_slice %182 {offsets = [0, 0], sizes = [2, 384], strides = [1, 1]} : vector<2x768xf32> to vector<2x384xf32>
    %184 = vector.extract_strided_slice %182 {offsets = [0, 384], sizes = [2, 384], strides = [1, 1]} : vector<2x768xf32> to vector<2x384xf32>
    %185 = arith.index_cast %c3_i32 : i32 to index
    %c0_46 = arith.constant 0 : index
    %c0_47 = arith.constant 0 : index
    %186 = vector.load %arg11[%185, %c0_46, %c0_47] : memref<8x2x384xf32, #tpu.memory_space<vmem>>, vector<1x2x384xf32>
    %187 = vector.shape_cast %186 : vector<1x2x384xf32> to vector<2x384xf32>
    %188 = vector.extract_strided_slice %187 {offsets = [0, 0], sizes = [2, 256], strides = [1, 1]} : vector<2x384xf32> to vector<2x256xf32>
    %189 = vector.extract_strided_slice %183 {offsets = [0, 0], sizes = [2, 256], strides = [1, 1]} : vector<2x384xf32> to vector<2x256xf32>
    %190 = arith.addf %188, %189 : vector<2x256xf32>
    %191 = arith.negf %190 : vector<2x256xf32>
    %192 = math.exp %191 : vector<2x256xf32>
    %cst_48 = arith.constant 1.000000e+00 : f32
    %193 = vector.broadcast %cst_48 : f32 to vector<2x256xf32>
    %194 = arith.addf %193, %192 : vector<2x256xf32>
    %195 = arith.divf %193, %194 : vector<2x256xf32>
    %196 = vector.extract_strided_slice %195 {offsets = [0, 0], sizes = [2, 128], strides = [1, 1]} : vector<2x256xf32> to vector<2x128xf32>
    %197 = vector.extract_strided_slice %195 {offsets = [0, 128], sizes = [2, 128], strides = [1, 1]} : vector<2x256xf32> to vector<2x128xf32>
    %198 = vector.extract_strided_slice %187 {offsets = [0, 256], sizes = [2, 128], strides = [1, 1]} : vector<2x384xf32> to vector<2x128xf32>
    %199 = vector.extract_strided_slice %183 {offsets = [0, 256], sizes = [2, 128], strides = [1, 1]} : vector<2x384xf32> to vector<2x128xf32>
    %200 = arith.mulf %196, %199 : vector<2x128xf32>
    %201 = arith.addf %198, %200 : vector<2x128xf32>
    %202 = math.tanh %201 : vector<2x128xf32>
    %203 = arith.subf %176, %202 : vector<2x128xf32>
    %204 = arith.mulf %197, %203 : vector<2x128xf32>
    %205 = arith.addf %202, %204 : vector<2x128xf32>
    %206 = arith.truncf %205 : vector<2x128xf32> to vector<2x128xbf16>
    %c0_49 = arith.constant 0 : index
    %c0_50 = arith.constant 0 : index
    %207 = vector.load %arg6[%c0_49, %c0_50] : memref<128x384xbf16, #tpu.memory_space<vmem>>, vector<128x384xbf16>
    %cst_51 = arith.constant dense<0.000000e+00> : vector<2x384xf32>
    %208 = tpu.matmul %206, %207, %cst_51 {dimension_numbers = #tpu.dot_dimension_numbers<[1], [0], [0], [1], [0, 0, 1, 1], [], []>} : vector<2x128xbf16>, vector<128x384xbf16>, vector<2x384xf32> -> vector<2x384xf32>
    %209 = vector.broadcast %12 : vector<1x384xf32> to vector<2x384xf32>
    %210 = arith.addf %208, %209 : vector<2x384xf32>
    %211 = vector.extract_strided_slice %210 {offsets = [0, 0], sizes = [2, 256], strides = [1, 1]} : vector<2x384xf32> to vector<2x256xf32>
    %212 = vector.extract_strided_slice %184 {offsets = [0, 0], sizes = [2, 256], strides = [1, 1]} : vector<2x384xf32> to vector<2x256xf32>
    %213 = arith.addf %211, %212 : vector<2x256xf32>
    %214 = arith.negf %213 : vector<2x256xf32>
    %215 = math.exp %214 : vector<2x256xf32>
    %cst_52 = arith.constant 1.000000e+00 : f32
    %216 = vector.broadcast %cst_52 : f32 to vector<2x256xf32>
    %217 = arith.addf %216, %215 : vector<2x256xf32>
    %218 = arith.divf %216, %217 : vector<2x256xf32>
    %219 = vector.extract_strided_slice %218 {offsets = [0, 0], sizes = [2, 128], strides = [1, 1]} : vector<2x256xf32> to vector<2x128xf32>
    %220 = vector.extract_strided_slice %218 {offsets = [0, 128], sizes = [2, 128], strides = [1, 1]} : vector<2x256xf32> to vector<2x128xf32>
    %221 = vector.extract_strided_slice %210 {offsets = [0, 256], sizes = [2, 128], strides = [1, 1]} : vector<2x384xf32> to vector<2x128xf32>
    %222 = vector.extract_strided_slice %184 {offsets = [0, 256], sizes = [2, 128], strides = [1, 1]} : vector<2x384xf32> to vector<2x128xf32>
    %223 = arith.mulf %219, %222 : vector<2x128xf32>
    %224 = arith.addf %221, %223 : vector<2x128xf32>
    %225 = math.tanh %224 : vector<2x128xf32>
    %226 = arith.subf %177, %225 : vector<2x128xf32>
    %227 = arith.mulf %220, %226 : vector<2x128xf32>
    %228 = arith.addf %225, %227 : vector<2x128xf32>
    %229 = tpu.concatenate %205, %228 in 1 : vector<2x128xf32>, vector<2x128xf32> -> vector<2x256xf32>
    %c4_i32 = arith.constant 4 : i32
    %230 = vector.extract_strided_slice %229 {offsets = [0, 0], sizes = [2, 128], strides = [1, 1]} : vector<2x256xf32> to vector<2x128xf32>
    %231 = vector.extract_strided_slice %229 {offsets = [0, 128], sizes = [2, 128], strides = [1, 1]} : vector<2x256xf32> to vector<2x128xf32>
    %232 = arith.truncf %229 : vector<2x256xf32> to vector<2x256xbf16>
    %c0_53 = arith.constant 0 : index
    %c0_54 = arith.constant 0 : index
    %233 = vector.load %arg4[%c0_53, %c0_54] : memref<256x768xbf16, #tpu.memory_space<vmem>>, vector<256x768xbf16>
    %cst_55 = arith.constant dense<0.000000e+00> : vector<2x768xf32>
    %234 = tpu.matmul %232, %233, %cst_55 {dimension_numbers = #tpu.dot_dimension_numbers<[1], [0], [0], [1], [0, 0, 1, 1], [], []>} : vector<2x256xbf16>, vector<256x768xbf16>, vector<2x768xf32> -> vector<2x768xf32>
    %235 = vector.broadcast %11 : vector<1x768xf32> to vector<2x768xf32>
    %236 = arith.addf %234, %235 : vector<2x768xf32>
    %237 = vector.extract_strided_slice %236 {offsets = [0, 0], sizes = [2, 384], strides = [1, 1]} : vector<2x768xf32> to vector<2x384xf32>
    %238 = vector.extract_strided_slice %236 {offsets = [0, 384], sizes = [2, 384], strides = [1, 1]} : vector<2x768xf32> to vector<2x384xf32>
    %239 = arith.index_cast %c4_i32 : i32 to index
    %c0_56 = arith.constant 0 : index
    %c0_57 = arith.constant 0 : index
    %240 = vector.load %arg11[%239, %c0_56, %c0_57] : memref<8x2x384xf32, #tpu.memory_space<vmem>>, vector<1x2x384xf32>
    %241 = vector.shape_cast %240 : vector<1x2x384xf32> to vector<2x384xf32>
    %242 = vector.extract_strided_slice %241 {offsets = [0, 0], sizes = [2, 256], strides = [1, 1]} : vector<2x384xf32> to vector<2x256xf32>
    %243 = vector.extract_strided_slice %237 {offsets = [0, 0], sizes = [2, 256], strides = [1, 1]} : vector<2x384xf32> to vector<2x256xf32>
    %244 = arith.addf %242, %243 : vector<2x256xf32>
    %245 = arith.negf %244 : vector<2x256xf32>
    %246 = math.exp %245 : vector<2x256xf32>
    %cst_58 = arith.constant 1.000000e+00 : f32
    %247 = vector.broadcast %cst_58 : f32 to vector<2x256xf32>
    %248 = arith.addf %247, %246 : vector<2x256xf32>
    %249 = arith.divf %247, %248 : vector<2x256xf32>
    %250 = vector.extract_strided_slice %249 {offsets = [0, 0], sizes = [2, 128], strides = [1, 1]} : vector<2x256xf32> to vector<2x128xf32>
    %251 = vector.extract_strided_slice %249 {offsets = [0, 128], sizes = [2, 128], strides = [1, 1]} : vector<2x256xf32> to vector<2x128xf32>
    %252 = vector.extract_strided_slice %241 {offsets = [0, 256], sizes = [2, 128], strides = [1, 1]} : vector<2x384xf32> to vector<2x128xf32>
    %253 = vector.extract_strided_slice %237 {offsets = [0, 256], sizes = [2, 128], strides = [1, 1]} : vector<2x384xf32> to vector<2x128xf32>
    %254 = arith.mulf %250, %253 : vector<2x128xf32>
    %255 = arith.addf %252, %254 : vector<2x128xf32>
    %256 = math.tanh %255 : vector<2x128xf32>
    %257 = arith.subf %230, %256 : vector<2x128xf32>
    %258 = arith.mulf %251, %257 : vector<2x128xf32>
    %259 = arith.addf %256, %258 : vector<2x128xf32>
    %260 = arith.truncf %259 : vector<2x128xf32> to vector<2x128xbf16>
    %c0_59 = arith.constant 0 : index
    %c0_60 = arith.constant 0 : index
    %261 = vector.load %arg6[%c0_59, %c0_60] : memref<128x384xbf16, #tpu.memory_space<vmem>>, vector<128x384xbf16>
    %cst_61 = arith.constant dense<0.000000e+00> : vector<2x384xf32>
    %262 = tpu.matmul %260, %261, %cst_61 {dimension_numbers = #tpu.dot_dimension_numbers<[1], [0], [0], [1], [0, 0, 1, 1], [], []>} : vector<2x128xbf16>, vector<128x384xbf16>, vector<2x384xf32> -> vector<2x384xf32>
    %263 = vector.broadcast %12 : vector<1x384xf32> to vector<2x384xf32>
    %264 = arith.addf %262, %263 : vector<2x384xf32>
    %265 = vector.extract_strided_slice %264 {offsets = [0, 0], sizes = [2, 256], strides = [1, 1]} : vector<2x384xf32> to vector<2x256xf32>
    %266 = vector.extract_strided_slice %238 {offsets = [0, 0], sizes = [2, 256], strides = [1, 1]} : vector<2x384xf32> to vector<2x256xf32>
    %267 = arith.addf %265, %266 : vector<2x256xf32>
    %268 = arith.negf %267 : vector<2x256xf32>
    %269 = math.exp %268 : vector<2x256xf32>
    %cst_62 = arith.constant 1.000000e+00 : f32
    %270 = vector.broadcast %cst_62 : f32 to vector<2x256xf32>
    %271 = arith.addf %270, %269 : vector<2x256xf32>
    %272 = arith.divf %270, %271 : vector<2x256xf32>
    %273 = vector.extract_strided_slice %272 {offsets = [0, 0], sizes = [2, 128], strides = [1, 1]} : vector<2x256xf32> to vector<2x128xf32>
    %274 = vector.extract_strided_slice %272 {offsets = [0, 128], sizes = [2, 128], strides = [1, 1]} : vector<2x256xf32> to vector<2x128xf32>
    %275 = vector.extract_strided_slice %264 {offsets = [0, 256], sizes = [2, 128], strides = [1, 1]} : vector<2x384xf32> to vector<2x128xf32>
    %276 = vector.extract_strided_slice %238 {offsets = [0, 256], sizes = [2, 128], strides = [1, 1]} : vector<2x384xf32> to vector<2x128xf32>
    %277 = arith.mulf %273, %276 : vector<2x128xf32>
    %278 = arith.addf %275, %277 : vector<2x128xf32>
    %279 = math.tanh %278 : vector<2x128xf32>
    %280 = arith.subf %231, %279 : vector<2x128xf32>
    %281 = arith.mulf %274, %280 : vector<2x128xf32>
    %282 = arith.addf %279, %281 : vector<2x128xf32>
    %283 = tpu.concatenate %259, %282 in 1 : vector<2x128xf32>, vector<2x128xf32> -> vector<2x256xf32>
    %c5_i32 = arith.constant 5 : i32
    %284 = vector.extract_strided_slice %283 {offsets = [0, 0], sizes = [2, 128], strides = [1, 1]} : vector<2x256xf32> to vector<2x128xf32>
    %285 = vector.extract_strided_slice %283 {offsets = [0, 128], sizes = [2, 128], strides = [1, 1]} : vector<2x256xf32> to vector<2x128xf32>
    %286 = arith.truncf %283 : vector<2x256xf32> to vector<2x256xbf16>
    %c0_63 = arith.constant 0 : index
    %c0_64 = arith.constant 0 : index
    %287 = vector.load %arg4[%c0_63, %c0_64] : memref<256x768xbf16, #tpu.memory_space<vmem>>, vector<256x768xbf16>
    %cst_65 = arith.constant dense<0.000000e+00> : vector<2x768xf32>
    %288 = tpu.matmul %286, %287, %cst_65 {dimension_numbers = #tpu.dot_dimension_numbers<[1], [0], [0], [1], [0, 0, 1, 1], [], []>} : vector<2x256xbf16>, vector<256x768xbf16>, vector<2x768xf32> -> vector<2x768xf32>
    %289 = vector.broadcast %11 : vector<1x768xf32> to vector<2x768xf32>
    %290 = arith.addf %288, %289 : vector<2x768xf32>
    %291 = vector.extract_strided_slice %290 {offsets = [0, 0], sizes = [2, 384], strides = [1, 1]} : vector<2x768xf32> to vector<2x384xf32>
    %292 = vector.extract_strided_slice %290 {offsets = [0, 384], sizes = [2, 384], strides = [1, 1]} : vector<2x768xf32> to vector<2x384xf32>
    %293 = arith.index_cast %c5_i32 : i32 to index
    %c0_66 = arith.constant 0 : index
    %c0_67 = arith.constant 0 : index
    %294 = vector.load %arg11[%293, %c0_66, %c0_67] : memref<8x2x384xf32, #tpu.memory_space<vmem>>, vector<1x2x384xf32>
    %295 = vector.shape_cast %294 : vector<1x2x384xf32> to vector<2x384xf32>
    %296 = vector.extract_strided_slice %295 {offsets = [0, 0], sizes = [2, 256], strides = [1, 1]} : vector<2x384xf32> to vector<2x256xf32>
    %297 = vector.extract_strided_slice %291 {offsets = [0, 0], sizes = [2, 256], strides = [1, 1]} : vector<2x384xf32> to vector<2x256xf32>
    %298 = arith.addf %296, %297 : vector<2x256xf32>
    %299 = arith.negf %298 : vector<2x256xf32>
    %300 = math.exp %299 : vector<2x256xf32>
    %cst_68 = arith.constant 1.000000e+00 : f32
    %301 = vector.broadcast %cst_68 : f32 to vector<2x256xf32>
    %302 = arith.addf %301, %300 : vector<2x256xf32>
    %303 = arith.divf %301, %302 : vector<2x256xf32>
    %304 = vector.extract_strided_slice %303 {offsets = [0, 0], sizes = [2, 128], strides = [1, 1]} : vector<2x256xf32> to vector<2x128xf32>
    %305 = vector.extract_strided_slice %303 {offsets = [0, 128], sizes = [2, 128], strides = [1, 1]} : vector<2x256xf32> to vector<2x128xf32>
    %306 = vector.extract_strided_slice %295 {offsets = [0, 256], sizes = [2, 128], strides = [1, 1]} : vector<2x384xf32> to vector<2x128xf32>
    %307 = vector.extract_strided_slice %291 {offsets = [0, 256], sizes = [2, 128], strides = [1, 1]} : vector<2x384xf32> to vector<2x128xf32>
    %308 = arith.mulf %304, %307 : vector<2x128xf32>
    %309 = arith.addf %306, %308 : vector<2x128xf32>
    %310 = math.tanh %309 : vector<2x128xf32>
    %311 = arith.subf %284, %310 : vector<2x128xf32>
    %312 = arith.mulf %305, %311 : vector<2x128xf32>
    %313 = arith.addf %310, %312 : vector<2x128xf32>
    %314 = arith.truncf %313 : vector<2x128xf32> to vector<2x128xbf16>
    %c0_69 = arith.constant 0 : index
    %c0_70 = arith.constant 0 : index
    %315 = vector.load %arg6[%c0_69, %c0_70] : memref<128x384xbf16, #tpu.memory_space<vmem>>, vector<128x384xbf16>
    %cst_71 = arith.constant dense<0.000000e+00> : vector<2x384xf32>
    %316 = tpu.matmul %314, %315, %cst_71 {dimension_numbers = #tpu.dot_dimension_numbers<[1], [0], [0], [1], [0, 0, 1, 1], [], []>} : vector<2x128xbf16>, vector<128x384xbf16>, vector<2x384xf32> -> vector<2x384xf32>
    %317 = vector.broadcast %12 : vector<1x384xf32> to vector<2x384xf32>
    %318 = arith.addf %316, %317 : vector<2x384xf32>
    %319 = vector.extract_strided_slice %318 {offsets = [0, 0], sizes = [2, 256], strides = [1, 1]} : vector<2x384xf32> to vector<2x256xf32>
    %320 = vector.extract_strided_slice %292 {offsets = [0, 0], sizes = [2, 256], strides = [1, 1]} : vector<2x384xf32> to vector<2x256xf32>
    %321 = arith.addf %319, %320 : vector<2x256xf32>
    %322 = arith.negf %321 : vector<2x256xf32>
    %323 = math.exp %322 : vector<2x256xf32>
    %cst_72 = arith.constant 1.000000e+00 : f32
    %324 = vector.broadcast %cst_72 : f32 to vector<2x256xf32>
    %325 = arith.addf %324, %323 : vector<2x256xf32>
    %326 = arith.divf %324, %325 : vector<2x256xf32>
    %327 = vector.extract_strided_slice %326 {offsets = [0, 0], sizes = [2, 128], strides = [1, 1]} : vector<2x256xf32> to vector<2x128xf32>
    %328 = vector.extract_strided_slice %326 {offsets = [0, 128], sizes = [2, 128], strides = [1, 1]} : vector<2x256xf32> to vector<2x128xf32>
    %329 = vector.extract_strided_slice %318 {offsets = [0, 256], sizes = [2, 128], strides = [1, 1]} : vector<2x384xf32> to vector<2x128xf32>
    %330 = vector.extract_strided_slice %292 {offsets = [0, 256], sizes = [2, 128], strides = [1, 1]} : vector<2x384xf32> to vector<2x128xf32>
    %331 = arith.mulf %327, %330 : vector<2x128xf32>
    %332 = arith.addf %329, %331 : vector<2x128xf32>
    %333 = math.tanh %332 : vector<2x128xf32>
    %334 = arith.subf %285, %333 : vector<2x128xf32>
    %335 = arith.mulf %328, %334 : vector<2x128xf32>
    %336 = arith.addf %333, %335 : vector<2x128xf32>
    %337 = tpu.concatenate %313, %336 in 1 : vector<2x128xf32>, vector<2x128xf32> -> vector<2x256xf32>
    %c6_i32 = arith.constant 6 : i32
    %338 = vector.extract_strided_slice %337 {offsets = [0, 0], sizes = [2, 128], strides = [1, 1]} : vector<2x256xf32> to vector<2x128xf32>
    %339 = vector.extract_strided_slice %337 {offsets = [0, 128], sizes = [2, 128], strides = [1, 1]} : vector<2x256xf32> to vector<2x128xf32>
    %340 = arith.truncf %337 : vector<2x256xf32> to vector<2x256xbf16>
    %c0_73 = arith.constant 0 : index
    %c0_74 = arith.constant 0 : index
    %341 = vector.load %arg4[%c0_73, %c0_74] : memref<256x768xbf16, #tpu.memory_space<vmem>>, vector<256x768xbf16>
    %cst_75 = arith.constant dense<0.000000e+00> : vector<2x768xf32>
    %342 = tpu.matmul %340, %341, %cst_75 {dimension_numbers = #tpu.dot_dimension_numbers<[1], [0], [0], [1], [0, 0, 1, 1], [], []>} : vector<2x256xbf16>, vector<256x768xbf16>, vector<2x768xf32> -> vector<2x768xf32>
    %343 = vector.broadcast %11 : vector<1x768xf32> to vector<2x768xf32>
    %344 = arith.addf %342, %343 : vector<2x768xf32>
    %345 = vector.extract_strided_slice %344 {offsets = [0, 0], sizes = [2, 384], strides = [1, 1]} : vector<2x768xf32> to vector<2x384xf32>
    %346 = vector.extract_strided_slice %344 {offsets = [0, 384], sizes = [2, 384], strides = [1, 1]} : vector<2x768xf32> to vector<2x384xf32>
    %347 = arith.index_cast %c6_i32 : i32 to index
    %c0_76 = arith.constant 0 : index
    %c0_77 = arith.constant 0 : index
    %348 = vector.load %arg11[%347, %c0_76, %c0_77] : memref<8x2x384xf32, #tpu.memory_space<vmem>>, vector<1x2x384xf32>
    %349 = vector.shape_cast %348 : vector<1x2x384xf32> to vector<2x384xf32>
    %350 = vector.extract_strided_slice %349 {offsets = [0, 0], sizes = [2, 256], strides = [1, 1]} : vector<2x384xf32> to vector<2x256xf32>
    %351 = vector.extract_strided_slice %345 {offsets = [0, 0], sizes = [2, 256], strides = [1, 1]} : vector<2x384xf32> to vector<2x256xf32>
    %352 = arith.addf %350, %351 : vector<2x256xf32>
    %353 = arith.negf %352 : vector<2x256xf32>
    %354 = math.exp %353 : vector<2x256xf32>
    %cst_78 = arith.constant 1.000000e+00 : f32
    %355 = vector.broadcast %cst_78 : f32 to vector<2x256xf32>
    %356 = arith.addf %355, %354 : vector<2x256xf32>
    %357 = arith.divf %355, %356 : vector<2x256xf32>
    %358 = vector.extract_strided_slice %357 {offsets = [0, 0], sizes = [2, 128], strides = [1, 1]} : vector<2x256xf32> to vector<2x128xf32>
    %359 = vector.extract_strided_slice %357 {offsets = [0, 128], sizes = [2, 128], strides = [1, 1]} : vector<2x256xf32> to vector<2x128xf32>
    %360 = vector.extract_strided_slice %349 {offsets = [0, 256], sizes = [2, 128], strides = [1, 1]} : vector<2x384xf32> to vector<2x128xf32>
    %361 = vector.extract_strided_slice %345 {offsets = [0, 256], sizes = [2, 128], strides = [1, 1]} : vector<2x384xf32> to vector<2x128xf32>
    %362 = arith.mulf %358, %361 : vector<2x128xf32>
    %363 = arith.addf %360, %362 : vector<2x128xf32>
    %364 = math.tanh %363 : vector<2x128xf32>
    %365 = arith.subf %338, %364 : vector<2x128xf32>
    %366 = arith.mulf %359, %365 : vector<2x128xf32>
    %367 = arith.addf %364, %366 : vector<2x128xf32>
    %368 = arith.truncf %367 : vector<2x128xf32> to vector<2x128xbf16>
    %c0_79 = arith.constant 0 : index
    %c0_80 = arith.constant 0 : index
    %369 = vector.load %arg6[%c0_79, %c0_80] : memref<128x384xbf16, #tpu.memory_space<vmem>>, vector<128x384xbf16>
    %cst_81 = arith.constant dense<0.000000e+00> : vector<2x384xf32>
    %370 = tpu.matmul %368, %369, %cst_81 {dimension_numbers = #tpu.dot_dimension_numbers<[1], [0], [0], [1], [0, 0, 1, 1], [], []>} : vector<2x128xbf16>, vector<128x384xbf16>, vector<2x384xf32> -> vector<2x384xf32>
    %371 = vector.broadcast %12 : vector<1x384xf32> to vector<2x384xf32>
    %372 = arith.addf %370, %371 : vector<2x384xf32>
    %373 = vector.extract_strided_slice %372 {offsets = [0, 0], sizes = [2, 256], strides = [1, 1]} : vector<2x384xf32> to vector<2x256xf32>
    %374 = vector.extract_strided_slice %346 {offsets = [0, 0], sizes = [2, 256], strides = [1, 1]} : vector<2x384xf32> to vector<2x256xf32>
    %375 = arith.addf %373, %374 : vector<2x256xf32>
    %376 = arith.negf %375 : vector<2x256xf32>
    %377 = math.exp %376 : vector<2x256xf32>
    %cst_82 = arith.constant 1.000000e+00 : f32
    %378 = vector.broadcast %cst_82 : f32 to vector<2x256xf32>
    %379 = arith.addf %378, %377 : vector<2x256xf32>
    %380 = arith.divf %378, %379 : vector<2x256xf32>
    %381 = vector.extract_strided_slice %380 {offsets = [0, 0], sizes = [2, 128], strides = [1, 1]} : vector<2x256xf32> to vector<2x128xf32>
    %382 = vector.extract_strided_slice %380 {offsets = [0, 128], sizes = [2, 128], strides = [1, 1]} : vector<2x256xf32> to vector<2x128xf32>
    %383 = vector.extract_strided_slice %372 {offsets = [0, 256], sizes = [2, 128], strides = [1, 1]} : vector<2x384xf32> to vector<2x128xf32>
    %384 = vector.extract_strided_slice %346 {offsets = [0, 256], sizes = [2, 128], strides = [1, 1]} : vector<2x384xf32> to vector<2x128xf32>
    %385 = arith.mulf %381, %384 : vector<2x128xf32>
    %386 = arith.addf %383, %385 : vector<2x128xf32>
    %387 = math.tanh %386 : vector<2x128xf32>
    %388 = arith.subf %339, %387 : vector<2x128xf32>
    %389 = arith.mulf %382, %388 : vector<2x128xf32>
    %390 = arith.addf %387, %389 : vector<2x128xf32>
    %391 = tpu.concatenate %367, %390 in 1 : vector<2x128xf32>, vector<2x128xf32> -> vector<2x256xf32>
    %c7_i32 = arith.constant 7 : i32
    %392 = vector.extract_strided_slice %391 {offsets = [0, 0], sizes = [2, 128], strides = [1, 1]} : vector<2x256xf32> to vector<2x128xf32>
    %393 = vector.extract_strided_slice %391 {offsets = [0, 128], sizes = [2, 128], strides = [1, 1]} : vector<2x256xf32> to vector<2x128xf32>
    %394 = arith.truncf %391 : vector<2x256xf32> to vector<2x256xbf16>
    %c0_83 = arith.constant 0 : index
    %c0_84 = arith.constant 0 : index
    %395 = vector.load %arg4[%c0_83, %c0_84] : memref<256x768xbf16, #tpu.memory_space<vmem>>, vector<256x768xbf16>
    %cst_85 = arith.constant dense<0.000000e+00> : vector<2x768xf32>
    %396 = tpu.matmul %394, %395, %cst_85 {dimension_numbers = #tpu.dot_dimension_numbers<[1], [0], [0], [1], [0, 0, 1, 1], [], []>} : vector<2x256xbf16>, vector<256x768xbf16>, vector<2x768xf32> -> vector<2x768xf32>
    %397 = vector.broadcast %11 : vector<1x768xf32> to vector<2x768xf32>
    %398 = arith.addf %396, %397 : vector<2x768xf32>
    %399 = vector.extract_strided_slice %398 {offsets = [0, 0], sizes = [2, 384], strides = [1, 1]} : vector<2x768xf32> to vector<2x384xf32>
    %400 = vector.extract_strided_slice %398 {offsets = [0, 384], sizes = [2, 384], strides = [1, 1]} : vector<2x768xf32> to vector<2x384xf32>
    %401 = arith.index_cast %c7_i32 : i32 to index
    %c0_86 = arith.constant 0 : index
    %c0_87 = arith.constant 0 : index
    %402 = vector.load %arg11[%401, %c0_86, %c0_87] : memref<8x2x384xf32, #tpu.memory_space<vmem>>, vector<1x2x384xf32>
    %403 = vector.shape_cast %402 : vector<1x2x384xf32> to vector<2x384xf32>
    %404 = vector.extract_strided_slice %403 {offsets = [0, 0], sizes = [2, 256], strides = [1, 1]} : vector<2x384xf32> to vector<2x256xf32>
    %405 = vector.extract_strided_slice %399 {offsets = [0, 0], sizes = [2, 256], strides = [1, 1]} : vector<2x384xf32> to vector<2x256xf32>
    %406 = arith.addf %404, %405 : vector<2x256xf32>
    %407 = arith.negf %406 : vector<2x256xf32>
    %408 = math.exp %407 : vector<2x256xf32>
    %cst_88 = arith.constant 1.000000e+00 : f32
    %409 = vector.broadcast %cst_88 : f32 to vector<2x256xf32>
    %410 = arith.addf %409, %408 : vector<2x256xf32>
    %411 = arith.divf %409, %410 : vector<2x256xf32>
    %412 = vector.extract_strided_slice %411 {offsets = [0, 0], sizes = [2, 128], strides = [1, 1]} : vector<2x256xf32> to vector<2x128xf32>
    %413 = vector.extract_strided_slice %411 {offsets = [0, 128], sizes = [2, 128], strides = [1, 1]} : vector<2x256xf32> to vector<2x128xf32>
    %414 = vector.extract_strided_slice %403 {offsets = [0, 256], sizes = [2, 128], strides = [1, 1]} : vector<2x384xf32> to vector<2x128xf32>
    %415 = vector.extract_strided_slice %399 {offsets = [0, 256], sizes = [2, 128], strides = [1, 1]} : vector<2x384xf32> to vector<2x128xf32>
    %416 = arith.mulf %412, %415 : vector<2x128xf32>
    %417 = arith.addf %414, %416 : vector<2x128xf32>
    %418 = math.tanh %417 : vector<2x128xf32>
    %419 = arith.subf %392, %418 : vector<2x128xf32>
    %420 = arith.mulf %413, %419 : vector<2x128xf32>
    %421 = arith.addf %418, %420 : vector<2x128xf32>
    %422 = arith.truncf %421 : vector<2x128xf32> to vector<2x128xbf16>
    %c0_89 = arith.constant 0 : index
    %c0_90 = arith.constant 0 : index
    %423 = vector.load %arg6[%c0_89, %c0_90] : memref<128x384xbf16, #tpu.memory_space<vmem>>, vector<128x384xbf16>
    %cst_91 = arith.constant dense<0.000000e+00> : vector<2x384xf32>
    %424 = tpu.matmul %422, %423, %cst_91 {dimension_numbers = #tpu.dot_dimension_numbers<[1], [0], [0], [1], [0, 0, 1, 1], [], []>} : vector<2x128xbf16>, vector<128x384xbf16>, vector<2x384xf32> -> vector<2x384xf32>
    %425 = vector.broadcast %12 : vector<1x384xf32> to vector<2x384xf32>
    %426 = arith.addf %424, %425 : vector<2x384xf32>
    %427 = vector.extract_strided_slice %426 {offsets = [0, 0], sizes = [2, 256], strides = [1, 1]} : vector<2x384xf32> to vector<2x256xf32>
    %428 = vector.extract_strided_slice %400 {offsets = [0, 0], sizes = [2, 256], strides = [1, 1]} : vector<2x384xf32> to vector<2x256xf32>
    %429 = arith.addf %427, %428 : vector<2x256xf32>
    %430 = arith.negf %429 : vector<2x256xf32>
    %431 = math.exp %430 : vector<2x256xf32>
    %cst_92 = arith.constant 1.000000e+00 : f32
    %432 = vector.broadcast %cst_92 : f32 to vector<2x256xf32>
    %433 = arith.addf %432, %431 : vector<2x256xf32>
    %434 = arith.divf %432, %433 : vector<2x256xf32>
    %435 = vector.extract_strided_slice %434 {offsets = [0, 0], sizes = [2, 128], strides = [1, 1]} : vector<2x256xf32> to vector<2x128xf32>
    %436 = vector.extract_strided_slice %434 {offsets = [0, 128], sizes = [2, 128], strides = [1, 1]} : vector<2x256xf32> to vector<2x128xf32>
    %437 = vector.extract_strided_slice %426 {offsets = [0, 256], sizes = [2, 128], strides = [1, 1]} : vector<2x384xf32> to vector<2x128xf32>
    %438 = vector.extract_strided_slice %400 {offsets = [0, 256], sizes = [2, 128], strides = [1, 1]} : vector<2x384xf32> to vector<2x128xf32>
    %439 = arith.mulf %435, %438 : vector<2x128xf32>
    %440 = arith.addf %437, %439 : vector<2x128xf32>
    %441 = math.tanh %440 : vector<2x128xf32>
    %442 = arith.subf %393, %441 : vector<2x128xf32>
    %443 = arith.mulf %436, %442 : vector<2x128xf32>
    %444 = arith.addf %441, %443 : vector<2x128xf32>
    %445 = tpu.concatenate %421, %444 in 1 : vector<2x128xf32>, vector<2x128xf32> -> vector<2x256xf32>
    %c8_i32 = arith.constant 8 : i32
    %446 = vector.extract_strided_slice %445 {offsets = [0, 128], sizes = [2, 128], strides = [1, 1]} : vector<2x256xf32> to vector<2x128xf32>
    %447 = arith.truncf %446 : vector<2x128xf32> to vector<2x128xbf16>
    %c0_93 = arith.constant 0 : index
    %c0_94 = arith.constant 0 : index
    %448 = vector.load %arg8[%c0_93, %c0_94] : memref<128x128xbf16, #tpu.memory_space<vmem>>, vector<128x128xbf16>
    %cst_95 = arith.constant dense<0.000000e+00> : vector<2x128xf32>
    %449 = tpu.matmul %447, %448, %cst_95 {dimension_numbers = #tpu.dot_dimension_numbers<[1], [0], [0], [1], [0, 0, 1, 1], [], []>} : vector<2x128xbf16>, vector<128x128xbf16>, vector<2x128xf32> -> vector<2x128xf32>
    %c0_96 = arith.constant 0 : index
    %c0_97 = arith.constant 0 : index
    %450 = vector.load %arg9[%c0_96, %c0_97] : memref<1x128xf32, #tpu.memory_space<vmem>>, vector<1x128xf32>
    %451 = vector.broadcast %450 : vector<1x128xf32> to vector<2x128xf32>
    %452 = arith.addf %449, %451 : vector<2x128xf32>
    %c0_98 = arith.constant 0 : index
    %c0_99 = arith.constant 0 : index
    %453 = vector.load %arg10[%c0_98, %c0_99] : memref<2x128xf32, #tpu.memory_space<vmem>>, vector<2x128xf32>
    tpu.vector_store %arg10[%c0_98, %c0_99], %452 {strides = array<i32>} : memref<2x128xf32, #tpu.memory_space<vmem>>, vector<2x128xf32>,
    return
  }
  func.func @transform_0(%arg0: i32) -> (i32, i32, i32) {
    %c0_i32 = arith.constant 0 : i32
    %c0_i32_0 = arith.constant 0 : i32
    %c0_i32_1 = arith.constant 0 : i32
    %c0_i32_2 = arith.constant 0 : i32
    return %c0_i32, %c0_i32_0, %c0_i32_1 : i32, i32, i32
  }
  func.func @transform_1(%arg0: i32) -> (i32, i32) {
    %c0_i32 = arith.constant 0 : i32
    %c0_i32_0 = arith.constant 0 : i32
    %c0_i32_1 = arith.constant 0 : i32
    return %c0_i32, %c0_i32_0 : i32, i32
  }
  func.func @transform_2(%arg0: i32) -> (i32, i32) {
    %c0_i32 = arith.constant 0 : i32
    %c0_i32_0 = arith.constant 0 : i32
    %c0_i32_1 = arith.constant 0 : i32
    return %c0_i32, %c0_i32_0 : i32, i32
  }
  func.func @transform_3(%arg0: i32) -> (i32, i32) {
    %c0_i32 = arith.constant 0 : i32
    %c0_i32_0 = arith.constant 0 : i32
    %c0_i32_1 = arith.constant 0 : i32
    return %c0_i32, %c0_i32_0 : i32, i32
  }
  func.func @transform_4(%arg0: i32) -> (i32, i32) {
    %c0_i32 = arith.constant 0 : i32
    %c0_i32_0 = arith.constant 0 : i32
    %c0_i32_1 = arith.constant 0 : i32
    return %c0_i32, %c0_i32_0 : i32, i32
  }
  func.func @transform_5(%arg0: i32) -> (i32, i32) {
    %c0_i32 = arith.constant 0 : i32
    %c0_i32_0 = arith.constant 0 : i32
    %c0_i32_1 = arith.constant 0 : i32
    return %c0_i32, %c0_i32_0 : i32, i32
  }
  func.func @transform_6(%arg0: i32) -> (i32, i32) {
    %c0_i32 = arith.constant 0 : i32
    %c0_i32_0 = arith.constant 0 : i32
    %c0_i32_1 = arith.constant 0 : i32
    return %c0_i32, %c0_i32_0 : i32, i32
  }
  func.func @transform_7(%arg0: i32) -> (i32, i32) {
    %c0_i32 = arith.constant 0 : i32
    %c0_i32_0 = arith.constant 0 : i32
    %c0_i32_1 = arith.constant 0 : i32
    return %c0_i32, %c0_i32_0 : i32, i32
  }
  func.func @transform_8(%arg0: i32) -> (i32, i32) {
    %c0_i32 = arith.constant 0 : i32
    %c0_i32_0 = arith.constant 0 : i32
    %c0_i32_1 = arith.constant 0 : i32
    return %c0_i32, %c0_i32_0 : i32, i32
  }
  func.func @transform_9(%arg0: i32) -> (i32, i32) {
    %c0_i32 = arith.constant 0 : i32
    %c0_i32_0 = arith.constant 0 : i32
    %c0_i32_1 = arith.constant 0 : i32
    return %c0_i32, %c0_i32_0 : i32, i32
  }
}

</mosaic_0001>

<bundles_post_ra>
// kernel: tpu_custom_call.1
= control target key start
LH: loop header
LB: loop body
LE: loop exit
PB: predicated region body
PF: predicated region fallthrough
CT: control target
= control target key end

     0   :  { %14 = vsyncpa [#allocation4], 0  ;;  %s6066_s0 = inlined_call_operand.vmem [shape: f32[8,2,1], index: 0, kind: input, shape index: {}]   ;;  %s6067_s1 = inlined_call_operand.vmem [shape: f32[1,384], index: 1, kind: input, shape index: {}]   ;;  %s6068_s2 = inlined_call_operand.vmem [shape: f32[1,384], index: 2, kind: input, shape index: {}]   ;;  %s6069_s3 = inlined_call_operand.hbm [shape: bf16[256,768], index: 3, kind: input, shape index: {}]   ;;  %s6070_s4 = inlined_call_operand.vmem [shape: f32[1,768], index: 4, kind: input, shape index: {}]   ;;  %s6071_s5 = inlined_call_operand.hbm [shape: bf16[128,384], index: 5, kind: input, shape index: {}]   ;;  %s6072_s6 = inlined_call_operand.vmem [shape: f32[1,384], index: 6, kind: input, shape index: {}]   ;;  %s6073_s7 = inlined_call_operand.hbm [shape: bf16[128,128], index: 7, kind: input, shape index: {}]   ;;  %s6074_s8 = inlined_call_operand.vmem [shape: f32[1,128], index: 8, kind: input, shape index: {}]   ;;  %s6075_s9 = inlined_call_operand.hbm [shape: f32[2,128], index: 9, kind: output, shape index: {}]  }
   0x1   :  { %15 = vsyncpa [#allocation7], 0  ;;  %s42_s11 = sshll.u32 %s6071_s5, 4  ;;  %s43_s11 = int_to_ptr.hbm [resolvable:$true] %s42_s11 }
   0x2   :  { %16 = vsyncpa [#allocation5], 0  ;;  %s4289_s12 = smov [#allocation6]   ;;  %s27_s16 = sshll.u32 %s6069_s3, 4  ;;  %s28_s16 = int_to_ptr.hbm [resolvable:$true] %s27_s16 }
   0x3   :  { %s44_s13 = sshll.u32 %s4289_s12, 4  ;;  %s4290_s17 = smov 192   ;;  %s45_s13 = int_to_ptr.vmem [resolvable:$true] %s44_s13 }
   0x4   :  { %s4291_s18 = smov 12   ;;  %s4292_s19 = smov [#allocation3]  }
   0x5   :  { %50 = dma.hbm_to_vmem [thread:$0]  %s43_s11, 3072, %s45_s13, [#allocation7], %s4290_s17, %s4290_s17, %s4291_s18  }
   0x6   :  { %s29_s20 = sshll.u32 %s4292_s19, 4  ;;  %s4293_s21 = smov 384   ;;  %s30_s20 = int_to_ptr.vmem [resolvable:$true] %s29_s20 }
   0x7   :  { %s4294_s22 = smov 24   ;;  %s57_s24 = sshll.u32 %s6073_s7, 4  ;;  %s58_s24 = int_to_ptr.hbm [resolvable:$true] %s57_s24 }
   0x8   :  { %35 = dma.hbm_to_vmem [thread:$0]  %s28_s16, 12288, %s30_s20, [#allocation4], %s4293_s21, %s4293_s21, %s4294_s22  }
   0x9   :  { %s4295_s25 = smov [#allocation8]   ;;  %s4296_s27 = smov 64  }
   0xa   :  { %s59_s26 = sshll.u32 %s4295_s25, 4  ;;  %s4297_s3 = smov 4   ;;  %s60_s26 = int_to_ptr.vmem [resolvable:$true] %s59_s26 }
   0xb   :  { %65 = dma.hbm_to_vmem [thread:$0]  %s58_s24, 1024, %s60_s26, [#allocation7], %s4296_s27, %s4296_s27, %s4297_s3  }
   0xc   :  { %4283 = dma.done.wait [#allocation4], 12288  }
   0xd   :  { %4284 = vsyncadd [#allocation4], 4294955008 }
   0xe   :  { %4285 = dma.done.wait [#allocation7], 4096  }
   0xf   :  { %4286 = vsyncadd [#allocation7], 4294963200  ;;  %v6076_v0 = vmov 0   ;;  %v3550_v1 = vld [vmem:[#allocation3 + $0x150] sm:$0xf]  ;;  %vm233_vm0 = vcmask 1041408  }
  0x10   :  { %4055 = vset.pattern.permute.xlu0 %v6076_v0  ;;  %4056 = vset.pattern.permute.xlu1 %v6076_v0  ;;  %v3961_v2 = vld [vmem:[#allocation3 + $0x164] sm:$0xf0]  ;;  %v3958_v3 = vld [vmem:[#allocation3 + $0x154] sm:$0xf]  ;;  %v3552_v5 = vld [vmem:[#allocation3 + $0x168] sm:$0xf0] }
  0x11   :  { %4057 = vset.pattern.permute.xlu2 %v6076_v0  ;;  %v4362_v4 = vor.u32 %v3961_v2, %v3550_v1  ;;  %v4006_v6 = vld [vmem:[#allocation3 + $0x2d4] sm:$0xf]  ;;  %v3744_v7 = vld [vmem:[#allocation3 + $0x2e8] sm:$0xf0]  ;;  %v4364_v8 = vor.u32 %v3958_v3, %v3552_v5  ;;  %v3742_v10 = vld [vmem:[#allocation3 + $0x2d0] sm:$0xf] }
  0x12   :  { %v4366_v9 = vor.u32 %v4006_v6, %v3744_v7  ;;  %v4009_v11 = vld [vmem:[#allocation3 + $0x2e4] sm:$0xf0]  ;;  %v3526_v12 = vld [vmem:[#allocation3 + $0x120] sm:$0xf]  ;;  %v3955_v14 = vld [vmem:[#allocation3 + $0x134] sm:$0xf0] }
  0x13   :  { %6357 = vst [vmem:[#allocation13_spill] sm:$0xff] %v4362_v4  ;;  %858 = vmatpush.bf16.msra.mxu0 %v4362_v4  ;;  %v4369_v13 = vor.u32 %v4009_v11, %v3742_v10  ;;  %v3952_v15 = vld [vmem:[#allocation3 + $0x124] sm:$0xf]  ;;  %v3528_v16 = vld [vmem:[#allocation3 + $0x138] sm:$0xf0]  ;;  %884 = vmatpush.bf16.msra.mxu2 %v4364_v8  ;;  %v4373_v17 = vor.u32 %v3955_v14, %v3526_v12  ;;  %vm235_vm1 = vcmask 1043456  }
  0x14   :  { %6358 = vst [vmem:[#allocation14_spill] sm:$0xff] %v4364_v8  ;;  %897 = vmatpush.bf16.msra.mxu3 %v4366_v9  ;;  %v4375_v18 = vor.u32 %v3952_v15, %v3528_v16  ;;  %v4000_v19 = vld [vmem:[#allocation3 + $0x2a4] sm:$0xf]  ;;  %v3720_v20 = vld [vmem:[#allocation3 + $0x2b8] sm:$0xf0]  ;;  %s4299_s26 = smov [#allocation9]  }
  0x15   :  { %6359 = vst [vmem:[#allocation15_spill] sm:$0xff] %v4366_v9  ;;  %v3718_v21 = vld [vmem:[#allocation3 + $0x2a0] sm:$0xf]  ;;  %871 = vmatpush.bf16.msra.mxu1 %v4369_v13  ;;  %v4378_v22 = vor.u32 %v4000_v19, %v3720_v20  ;;  %v4003_v23 = vld [vmem:[#allocation3 + $0x2b4] sm:$0xf0]  ;;  %s3367_s27 = sshll.u32 %s4299_s26, 4  ;;  %s3368_s27 = int_to_ptr.vmem [resolvable:$true] %s3367_s27 }
  0x16   :  { %6360 = vst [vmem:[#allocation16_spill] sm:$0xff] %v4369_v13  ;;  %v3502_v24 = vld [vmem:[#allocation3 + $0xf0] sm:$0xf]  ;;  %v3949_v25 = vld [vmem:[#allocation3 + $0x104] sm:$0xf0]  ;;  %v4380_v26 = vor.u32 %v4003_v23, %v3718_v21  ;;  %s3369_s28 = sshll.u32 %s6075_s9, 4  ;;  %s3370_s28 = int_to_ptr.hbm [resolvable:$true] %s3369_s28 }
  0x17   :  { %6361 = vst [vmem:[#allocation17_spill] sm:$0xff] %v4373_v17  ;;  %v3946_v27 = vld [vmem:[#allocation3 + $0xf4] sm:$0xf]  ;;  %v3504_v28 = vld [vmem:[#allocation3 + $0x108] sm:$0xf0]  ;;  %859 = vmatpush.bf16.msra.mxu0 %v4373_v17  ;;  %v4383_v30 = vor.u32 %v3949_v25, %v3502_v24  ;;  %885 = vmatpush.bf16.msra.mxu2 %v4375_v18 }
  0x18   :  { %6362 = vst [vmem:[#allocation18_spill] sm:$0xff] %v4375_v18  ;;  %v3994_v29 = vld [vmem:[#allocation3 + $0x274] sm:$0xf]  ;;  %v3696_v31 = vld [vmem:[#allocation3 + $0x288] sm:$0xf0]  ;;  %898 = vmatpush.bf16.msra.mxu3 %v4378_v22  ;;  %v4387_v34 = vor.u32 %v3946_v27, %v3504_v28 }
  0x19   :  { %6363 = vst [vmem:[#allocation19_spill] sm:$0xff] %v4378_v22  ;;  %v3694_v32 = vld [vmem:[#allocation3 + $0x270] sm:$0xf]  ;;  %v3997_v33 = vld [vmem:[#allocation3 + $0x284] sm:$0xf0]  ;;  %v4389_v35 = vor.u32 %v3994_v29, %v3696_v31  ;;  %872 = vmatpush.bf16.msra.mxu1 %v4380_v26 }
  0x1a   :  { %6364 = vst [vmem:[#allocation20_spill] sm:$0xff] %v4380_v26  ;;  %v3478_v36 = vld [vmem:[#allocation3 + $0xc0] sm:$0xf]  ;;  %v3943_v37 = vld [vmem:[#allocation3 + $0xd4] sm:$0xf0]  ;;  %v4392_v39 = vor.u32 %v3997_v33, %v3694_v32 }
  0x1b   :  { %6365 = vst [vmem:[#allocation21_spill] sm:$0xff] %v4383_v30  ;;  %v3940_v38 = vld [vmem:[#allocation3 + $0xc4] sm:$0xf]  ;;  %v3480_v40 = vld [vmem:[#allocation3 + $0xd8] sm:$0xf0]  ;;  %860 = vmatpush.bf16.msra.mxu0 %v4383_v30  ;;  %v4395_v45 = vor.u32 %v3943_v37, %v3478_v36  ;;  %886 = vmatpush.bf16.msra.mxu2 %v4387_v34 }
  0x1c   :  { %6366 = vst [vmem:[#allocation22_spill] sm:$0xff] %v4387_v34  ;;  %v3988_v41 = vld [vmem:[#allocation3 + $0x244] sm:$0xf]  ;;  %v3672_v42 = vld [vmem:[#allocation3 + $0x258] sm:$0xf0]  ;;  %899 = vmatpush.bf16.msra.mxu3 %v4389_v35  ;;  %v4399_v46 = vor.u32 %v3940_v38, %v3480_v40 }
  0x1d   :  { %6367 = vst [vmem:[#allocation23_spill] sm:$0xff] %v4389_v35  ;;  %v3670_v43 = vld [vmem:[#allocation3 + $0x240] sm:$0xf]  ;;  %v3991_v44 = vld [vmem:[#allocation3 + $0x254] sm:$0xf0]  ;;  %v4401_v47 = vor.u32 %v3988_v41, %v3672_v42  ;;  %873 = vmatpush.bf16.msra.mxu1 %v4392_v39 }
  0x1e   :  { %6368 = vst [vmem:[#allocation24_spill] sm:$0xff] %v4392_v39  ;;  %v3454_v48 = vld [vmem:[#allocation3 + $0x90] sm:$0xf]  ;;  %v3937_v49 = vld [vmem:[#allocation3 + $0xa4] sm:$0xf0]  ;;  %v4404_v51 = vor.u32 %v3991_v44, %v3670_v43 }
  0x1f   :  { %6369 = vst [vmem:[#allocation25_spill] sm:$0xff] %v4395_v45  ;;  %v3934_v50 = vld [vmem:[#allocation3 + $0x94] sm:$0xf]  ;;  %v3456_v52 = vld [vmem:[#allocation3 + $0xa8] sm:$0xf0]  ;;  %861 = vmatpush.bf16.msra.mxu0 %v4395_v45  ;;  %v4407_v57 = vor.u32 %v3937_v49, %v3454_v48  ;;  %887 = vmatpush.bf16.msra.mxu2 %v4399_v46 }
  0x20   :  { %6370 = vst [vmem:[#allocation26_spill] sm:$0xff] %v4399_v46  ;;  %v3982_v53 = vld [vmem:[#allocation3 + $0x214] sm:$0xf]  ;;  %v3648_v54 = vld [vmem:[#allocation3 + $0x228] sm:$0xf0]  ;;  %900 = vmatpush.bf16.msra.mxu3 %v4401_v47  ;;  %v4414_v59 = vor.u32 %v3934_v50, %v3456_v52 }
  0x21   :  { %6371 = vst [vmem:[#allocation27_spill] sm:$0xff] %v4401_v47  ;;  %v3646_v55 = vld [vmem:[#allocation3 + $0x210] sm:$0xf]  ;;  %v3985_v56 = vld [vmem:[#allocation3 + $0x224] sm:$0xf0]  ;;  %v4416_v60 = vor.u32 %v3982_v53, %v3648_v54  ;;  %874 = vmatpush.bf16.msra.mxu1 %v4404_v51 }
  0x22   :  { %6372 = vst [vmem:[#allocation28_spill] sm:$0xff] %v4404_v51  ;;  %v81_v58 = vld [vmem:[%s6066_s0] sm:$0x3]  ;;  %v3430_v61 = vld [vmem:[#allocation3 + $0x60] sm:$0xf]  ;;  %v4419_v1 = vor.u32 %v3985_v56, %v3646_v55 }
  0x23   :  { %6373 = vst [vmem:[#allocation29_spill] sm:$0xff] %v4407_v57  ;;  %v3931_v62 = vld [vmem:[#allocation3 + $0x74] sm:$0xf0]  ;;  %v3928_v63 = vld [vmem:[#allocation3 + $0x64] sm:$0xf]  ;;  %92 = vperm.xlu0 %4055, %v81_v58   ;;  %862 = vmatpush.bf16.msra.mxu0 %v4407_v57 }
  0x24   :  { %6374 = vst [vmem:[#allocation30_spill] sm:$0xff] %v4414_v59  ;;  %v3432_v2 = vld [vmem:[#allocation3 + $0x78] sm:$0xf0]  ;;  %v3976_v3 = vld [vmem:[#allocation3 + $0x1e4] sm:$0xf]  ;;  %v4422_v10 = vor.u32 %v3931_v62, %v3430_v61  ;;  %888 = vmatpush.bf16.msra.mxu2 %v4414_v59  ;;  %901 = vmatpush.bf16.msra.mxu3 %v4416_v60 }
  0x25   :  { %6375 = vst [vmem:[#allocation31_spill] sm:$0xff] %v4416_v60  ;;  %v3624_v5 = vld [vmem:[#allocation3 + $0x1f8] sm:$0xf0]  ;;  %v3622_v6 = vld [vmem:[#allocation3 + $0x1e0] sm:$0xf]  ;;  %v4426_v11 = vor.u32 %v3928_v63, %v3432_v2  ;;  %875 = vmatpush.bf16.msra.mxu1 %v4419_v1 }
  0x26   :  { %6376 = vst [vmem:[#allocation32_spill] sm:$0xff] %v4419_v1  ;;  %v3979_v7 = vld [vmem:[#allocation3 + $0x1f4] sm:$0xf0]  ;;  %v4428_v12 = vor.u32 %v3976_v3, %v3624_v5  ;;  %v3406_v14 = vld [vmem:[#allocation3 + $0x30] sm:$0xf] }
  0x27   :  { %6377 = vst [vmem:[#allocation33_spill] sm:$0xff] %v4422_v10  ;;  %v3925_v15 = vld [vmem:[#allocation3 + $0x44] sm:$0xf0]  ;;  %v3922_v16 = vld [vmem:[#allocation3 + $0x34] sm:$0xf]  ;;  %v4431_v19 = vor.u32 %v3979_v7, %v3622_v6  ;;  %863 = vmatpush.bf16.msra.mxu0 %v4422_v10 }
  0x28   :  { %6378 = vst [vmem:[#allocation34_spill] sm:$0xff] %v4426_v11  ;;  %v3408_v20 = vld [vmem:[#allocation3 + $0x48] sm:$0xf0]  ;;  %v3970_v21 = vld [vmem:[#allocation3 + $0x1b4] sm:$0xf]  ;;  %v4437_v28 = vor.u32 %v3925_v15, %v3406_v14  ;;  %889 = vmatpush.bf16.msra.mxu2 %v4426_v11  ;;  %902 = vmatpush.bf16.msra.mxu3 %v4428_v12 }
  0x29   :  { %6379 = vst [vmem:[#allocation35_spill] sm:$0xff] %v4428_v12  ;;  %v3600_v23 = vld [vmem:[#allocation3 + $0x1c8] sm:$0xf0]  ;;  %v3598_v24 = vld [vmem:[#allocation3 + $0x1b0] sm:$0xf]  ;;  %v4441_v31 = vor.u32 %v3922_v16, %v3408_v20  ;;  %876 = vmatpush.bf16.msra.mxu1 %v4431_v19 }
  0x2a   :  { %6380 = vst [vmem:[#allocation36_spill] sm:$0xff] %v4431_v19  ;;  %v3973_v25 = vld [vmem:[#allocation3 + $0x1c4] sm:$0xf0]  ;;  %v82_v27 = vld [vmem:[%s6066_s0 + $0x2] sm:$0x3]  ;;  %v4443_v32 = vor.u32 %v3970_v21, %v3600_v23 }
  0x2b   :  { %6381 = vst [vmem:[#allocation37_spill] sm:$0xff] %v4437_v28  ;;  %v3382_v29 = vld [vmem:[#allocation3] sm:$0xf]  ;;  %v3919_v33 = vld [vmem:[#allocation3 + $0x14] sm:$0xf0]  ;;  %v4446_v38 = vor.u32 %v3973_v25, %v3598_v24  ;;  %97 = vperm.xlu0 %4055, %v82_v27   ;;  %864 = vmatpush.bf16.msra.mxu0 %v4437_v28 }
  0x2c   :  { %6382 = vst [vmem:[#allocation38_spill] sm:$0xff] %v4441_v31  ;;  %v3916_v36 = vld [vmem:[#allocation3 + $0x4] sm:$0xf]  ;;  %v3384_v37 = vld [vmem:[#allocation3 + $0x18] sm:$0xf0]  ;;  %v4449_v49 = vor.u32 %v3919_v33, %v3382_v29  ;;  %890 = vmatpush.bf16.msra.mxu2 %v4441_v31  ;;  %903 = vmatpush.bf16.msra.mxu3 %v4443_v32 }
  0x2d   :  { %6383 = vst [vmem:[#allocation39_spill] sm:$0xff] %v4443_v32  ;;  %v3964_v40 = vld [vmem:[#allocation3 + $0x184] sm:$0xf]  ;;  %v3576_v41 = vld [vmem:[#allocation3 + $0x198] sm:$0xf0]  ;;  %v4453_v53 = vor.u32 %v3916_v36, %v3384_v37  ;;  %877 = vmatpush.bf16.msra.mxu1 %v4446_v38 }
  0x2e   :  { %6384 = vst [vmem:[#allocation40_spill] sm:$0xff] %v4446_v38  ;;  %v3574_v42 = vld [vmem:[#allocation3 + $0x180] sm:$0xf]  ;;  %v3967_v43 = vld [vmem:[#allocation3 + $0x194] sm:$0xf0]  ;;  %v4455_v54 = vor.u32 %v3964_v40, %v3576_v41 }
  0x2f   :  { %v3558_v44 = vld [vmem:[#allocation3 + $0x158] sm:$0xf]  ;;  %v3962_v48 = vld [vmem:[#allocation3 + $0x16c] sm:$0xf0]  ;;  %6385 = vst [vmem:[#allocation41_spill] sm:$0xff] %v4449_v49  ;;  %v4458_v55 = vor.u32 %v3967_v43, %v3574_v42  ;;  %865 = vmatpush.bf16.msra.mxu0 %v4449_v49 }
  0x30   :  { %v3750_v50 = vld [vmem:[#allocation3 + $0x2d8] sm:$0xf]  ;;  %v4010_v52 = vld [vmem:[#allocation3 + $0x2ec] sm:$0xf0]  ;;  %6386 = vst [vmem:[#allocation42_spill] sm:$0xff] %v4453_v53  ;;  %v4460_v56 = vor.u32 %v3962_v48, %v3558_v44  ;;  %891 = vmatpush.bf16.msra.mxu2 %v4453_v53  ;;  %904 = vmatpush.bf16.msra.mxu3 %v4455_v54 }
  0x31   :  { %6387 = vst [vmem:[#allocation43_spill] sm:$0xff] %v4455_v54  ;;  %v4462_v58 = vor.u32 %v4010_v52, %v3750_v50  ;;  %v3534_v61 = vld [vmem:[#allocation3 + $0x128] sm:$0xf]  ;;  %v3956_v62 = vld [vmem:[#allocation3 + $0x13c] sm:$0xf0]  ;;  %878 = vmatpush.bf16.msra.mxu1 %v4458_v55 }
  0x32   :  { %6388 = vst [vmem:[#allocation44_spill] sm:$0xff] %v4458_v55  ;;  %v3726_v63 = vld [vmem:[#allocation3 + $0x2a8] sm:$0xf]  ;;  %v4004_v2 = vld [vmem:[#allocation3 + $0x2bc] sm:$0xf0]  ;;  %v4472_v5 = vor.u32 %v3956_v62, %v3534_v61  ;;  %866 = vmatmul.bf16.vlgmr.msra.gmra.mxu0 %v6076_v0 }
  0x33   :  { %6389 = vst [vmem:[#allocation45_spill] sm:$0xff] %v4460_v56  ;;  %v87_v3 = vld [vmem:[%s6066_s0 + $0xc] sm:$0x3]  ;;  %910 = vmatpush.bf16.msrb.mxu0 %v4460_v56  ;;  %v3510_v6 = vld [vmem:[#allocation3 + $0xf8] sm:$0xf]  ;;  %v4476_v15 = vor.u32 %v4004_v2, %v3726_v63  ;;  %892 = vmatmul.bf16.vlgmr.msra.gmra.mxu2 %v6076_v0 }
  0x34   :  { %6390 = vst [vmem:[#allocation46_spill] sm:$0xff] %v4462_v58  ;;  %v4007_v7 = vld [vmem:[#allocation3 + $0x2dc] sm:$0xf]  ;;  %v3752_v14 = vld [vmem:[#allocation3 + $0x2f0] sm:$0xf0]  ;;  %905 = vmatmul.bf16.vlgmr.msra.gmra.mxu3 %v6076_v0  ;;  %879 = vmatmul.bf16.vlgmr.msra.gmra.mxu1 %v6076_v0 }
  0x35   :  { %6391 = vst [vmem:[#allocation47_spill] sm:$0xff] %v4472_v5  ;;  %923 = vmatpush.bf16.msrb.mxu1 %v4462_v58  ;;  %v3950_v16 = vld [vmem:[#allocation3 + $0x10c] sm:$0xf0]  ;;  %v4478_v20 = vor.u32 %v4007_v7, %v3752_v14  ;;  %v4001_v21 = vld [vmem:[#allocation3 + $0x2ac] sm:$0xf]  ;;  %122 = vperm.xlu0 %4055, %v87_v3  }
  0x36   :  { %6392 = vst [vmem:[#allocation48_spill] sm:$0xff] %v4476_v15  ;;  %v3728_v23 = vld [vmem:[#allocation3 + $0x2c0] sm:$0xf0]  ;;  %v3702_v24 = vld [vmem:[#allocation3 + $0x278] sm:$0xf]  ;;  %v4484_v27 = vor.u32 %v3950_v16, %v3510_v6 }
  0x37   :  { %6393 = vst [vmem:[#allocation49_spill] sm:$0xff] %v4478_v20  ;;  %v3998_v25 = vld [vmem:[#allocation3 + $0x28c] sm:$0xf0]  ;;  %911 = vmatpush.bf16.msrb.mxu0 %v4472_v5  ;;  %v3486_v29 = vld [vmem:[#allocation3 + $0xc8] sm:$0xf]  ;;  %949 = vmatpush.bf16.msrb.mxu3 %v4478_v20  ;;  %v4487_v36 = vor.u32 %v4001_v21, %v3728_v23 }
  0x38   :  { %6394 = vst [vmem:[#allocation50_spill] sm:$0xff] %v4484_v27  ;;  %v3944_v33 = vld [vmem:[#allocation3 + $0xdc] sm:$0xf0]  ;;  %v3959_v37 = vld [vmem:[#allocation3 + $0x15c] sm:$0xf]  ;;  %v4490_v40 = vor.u32 %v3998_v25, %v3702_v24 }
  0x39   :  { %6395 = vst [vmem:[#allocation51_spill] sm:$0xff] %v4487_v36  ;;  %924 = vmatpush.bf16.msrb.mxu1 %v4476_v15  ;;  %v3995_v41 = vld [vmem:[#allocation3 + $0x27c] sm:$0xf]  ;;  %v3704_v42 = vld [vmem:[#allocation3 + $0x290] sm:$0xf0]  ;;  %v4495_v62 = vor.u32 %v3944_v33, %v3486_v29 }
  0x3a   :  { %6396 = vst [vmem:[#allocation52_spill] sm:$0xff] %v4490_v40  ;;  %v3560_v43 = vld [vmem:[#allocation3 + $0x170] sm:$0xf0]  ;;  %v3678_v44 = vld [vmem:[#allocation3 + $0x248] sm:$0xf]  ;;  %v4498_v3 = vor.u32 %v3995_v41, %v3704_v42 }
  0x3b   :  { %v3992_v48 = vld [vmem:[#allocation3 + $0x25c] sm:$0xf0]  ;;  %v4492_v50 = vor.u32 %v3959_v37, %v3560_v43  ;;  %v3953_v52 = vld [vmem:[#allocation3 + $0x12c] sm:$0xf]  ;;  %v3536_v61 = vld [vmem:[#allocation3 + $0x140] sm:$0xf0]  ;;  %912 = vmatpush.bf16.msrb.mxu0 %v4484_v27  ;;  %950 = vmatpush.bf16.msrb.mxu3 %v4487_v36 }
  0x3c   :  { %6398 = vst [vmem:[#allocation54_spill] sm:$0xff] %v4495_v62  ;;  %v3462_v63 = vld [vmem:[#allocation3 + $0x98] sm:$0xf]  ;;  %v3938_v2 = vld [vmem:[#allocation3 + $0xac] sm:$0xf0]  ;;  %v4501_v6 = vor.u32 %v3992_v48, %v3678_v44  ;;  %v4504_v16 = vor.u32 %v3953_v52, %v3536_v61 }
  0x3d   :  { %6397 = vst [vmem:[#allocation53_spill] sm:$0xff] %v4492_v50  ;;  %925 = vmatpush.bf16.msrb.mxu1 %v4490_v40  ;;  %v3989_v7 = vld [vmem:[#allocation3 + $0x24c] sm:$0xf]  ;;  %v3680_v14 = vld [vmem:[#allocation3 + $0x260] sm:$0xf0]  ;;  %936 = vmatpush.bf16.msrb.mxu2 %v4492_v50  ;;  %v4507_v24 = vor.u32 %v3938_v2, %v3462_v63 }
  0x3e   :  { %6399 = vst [vmem:[#allocation55_spill] sm:$0xff] %v4498_v3  ;;  %v3654_v21 = vld [vmem:[#allocation3 + $0x218] sm:$0xf]  ;;  %v3986_v23 = vld [vmem:[#allocation3 + $0x22c] sm:$0xf0]  ;;  %v4510_v29 = vor.u32 %v3989_v7, %v3680_v14 }
  0x3f   :  { %6400 = vst [vmem:[#allocation56_spill] sm:$0xff] %v4501_v6  ;;  %913 = vmatpush.bf16.msrb.mxu0 %v4495_v62  ;;  %v3438_v25 = vld [vmem:[#allocation3 + $0x68] sm:$0xf]  ;;  %951 = vmatpush.bf16.msrb.mxu3 %v4498_v3  ;;  %v4513_v33 = vor.u32 %v3986_v23, %v3654_v21  ;;  %v3932_v37 = vld [vmem:[#allocation3 + $0x7c] sm:$0xf0] }
  0x40   :  { %6401 = vst [vmem:[#allocation57_spill] sm:$0xff] %v4504_v16  ;;  %v3983_v41 = vld [vmem:[#allocation3 + $0x21c] sm:$0xf]  ;;  %v3656_v42 = vld [vmem:[#allocation3 + $0x230] sm:$0xf0]  ;;  %v4517_v48 = vor.u32 %v3932_v37, %v3438_v25 }
  0x41   :  { %6402 = vst [vmem:[#allocation58_spill] sm:$0xff] %v4507_v24  ;;  %926 = vmatpush.bf16.msrb.mxu1 %v4501_v6  ;;  %937 = vmatpush.bf16.msrb.mxu2 %v4504_v16  ;;  %v3630_v43 = vld [vmem:[#allocation3 + $0x1e8] sm:$0xf]  ;;  %v3980_v44 = vld [vmem:[#allocation3 + $0x1fc] sm:$0xf0]  ;;  %v4520_v61 = vor.u32 %v3983_v41, %v3656_v42 }
  0x42   :  { %6403 = vst [vmem:[#allocation59_spill] sm:$0xff] %v4510_v29  ;;  %v3414_v52 = vld [vmem:[#allocation3 + $0x38] sm:$0xf]  ;;  %v4523_v63 = vor.u32 %v3980_v44, %v3630_v43  ;;  %v3926_v2 = vld [vmem:[#allocation3 + $0x4c] sm:$0xf0] }
  0x43   :  { %6404 = vst [vmem:[#allocation60_spill] sm:$0xff] %v4513_v33  ;;  %914 = vmatpush.bf16.msrb.mxu0 %v4507_v24  ;;  %952 = vmatpush.bf16.msrb.mxu3 %v4510_v29  ;;  %v3977_v7 = vld [vmem:[#allocation3 + $0x1ec] sm:$0xf]  ;;  %v3632_v14 = vld [vmem:[#allocation3 + $0x200] sm:$0xf0]  ;;  %v4526_v0 = vor.u32 %v3926_v2, %v3414_v52 }
  0x44   :  { %6405 = vst [vmem:[#allocation61_spill] sm:$0xff] %v4517_v48  ;;  %v3606_v21 = vld [vmem:[#allocation3 + $0x1b8] sm:$0xf]  ;;  %v3974_v23 = vld [vmem:[#allocation3 + $0x1cc] sm:$0xf0]  ;;  %v4529_v37 = vor.u32 %v3977_v7, %v3632_v14 }
  0x45   :  { %6406 = vst [vmem:[#allocation62_spill] sm:$0xff] %v4520_v61  ;;  %927 = vmatpush.bf16.msrb.mxu1 %v4513_v33  ;;  %v3390_v25 = vld [vmem:[#allocation3 + $0x8] sm:$0xf]  ;;  %v4532_v41 = vor.u32 %v3974_v23, %v3606_v21  ;;  %v3920_v42 = vld [vmem:[#allocation3 + $0x1c] sm:$0xf0] }
  0x46   :  { %6407 = vst [vmem:[#allocation63_spill] sm:$0xff] %v4523_v63  ;;  %v3971_v43 = vld [vmem:[#allocation3 + $0x1bc] sm:$0xf]  ;;  %v3608_v44 = vld [vmem:[#allocation3 + $0x1d0] sm:$0xf0]  ;;  %v4535_v52 = vor.u32 %v3920_v42, %v3390_v25 }
  0x47   :  { %915 = vmatpush.bf16.msrb.mxu0 %v4517_v48  ;;  %6408 = vst [vmem:[#allocation64_spill] sm:$0xff] %v4526_v0  ;;  %953 = vmatpush.bf16.msrb.mxu3 %v4520_v61  ;;  %v3582_v33 = vld [vmem:[#allocation3 + $0x188] sm:$0xf]  ;;  %v3968_v29 = vld [vmem:[#allocation3 + $0x19c] sm:$0xf0]  ;;  %v4538_v2 = vor.u32 %v3971_v43, %v3608_v44 }
  0x48   :  { %6409 = vst [vmem:[#allocation65_spill] sm:$0xff] %v4529_v37  ;;  %v3758_v6 = vld [vmem:[#allocation3 + $0x2e0] sm:$0xf]  ;;  %v4011_v3 = vld [vmem:[#allocation3 + $0x2f4] sm:$0xf0]  ;;  %v4541_v7 = vor.u32 %v3968_v29, %v3582_v33  ;;  %v6417_v29 = vmov 0  }
  0x49   :  { %928 = vmatpush.bf16.msrb.mxu1 %v4523_v63  ;;  %6410 = vst [vmem:[#allocation66_spill] sm:$0xff] %v4532_v41  ;;  %v3965_v14 = vld [vmem:[#allocation3 + $0x18c] sm:$0xf]  ;;  %v3584_v21 = vld [vmem:[#allocation3 + $0x1a0] sm:$0xf0]  ;;  %v4543_v23 = vor.u32 %v4011_v3, %v3758_v6 }
  0x4a   :  { %6411 = vst [vmem:[#allocation67_spill] sm:$0xff] %v4535_v52  ;;  %v4008_v63 = vld [vmem:[#allocation3 + $0x2e4] sm:$0xf]  ;;  %v3760_v61 = vld [vmem:[#allocation3 + $0x2f8] sm:$0xf0]  ;;  %v4547_v25 = vor.u32 %v3965_v14, %v3584_v21 }
  0x4b   :  { %916 = vmatpush.bf16.msrb.mxu0 %v4526_v0  ;;  %954 = vmatpush.bf16.msrb.mxu3 %v4529_v37  ;;  %6412 = vst [vmem:[#allocation68_spill] sm:$0xff] %v4538_v2  ;;  %v4550_v42 = vor.u32 %v4008_v63, %v3760_v61  ;;  %v3734_v3 = vld [vmem:[#allocation3 + $0x2b0] sm:$0xf]  ;;  %v4005_v6 = vld [vmem:[#allocation3 + $0x2c4] sm:$0xf0] }
  0x4c   :  { %6413 = vst [vmem:[#allocation69_spill] sm:$0xff] %v4541_v7  ;;  %v4558_v33 = vor.u32 %v4005_v6, %v3734_v3  ;;  %v4002_v43 = vld [vmem:[#allocation3 + $0x2b4] sm:$0xf]  ;;  %v3736_v44 = vld [vmem:[#allocation3 + $0x2c8] sm:$0xf0] }
  0x4d   :  { %929 = vmatpush.bf16.msrb.mxu1 %v4532_v41  ;;  %6414 = vst [vmem:[#allocation70_spill] sm:$0xff] %v4543_v23  ;;  %v4560_v61 = vor.u32 %v4002_v43, %v3736_v44  ;;  %v3947_v63 = vld [vmem:[#allocation3 + $0xfc] sm:$0xf]  ;;  %v3512_v14 = vld [vmem:[#allocation3 + $0x110] sm:$0xf0] }
  0x4e   :  { %6415 = vst [vmem:[#allocation71_spill] sm:$0xff] %v4547_v25  ;;  %v4563_v21 = vor.u32 %v3947_v63, %v3512_v14  ;;  %v3941_v3 = vld [vmem:[#allocation3 + $0xcc] sm:$0xf]  ;;  %v3488_v6 = vld [vmem:[#allocation3 + $0xe0] sm:$0xf0] }
  0x4f   :  { %917 = vmatpush.bf16.msrb.mxu0 %v4535_v52  ;;  %955 = vmatpush.bf16.msrb.mxu3 %v4538_v2  ;;  %6416 = vst [vmem:[#allocation72_spill] sm:$0xff] %v4550_v42  ;;  %v3712_v2 = vld [vmem:[#allocation3 + $0x298] sm:$0xf0]  ;;  %v4571_v44 = vor.u32 %v3941_v3, %v3488_v6  ;;  %v3686_v63 = vld [vmem:[#allocation3 + $0x250] sm:$0xf] }
  0x50   :  { %6418 = vst [vmem:[#allocation73_spill] sm:$0xff] %v4558_v33  ;;  %938 = vmatpush.bf16.msrb.mxu2 %v4563_v21  ;;  %v3993_v14 = vld [vmem:[#allocation3 + $0x264] sm:$0xf0]  ;;  %v3935_v41 = vld [vmem:[#allocation3 + $0x9c] sm:$0xf] }
  0x51   :  { %930 = vmatpush.bf16.msrb.mxu1 %v4541_v7  ;;  %6419 = vst [vmem:[#allocation74_spill] sm:$0xff] %v4560_v61  ;;  %v3996_v7 = vld [vmem:[#allocation3 + $0x284] sm:$0xf]  ;;  %v3464_v37 = vld [vmem:[#allocation3 + $0xb0] sm:$0xf0] }
  0x52   :  { %918 = vmatmul.bf16.vlgmr.msrb.gmra.mxu0 %v6417_v29  ;;  %6420 = vst [vmem:[#allocation75_spill] sm:$0xff] %v4563_v21  ;;  %v4569_v43 = vor.u32 %v3996_v7, %v3712_v2  ;;  %v4581_v2 = vor.u32 %v3935_v41, %v3464_v37  ;;  %v3662_v7 = vld [vmem:[#allocation3 + $0x220] sm:$0xf]  ;;  %v3987_v3 = vld [vmem:[#allocation3 + $0x234] sm:$0xf0] }
  0x53   :  { %956 = vmatpush.bf16.msrb.mxu3 %v4547_v25  ;;  %v3999_v25 = vld [vmem:[#allocation3 + $0x294] sm:$0xf0]  ;;  %6423 = vst [vmem:[#allocation78_spill] sm:$0xff] %v4571_v44  ;;  %v3984_v6 = vld [vmem:[#allocation3 + $0x224] sm:$0xf] }
  0x54   :  { %931 = vmatmul.bf16.vlgmr.msrb.gmra.mxu1 %v6417_v29  ;;  %6422 = vst [vmem:[#allocation77_spill] sm:$0xff] %v4569_v43  ;;  %939 = vmatpush.bf16.msrb.mxu2 %v4571_v44  ;;  %v3638_v37 = vld [vmem:[#allocation3 + $0x1f0] sm:$0xf]  ;;  %v3981_v41 = vld [vmem:[#allocation3 + $0x204] sm:$0xf0] }
  0x55   :  { %975 = vmatpush.bf16.msra.mxu1 %v4543_v23  ;;  %v3710_v23 = vld [vmem:[#allocation3 + $0x280] sm:$0xf]  ;;  %6426 = vst [vmem:[#allocation81_spill] sm:$0xff] %v4581_v2  ;;  %v3917_v44 = vld [vmem:[#allocation3 + $0xc] sm:$0xf] }
  0x56   :  { %957 = vmatmul.bf16.vlgmr.msrb.gmra.mxu3 %v6417_v29  ;;  %v3568_v15 = vld [vmem:[#allocation3 + $0x178] sm:$0xf0]  ;;  %v3969_v16 = vld [vmem:[#allocation3 + $0x1a4] sm:$0xf0]  ;;  %v3592_v20 = vld [vmem:[#allocation3 + $0x1a8] sm:$0xf0] }
  0x57   :  { %1001 = vmatpush.bf16.msra.mxu3 %v4550_v42  ;;  %v4566_v42 = vor.u32 %v3999_v25, %v3710_v23  ;;  %v3990_v23 = vld [vmem:[#allocation3 + $0x254] sm:$0xf]  ;;  %v3688_v25 = vld [vmem:[#allocation3 + $0x268] sm:$0xf0]  ;;  %v3957_v50 = vld [vmem:[#allocation3 + $0x144] sm:$0xf0] }
  0x58   :  { %940 = vmatpush.bf16.msrb.mxu2 %v4581_v2  ;;  %v3954_v54 = vld [vmem:[#allocation3 + $0x134] sm:$0xf] }
  0x59   :  { %976 = vmatpush.bf16.msra.mxu1 %v4558_v33  ;;  %6421 = vst [vmem:[#allocation76_spill] sm:$0xff] %v4566_v42  ;;  %v4578_v33 = vor.u32 %v3990_v23, %v3688_v25 }
  0x5b   :  { %1002 = vmatpush.bf16.msra.mxu3 %v4560_v61  ;;  %v4576_v61 = vor.u32 %v3993_v14, %v3686_v63  ;;  %6425 = vst [vmem:[#allocation80_spill] sm:$0xff] %v4578_v33  ;;  %v3929_v63 = vld [vmem:[#allocation3 + $0x6c] sm:$0xf]  ;;  %v3440_v14 = vld [vmem:[#allocation3 + $0x80] sm:$0xf0] }
  0x5c   :  { %v4589_v25 = vor.u32 %v3929_v63, %v3440_v14  ;;  %v3416_v63 = vld [vmem:[#allocation3 + $0x50] sm:$0xf0] }
  0x5d   :  { %977 = vmatpush.bf16.msra.mxu1 %v4566_v42  ;;  %6424 = vst [vmem:[#allocation79_spill] sm:$0xff] %v4576_v61  ;;  %v3664_v42 = vld [vmem:[#allocation3 + $0x238] sm:$0xf0] }
  0x5e   :  { %v4587_v23 = vor.u32 %v3984_v6, %v3664_v42  ;;  %6429 = vst [vmem:[#allocation84_spill] sm:$0xff] %v4589_v25  ;;  %941 = vmatpush.bf16.msrb.mxu2 %v4589_v25  ;;  %v3923_v6 = vld [vmem:[#allocation3 + $0x3c] sm:$0xf] }
  0x5f   :  { %1003 = vmatpush.bf16.msra.mxu3 %v4569_v43  ;;  %v4584_v43 = vor.u32 %v3987_v3, %v3662_v7  ;;  %v3978_v7 = vld [vmem:[#allocation3 + $0x1f4] sm:$0xf]  ;;  %v3640_v3 = vld [vmem:[#allocation3 + $0x208] sm:$0xf0]  ;;  %v4602_v14 = vor.u32 %v3923_v6, %v3416_v63 }
  0x60   :  { %6428 = vst [vmem:[#allocation83_spill] sm:$0xff] %v4587_v23  ;;  %v4599_v42 = vor.u32 %v3978_v7, %v3640_v3  ;;  %v3972_v3 = vld [vmem:[#allocation3 + $0x1c4] sm:$0xf] }
  0x61   :  { %978 = vmatpush.bf16.msra.mxu1 %v4576_v61  ;;  %6427 = vst [vmem:[#allocation82_spill] sm:$0xff] %v4584_v43  ;;  %v89_v61 = vld [vmem:[%s6067_s1] sm:$0x7] }
  0x62   :  { %6431 = vst [vmem:[#allocation86_spill] sm:$0xff] %v4599_v42  ;;  %v4610_v25 = vperm.slane %v89_v61, 1  ;;  %942 = vmatpush.bf16.msrb.mxu2 %v4602_v14  ;;  %v4615_v6 = vperm.slane %v89_v61, 2 }
  0x63   :  { %1004 = vmatpush.bf16.msra.mxu3 %v4578_v33  ;;  %v4594_v33 = vor.u32 %v3981_v41, %v3638_v37  ;;  %6432 = vst [vmem:[#allocation87_spill] sm:$0xff] %v4602_v14  ;;  %v3614_v37 = vld [vmem:[#allocation3 + $0x1c0] sm:$0xf]  ;;  %v3975_v41 = vld [vmem:[#allocation3 + $0x1d4] sm:$0xf0] }
  0x64   :  { %6434 = vst [vmem:[#allocation89_spill] sm:$0xff] %v4610_v25  ;;  %v4613_v7 = vor.u32 %v3975_v41, %v3614_v37  ;;  %v3566_v37 = vld [vmem:[#allocation3 + $0x160] sm:$0xf]  ;;  %v3963_v41 = vld [vmem:[#allocation3 + $0x174] sm:$0xf0] }
  0x65   :  { %979 = vmatpush.bf16.msra.mxu1 %v4584_v43  ;;  %6430 = vst [vmem:[#allocation85_spill] sm:$0xff] %v4594_v33  ;;  %v4608_v43 = vperm.slane %v89_v61, 0  ;;  %v4629_v61 = vor.u32 %v3963_v41, %v3566_v37  ;;  %v3960_v14 = vld [vmem:[#allocation3 + $0x164] sm:$0xf]  ;;  %v3853_v37 = vld [vmem:[#allocation6 + $0xb4] sm:$0xf0] }
  0x66   :  { %6435 = vst [vmem:[#allocation90_spill] sm:$0xff] %v4613_v7 }
  0x67   :  { %1005 = vmatpush.bf16.msra.mxu3 %v4587_v23  ;;  %v161_v23 = vld [vmem:[%s6068_s2] sm:$0x7]  ;;  %6433 = vst [vmem:[#allocation88_spill] sm:$0xff] %v4608_v43  ;;  %962 = vmatpush.bf16.msra.mxu0 %v4629_v61 }
  0x68   :  { %6436 = vst [vmem:[#allocation91_spill] sm:$0xff] %v4615_v6  ;;  %v4617_v63 = vperm.slane %v161_v23, 0  ;;  %v4621_v40 = vperm.slane %v161_v23, 1  ;;  %v4623_v21 = vperm.slane %v161_v23, 2  ;;  %v3966_v23 = vld [vmem:[#allocation3 + $0x194] sm:$0xf] }
  0x69   :  { %980 = vmatpush.bf16.msra.mxu1 %v4594_v33  ;;  %v3616_v33 = vld [vmem:[#allocation3 + $0x1d8] sm:$0xf0] }
  0x6a   :  { %6437 = vst [vmem:[#allocation92_spill] sm:$0xff] %v4617_v63  ;;  %v4619_v2 = vor.u32 %v3972_v3, %v3616_v33  ;;  %v3590_v33 = vld [vmem:[#allocation3 + $0x190] sm:$0xf]  ;;  %v4632_v3 = vor.u32 %v3960_v14, %v3568_v15 }
  0x6b   :  { %1006 = vmatpush.bf16.msra.mxu3 %v4599_v42  ;;  %v3392_v42 = vld [vmem:[#allocation3 + $0x20] sm:$0xf0]  ;;  %6439 = vst [vmem:[#allocation94_spill] sm:$0xff] %v4621_v40  ;;  %v3542_v14 = vld [vmem:[#allocation3 + $0x130] sm:$0xf] }
  0x6c   :  { %6438 = vst [vmem:[#allocation93_spill] sm:$0xff] %v4619_v2  ;;  %v4626_v36 = vor.u32 %v3917_v44, %v3392_v42  ;;  %v4635_v44 = vor.u32 %v3969_v16, %v3590_v33  ;;  %v4637_v42 = vor.u32 %v3966_v23, %v3592_v20  ;;  %v4647_v20 = vor.u32 %v3957_v50, %v3542_v14  ;;  %v3544_v16 = vld [vmem:[#allocation3 + $0x148] sm:$0xf0]  ;;  %v3518_v14 = vld [vmem:[#allocation3 + $0x100] sm:$0xf] }
  0x6d   :  { %6440 = vst [vmem:[#allocation95_spill] sm:$0xff] %v4623_v21  ;;  %981 = vmatpush.bf16.msra.mxu1 %v4613_v7 }
  0x6e   :  { %6441 = vst [vmem:[#allocation96_spill] sm:$0xff] %v4626_v36  ;;  %943 = vmatpush.bf16.msrb.mxu2 %v4626_v36  ;;  %963 = vmatpush.bf16.msra.mxu0 %v4647_v20 }
  0x6f   :  { %1007 = vmatpush.bf16.msra.mxu3 %v4619_v2  ;;  %6442 = vst [vmem:[#allocation97_spill] sm:$0xff] %v4632_v3  ;;  %v4033_v2 = vld [vmem:[#allocation6 + $0xac] sm:$0xf] }
  0x70   :  { %6443 = vst [vmem:[#allocation98_spill] sm:$0xff] %v4635_v44  ;;  %v4643_v15 = vor.u32 %v4033_v2, %v3853_v37  ;;  %v4030_v2 = vld [vmem:[#allocation6 + $0x94] sm:$0xf]  ;;  %v3841_v37 = vld [vmem:[#allocation6 + $0x9c] sm:$0xf0] }
  0x71   :  { %6444 = vst [vmem:[#allocation99_spill] sm:$0xff] %v4637_v42  ;;  %982 = vmatpush.bf16.msra.mxu1 %v4635_v44  ;;  %v4657_v50 = vor.u32 %v4030_v2, %v3841_v37  ;;  %944 = vmatmul.bf16.vlgmr.msrb.gmra.mxu2 %v6417_v29  ;;  %v3520_v44 = vld [vmem:[#allocation3 + $0x118] sm:$0xf0] }
  0x72   :  { %988 = vmatpush.bf16.msra.mxu2 %v4632_v3  ;;  %6445 = vst [vmem:[#allocation100_spill] sm:$0xff] %v4643_v15  ;;  %v3470_v3 = vld [vmem:[#allocation3 + $0xa0] sm:$0xf] }
  0x73   :  { %1008 = vmatpush.bf16.msra.mxu3 %v4637_v42  ;;  %v4655_v42 = vor.u32 %v3954_v54, %v3544_v16  ;;  %6447 = vst [vmem:[#allocation102_spill] sm:$0xff] %v4657_v50 }
  0x74   :  { %983 = vmatmul.bf16.vlgmr.msra.gmra.mxu1 %v6417_v29 }
  0x75   :  { %1233 = vmatpush.bf16.msrb.mxu1 %v4643_v15  ;;  %6446 = vst [vmem:[#allocation101_spill] sm:$0xff] %v4655_v42  ;;  %v3948_v15 = vld [vmem:[#allocation3 + $0x104] sm:$0xf] }
  0x76   :  { %1009 = vmatmul.bf16.vlgmr.msra.gmra.mxu3 %v6417_v29  ;;  %989 = vmatpush.bf16.msra.mxu2 %v4655_v42  ;;  %v4668_v16 = vor.u32 %v3948_v15, %v3520_v44  ;;  %v3942_v15 = vld [vmem:[#allocation3 + $0xd4] sm:$0xf] }
  0x77   :  { %1306 = vmatpush.bf16.msrb.mxu3 %v4362_v4 }
  0x78   :  { %6448 = vst [vmem:[#allocation103_spill] sm:$0xff] %v4668_v16 }
  0x79   :  { %1234 = vmatpush.bf16.msrb.mxu1 %v4657_v50 }
  0x7a   :  { %990 = vmatpush.bf16.msra.mxu2 %v4668_v16 }
  0x7b   :  { %1307 = vmatpush.bf16.msrb.mxu3 %v4373_v17  ;;  %v3945_v17 = vld [vmem:[#allocation3 + $0xe4] sm:$0xf0] }
  0x7f   :  { %1308 = vmatpush.bf16.msrb.mxu3 %v4383_v30 }
  0x83   :  { %1309 = vmatpush.bf16.msrb.mxu3 %v4395_v45 }
  0x87   :  { %1310 = vmatpush.bf16.msrb.mxu3 %v4407_v57 }
  0x8b   :  { %1311 = vmatpush.bf16.msrb.mxu3 %v4422_v10 }
  0x8f   :  { %1312 = vmatpush.bf16.msrb.mxu3 %v4437_v28 }
  0x93   :  { %1313 = vmatpush.bf16.msrb.mxu3 %v4449_v49 }
  0x95   :  { %v93_v58 = vpop.permute.xlu0 %92 }
  0x96   :  { %v137_v41 = vmul.f32 %v4608_v43, %v93_v58  ;;  %v138_v7 = vmul.f32 %v4610_v25, %v93_v58  ;;  %v139_v36 = vmul.f32 %v4615_v6, %v93_v58 }
  0x97   :  { %1358 = vmatpush.bf16.msra.mxu3 %v4460_v56 }
  0x98   :  { %v169_v33 = vadd.f32 %v4617_v63, %v137_v41  ;;  %v170_v23 = vadd.f32 %v4621_v40, %v138_v7  ;;  %v171_v58 = vadd.f32 %v4623_v21, %v139_v36  ;;  %v3951_v36 = vld [vmem:[#allocation3 + $0x114] sm:$0xf0] }
  0x99   :  { %v4663_v4 = vor.u32 %v3951_v36, %v3518_v14  ;;  %v3494_v36 = vld [vmem:[#allocation3 + $0xd0] sm:$0xf] }
  0x9a   :  { %v217_v41 = vrot.slane %v170_v23, 6  ;;  %v218_v7 = vrot.slane %v171_v58, 4  ;;  %v4027_v23 = vld [vmem:[#allocation6 + $0x7c] sm:$0xf]  ;;  %v3829_v58 = vld [vmem:[#allocation6 + $0x84] sm:$0xf0]  ;;  %v4678_v44 = vor.u32 %v3945_v17, %v3494_v36 }
  0x9b   :  { %964 = vmatpush.bf16.msra.mxu0 %v4663_v4  ;;  %v4672_v42 = vor.u32 %v4027_v23, %v3829_v58  ;;  %1359 = vmatpush.bf16.msra.mxu3 %v4472_v5 }
  0x9c   :  { %v234_v54 = vsel %vm233_vm0, %v169_v33, %v217_v41  ;;  %6450 = vst [vmem:[#allocation105_spill] sm:$0xff] %v4678_v44 }
  0x9d   :  { %v236_v2 = vsel %vm235_vm1, %v234_v54, %v218_v7  ;;  %v98_v37 = vpop.permute.xlu0 %97  ;;  %6449 = vst [vmem:[#allocation104_spill] sm:$0xff] %v4672_v42  ;;  %v3496_v7 = vld [vmem:[#allocation3 + $0xe8] sm:$0xf0]  ;;  %1235 = vmatpush.bf16.msrb.mxu1 %v4672_v42  ;;  %v3472_v42 = vld [vmem:[#allocation3 + $0xb8] sm:$0xf0] }
  0x9e   :  { %259 = vst [vmem:[#allocation2] sm:$0x3f] %v236_v2  ;;  %v140_v14 = vmul.f32 %v4608_v43, %v98_v37  ;;  %v141_v33 = vmul.f32 %v4610_v25, %v98_v37  ;;  %v142_v41 = vmul.f32 %v4615_v6, %v98_v37  ;;  %v4024_v2 = vld [vmem:[#allocation6 + $0x64] sm:$0xf]  ;;  %v3817_v37 = vld [vmem:[#allocation6 + $0x6c] sm:$0xf0]  ;;  %v4686_v50 = vor.u32 %v3942_v15, %v3496_v7 }
  0x9f   :  { %965 = vmatpush.bf16.msra.mxu0 %v4678_v44  ;;  %v4688_v17 = vor.u32 %v4024_v2, %v3817_v37  ;;  %v4021_v7 = vld [vmem:[#allocation6 + $0x4c] sm:$0xf]  ;;  %v3805_v2 = vld [vmem:[#allocation6 + $0x54] sm:$0xf0]  ;;  %v3933_v37 = vld [vmem:[#allocation3 + $0x84] sm:$0xf0]  ;;  %1360 = vmatpush.bf16.msra.mxu3 %v4484_v27 }
  0xa0   :  { %v172_v54 = vadd.f32 %v4617_v63, %v140_v14  ;;  %v173_v23 = vadd.f32 %v4621_v40, %v141_v33  ;;  %v174_v58 = vadd.f32 %v4623_v21, %v142_v41  ;;  %6451 = vst [vmem:[#allocation106_spill] sm:$0xff] %v4686_v50  ;;  %v3939_v14 = vld [vmem:[#allocation3 + $0xb4] sm:$0xf0]  ;;  %991 = vmatpush.bf16.msra.mxu2 %v4686_v50  ;;  %v3936_v41 = vld [vmem:[#allocation3 + $0xa4] sm:$0xf] }
  0xa1   :  { %6452 = vst [vmem:[#allocation107_spill] sm:$0xff] %v4688_v17  ;;  %v4691_v33 = vor.u32 %v3939_v14, %v3470_v3  ;;  %1236 = vmatpush.bf16.msrb.mxu1 %v4688_v17  ;;  %v4696_v15 = vor.u32 %v3936_v41, %v3472_v42  ;;  %v3446_v3 = vld [vmem:[#allocation3 + $0x70] sm:$0xf]  ;;  %v3448_v14 = vld [vmem:[#allocation3 + $0x88] sm:$0xf0] }
  0xa2   :  { %v219_v36 = vrot.slane %v173_v23, 6  ;;  %v220_v16 = vrot.slane %v174_v58, 4  ;;  %v4700_v58 = vor.u32 %v4021_v7, %v3805_v2  ;;  %v3924_v17 = vld [vmem:[#allocation3 + $0x44] sm:$0xf] }
  0xa3   :  { %6453 = vst [vmem:[#allocation108_spill] sm:$0xff] %v4691_v33  ;;  %966 = vmatpush.bf16.msra.mxu0 %v4691_v33  ;;  %1361 = vmatpush.bf16.msra.mxu3 %v4495_v62 }
  0xa4   :  { %v237_v30 = vsel %vm233_vm0, %v172_v54, %v219_v36  ;;  %6454 = vst [vmem:[#allocation109_spill] sm:$0xff] %v4696_v15  ;;  %992 = vmatpush.bf16.msra.mxu2 %v4696_v15  ;;  %v4703_v54 = vor.u32 %v3933_v37, %v3446_v3  ;;  %v3930_v36 = vld [vmem:[#allocation3 + $0x74] sm:$0xf]  ;;  %v3422_v3 = vld [vmem:[#allocation3 + $0x40] sm:$0xf] }
  0xa5   :  { %v238_v23 = vsel %vm235_vm1, %v237_v30, %v220_v16  ;;  %6455 = vst [vmem:[#allocation110_spill] sm:$0xff] %v4700_v58  ;;  %1237 = vmatpush.bf16.msrb.mxu1 %v4700_v58  ;;  %v4707_v42 = vor.u32 %v3930_v36, %v3448_v14  ;;  %v4018_v30 = vld [vmem:[#allocation6 + $0x34] sm:$0xf]  ;;  %v3793_v16 = vld [vmem:[#allocation6 + $0x3c] sm:$0xf0] }
  0xa6   :  { %260 = vst [vmem:[#allocation2 + $0x6] sm:$0x3f] %v238_v23  ;;  %v4713_v23 = vor.u32 %v4018_v30, %v3793_v16  ;;  %v3927_v37 = vld [vmem:[#allocation3 + $0x54] sm:$0xf0]  ;;  %v4015_v30 = vld [vmem:[#allocation6 + $0x1c] sm:$0xf] }
  0xa7   :  { %6456 = vst [vmem:[#allocation111_spill] sm:$0xff] %v4703_v54  ;;  %v123_v45 = vpop.permute.xlu0 %122  ;;  %967 = vmatpush.bf16.msra.mxu0 %v4703_v54  ;;  %v3781_v16 = vld [vmem:[#allocation6 + $0x24] sm:$0xf0]  ;;  %1362 = vmatpush.bf16.msra.mxu3 %v4507_v24 }
  0xa8   :  { %6457 = vst [vmem:[#allocation112_spill] sm:$0xff] %v4707_v42  ;;  %v155_v41 = vmul.f32 %v4608_v43, %v123_v45  ;;  %v156_v7 = vmul.f32 %v4610_v25, %v123_v45  ;;  %v157_v2 = vmul.f32 %v4615_v6, %v123_v45  ;;  %993 = vmatpush.bf16.msra.mxu2 %v4707_v42  ;;  %v3424_v25 = vld [vmem:[#allocation3 + $0x58] sm:$0xf0] }
  0xa9   :  { %6458 = vst [vmem:[#allocation113_spill] sm:$0xff] %v4713_v23  ;;  %v4719_v43 = vor.u32 %v3927_v37, %v3422_v3  ;;  %1238 = vmatpush.bf16.msrb.mxu1 %v4713_v23  ;;  %v4723_v45 = vor.u32 %v3924_v17, %v3424_v25  ;;  %v3851_v25 = vld [vmem:[#allocation6 + $0xa8] sm:$0xf]  ;;  %v4034_v17 = vld [vmem:[#allocation6 + $0xb0] sm:$0xf0] }
  0xaa   :  { %v187_v58 = vadd.f32 %v4617_v63, %v155_v41  ;;  %v188_v36 = vadd.f32 %v4621_v40, %v156_v7  ;;  %v189_v14 = vadd.f32 %v4623_v21, %v157_v2  ;;  %v4726_v41 = vor.u32 %v4015_v30, %v3781_v16  ;;  %v3398_v7 = vld [vmem:[#allocation3 + $0x10] sm:$0xf]  ;;  %v3921_v2 = vld [vmem:[#allocation3 + $0x24] sm:$0xf0]  ;;  %v3918_v21 = vld [vmem:[#allocation3 + $0x14] sm:$0xf] }
  0xab   :  { %6459 = vst [vmem:[#allocation114_spill] sm:$0xff] %v4723_v45  ;;  %968 = vmatpush.bf16.msra.mxu0 %v4719_v43  ;;  %v4730_v37 = vor.u32 %v3921_v2, %v3398_v7  ;;  %v3400_v40 = vld [vmem:[#allocation3 + $0x28] sm:$0xf0]  ;;  %v3859_v30 = vld [vmem:[#allocation6 + $0xb0] sm:$0xf]  ;;  %1363 = vmatpush.bf16.msra.mxu3 %v4517_v48 }
  0xac   :  { %v229_v6 = vrot.slane %v188_v36, 6  ;;  %v230_v57 = vrot.slane %v189_v14, 4  ;;  %6460 = vst [vmem:[#allocation115_spill] sm:$0xff] %v4726_v41  ;;  %994 = vmatpush.bf16.msra.mxu2 %v4723_v45  ;;  %v4735_v36 = vor.u32 %v3918_v21, %v3400_v40  ;;  %v4737_v14 = vor.u32 %v4034_v17, %v3851_v25  ;;  %v4035_v16 = vld [vmem:[#allocation6 + $0xb8] sm:$0xf0] }
  0xad   :  { %6461 = vst [vmem:[#allocation116_spill] sm:$0xff] %v4730_v37  ;;  %1239 = vmatpush.bf16.msrb.mxu1 %v4726_v41  ;;  %v3769_v2 = vld [vmem:[#allocation6 + $0xc] sm:$0xf0]  ;;  %v4031_v25 = vld [vmem:[#allocation6 + $0x98] sm:$0xf0] }
  0xae   :  { %v247_v3 = vsel %vm233_vm0, %v187_v58, %v229_v6  ;;  %6462 = vst [vmem:[#allocation117_spill] sm:$0xff] %v4735_v36  ;;  %v4012_v6 = vld [vmem:[#allocation6 + $0x4] sm:$0xf]  ;;  %v4742_v58 = vld [vmem:[%s6070_s4] sm:$0x3f] }
  0xaf   :  { %v248_v63 = vsel %vm235_vm1, %v247_v3, %v230_v57  ;;  %6463 = vst [vmem:[#allocation118_spill] sm:$0xff] %v4737_v14  ;;  %v867_v7 = vpop.f32.mrf.mxu0  ;;  %969 = vmatpush.bf16.msra.mxu0 %v4730_v37  ;;  %v4745_v57 = vor.u32 %v4035_v16, %v3859_v30  ;;  %v4748_v40 = vperm.slane %v4742_v58, 0  ;;  %v4751_v21 = vor.u32 %v4012_v6, %v3769_v2  ;;  %v3847_v17 = vld [vmem:[#allocation6 + $0x98] sm:$0xf]  ;;  %v4032_v16 = vld [vmem:[#allocation6 + $0xa0] sm:$0xf0] }
  0xb0   :  { %265 = vst [vmem:[#allocation2 + $0x24] sm:$0x3f] %v248_v63  ;;  %995 = vmatpush.bf16.msra.mxu2 %v4735_v36  ;;  %v3839_v63 = vld [vmem:[#allocation6 + $0x90] sm:$0xf]  ;;  %v4759_v28 = vperm.slane %v4742_v58, 1  ;;  %v4763_v6 = vor.u32 %v4032_v16, %v3847_v17  ;;  %1364 = vmatpush.bf16.msra.mxu3 %v4526_v0 }
  0xb1   :  { %6464 = vst [vmem:[#allocation119_spill] sm:$0xff] %v4745_v57  ;;  %v880_v3 = vpop.f32.mrf.mxu1  ;;  %1240 = vmatpush.bf16.msrb.mxu1 %v4751_v21  ;;  %v4756_v30 = vor.u32 %v4031_v25, %v3839_v63  ;;  %v868_v2 = vadd.f32 %v867_v7, %v4748_v40  ;;  %v3827_v63 = vld [vmem:[#allocation6 + $0x78] sm:$0xf]  ;;  %v4028_v25 = vld [vmem:[#allocation6 + $0x80] sm:$0xf0] }
  0xb2   :  { %6465 = vst [vmem:[#allocation120_spill] sm:$0xff] %v4748_v40  ;;  %970 = vmatmul.bf16.vlgmr.msra.gmra.mxu0 %v6417_v29  ;;  %v4029_v17 = vld [vmem:[#allocation6 + $0x88] sm:$0xf0]  ;;  %v3815_v23 = vld [vmem:[#allocation6 + $0x60] sm:$0xf] }
  0xb3   :  { %1220 = vmatpush.bf16.msrb.mxu0 %v4737_v14  ;;  %6466 = vst [vmem:[#allocation121_spill] sm:$0xff] %v4751_v21  ;;  %v3835_v21 = vld [vmem:[#allocation6 + $0x80] sm:$0xf]  ;;  %996 = vmatmul.bf16.vlgmr.msra.gmra.mxu2 %v6417_v29  ;;  %v881_v40 = vadd.f32 %v880_v3, %v868_v2  ;;  %v4022_v3 = vld [vmem:[#allocation6 + $0x50] sm:$0xf0] }
  0xb4   :  { %1246 = vmatpush.bf16.msrb.mxu2 %v4745_v57  ;;  %6467 = vst [vmem:[#allocation122_spill] sm:$0xff] %v4756_v30  ;;  %v4775_v7 = vor.u32 %v4029_v17, %v3835_v21  ;;  %v4025_v57 = vld [vmem:[#allocation6 + $0x68] sm:$0xf0]  ;;  %v3811_v2 = vld [vmem:[#allocation6 + $0x50] sm:$0xf]  ;;  %1365 = vmatpush.bf16.msra.mxu3 %v4535_v52 }
  0xb5   :  { %6468 = vst [vmem:[#allocation123_spill] sm:$0xff] %v4759_v28  ;;  %1332 = vmatpush.bf16.msra.mxu1 %v4364_v8  ;;  %v4771_v8 = vor.u32 %v4028_v25, %v3827_v63  ;;  %v4780_v63 = vor.u32 %v4025_v57, %v3815_v23  ;;  %v4785_v25 = vld [vmem:[#allocation2] sm:$0x3f] }
  0xb6   :  { %6469 = vst [vmem:[#allocation124_spill] sm:$0xff] %v4763_v6  ;;  %v893_v41 = vpop.f32.mrf.mxu2 }
  0xb7   :  { %1221 = vmatpush.bf16.msrb.mxu0 %v4756_v30  ;;  %v906_v10 = vpop.f32.mrf.mxu3  ;;  %6470 = vst [vmem:[#allocation125_spill] sm:$0xff] %v4771_v8  ;;  %v894_v16 = vadd.f32 %v893_v41, %v4759_v28  ;;  %v869_v56 = vpop.f32.mrf.mxu0  ;;  %v4026_v41 = vld [vmem:[#allocation6 + $0x70] sm:$0xf0]  ;;  %v3799_v28 = vld [vmem:[#allocation6 + $0x38] sm:$0xf] }
  0xb8   :  { %1247 = vmatpush.bf16.msrb.mxu2 %v4763_v6  ;;  %6471 = vst [vmem:[#allocation126_spill] sm:$0xff] %v4775_v7  ;;  %v3823_v6 = vld [vmem:[#allocation6 + $0x68] sm:$0xf] }
  0xb9   :  { %1333 = vmatpush.bf16.msra.mxu1 %v4375_v18  ;;  %v907_v29 = vadd.f32 %v906_v10, %v894_v16  ;;  %v882_v49 = vpop.f32.mrf.mxu1  ;;  %6472 = vst [vmem:[#allocation127_spill] sm:$0xff] %v4780_v63  ;;  %v4783_v21 = vor.u32 %v4026_v41, %v3823_v6  ;;  %v4023_v6 = vld [vmem:[#allocation6 + $0x58] sm:$0xf0] }
  0xba   :  { %v3803_v49 = vld [vmem:[#allocation6 + $0x48] sm:$0xf] }
  0xbb   :  { %1222 = vmatpush.bf16.msrb.mxu0 %v4771_v8  ;;  %v1017_v56 = vrot.slane %v907_v29, 6  ;;  %6473 = vst [vmem:[#allocation128_spill] sm:$0xff] %v4783_v21  ;;  %v4792_v16 = vor.u32 %v4022_v3, %v3803_v49  ;;  %v4795_v29 = vor.u32 %v4023_v6, %v3811_v2  ;;  %v4020_v49 = vld [vmem:[#allocation6 + $0x40] sm:$0xf0]  ;;  %v3779_v2 = vld [vmem:[#allocation6 + $0x18] sm:$0xf] }
  0xbc   :  { %1248 = vmatpush.bf16.msrb.mxu2 %v4775_v7  ;;  %v4803_v3 = vor.u32 %v4020_v49, %v3799_v28  ;;  %v4017_v6 = vld [vmem:[#allocation6 + $0x28] sm:$0xf0] }
  0xbd   :  { %1334 = vmatpush.bf16.msra.mxu1 %v4387_v34  ;;  %v1018_v10 = vsel %vm233_vm0, %v881_v40, %v1017_v56  ;;  %6474 = vst [vmem:[#allocation129_spill] sm:$0xff] %v4792_v16  ;;  %v3791_v40 = vld [vmem:[#allocation6 + $0x30] sm:$0xf]  ;;  %v4019_v56 = vld [vmem:[#allocation6 + $0x38] sm:$0xf0] }
  0xbe   :  { %v1020_v23 = vadd.f32 %v1018_v10, %v4785_v25  ;;  %v895_v57 = vpop.f32.mrf.mxu2  ;;  %6475 = vst [vmem:[#allocation130_spill] sm:$0xff] %v4795_v29  ;;  %v4800_v10 = vor.u32 %v4019_v56, %v3791_v40  ;;  %v3767_v56 = vld [vmem:[#allocation6] sm:$0xf]  ;;  %v4013_v49 = vld [vmem:[#allocation6 + $0x8] sm:$0xf0] }
  0xbf   :  { %1223 = vmatpush.bf16.msrb.mxu0 %v4780_v63  ;;  %v908_v17 = vpop.f32.mrf.mxu3  ;;  %6477 = vst [vmem:[#allocation132_spill] sm:$0xff] %v4803_v3  ;;  %v3787_v57 = vld [vmem:[#allocation6 + $0x20] sm:$0xf]  ;;  %v4816_v24 = vor.u32 %v4013_v49, %v3767_v56 }
  0xc0   :  { %1249 = vmatpush.bf16.msrb.mxu2 %v4783_v21  ;;  %v3764_v41 = vmul.f32 -1.442695, %v1020_v23  ;;  %6476 = vst [vmem:[#allocation131_spill] sm:$0xff] %v4800_v10  ;;  %v4016_v23 = vld [vmem:[#allocation6 + $0x20] sm:$0xf0] }
  0xc1   :  { %1335 = vmatpush.bf16.msra.mxu1 %v4399_v46  ;;  %v4808_v17 = vor.u32 %v4016_v23, %v3779_v2  ;;  %6480 = vst [vmem:[#allocation135_spill] sm:$0xff] %v4816_v24  ;;  %v4014_v2 = vld [vmem:[#allocation6 + $0x10] sm:$0xf0] }
  0xc2   :  { %4059 = vpow2.f32 %v3764_v41  ;;  %v4811_v41 = vor.u32 %v4017_v6, %v3787_v57 }
  0xc3   :  { %1224 = vmatpush.bf16.msrb.mxu0 %v4792_v16  ;;  %6478 = vst [vmem:[#allocation133_spill] sm:$0xff] %v4808_v17 }
  0xc4   :  { %1250 = vmatpush.bf16.msrb.mxu2 %v4795_v29  ;;  %6479 = vst [vmem:[#allocation134_spill] sm:$0xff] %v4811_v41 }
  0xc5   :  { %1336 = vmatpush.bf16.msra.mxu1 %v4414_v59  ;;  %v3775_v59 = vld [vmem:[#allocation6 + $0x8] sm:$0xf] }
  0xc6   :  { %v4821_v23 = vor.u32 %v4014_v2, %v3775_v59 }
  0xc7   :  { %1225 = vmatpush.bf16.msrb.mxu0 %v4800_v10 }
  0xc8   :  { %1251 = vmatpush.bf16.msrb.mxu2 %v4803_v3  ;;  %v4060_v40 = vpop.eup %4059  ;;  %6481 = vst [vmem:[#allocation136_spill] sm:$0xff] %v4821_v23 }
  0xc9   :  { %1337 = vmatpush.bf16.msra.mxu1 %v4426_v11  ;;  %v1024_v28 = vadd.f32 1.0, %v4060_v40  ;;  %v4828_v40 = vperm.slane %v4742_v58, 2 }
  0xcb   :  { %1226 = vmatpush.bf16.msrb.mxu0 %v4808_v17  ;;  %4061 = vrcp.f32 %v1024_v28  ;;  %6482 = vst [vmem:[#allocation137_spill] sm:$0xff] %v4828_v40  ;;  %v1036_v0 = vand.u32 2147483648, %v1024_v28  ;;  %v1034_v48 = vand.u32 2147483647, %v1024_v28  ;;  %vm1030_vm3 = vweird.f32 %v1024_v28 }
  0xcc   :  { %1252 = vmatpush.bf16.msrb.mxu2 %v4811_v41 }
  0xcd   :  { %1338 = vmatpush.bf16.msra.mxu1 %v4441_v31  ;;  %v1037_v46 = vor.u32 1.1754944e-38, %v1036_v0  ;;  %vm1035_vm5 = vcmp.eq.f32.partialorder %v1034_v48, 8.507059e+37  ;;  %v6483_v48 = vld [vmem:[#allocation43_spill] sm:$0xff] }
  0xcf   :  { %1227 = vmatpush.bf16.msrb.mxu0 %v4816_v24  ;;  %v919_v57 = vpop.f32.mrf.mxu0 }
  0xd0   :  { %1253 = vmatpush.bf16.msrb.mxu2 %v4821_v23  ;;  %v920_v49 = vadd.f32 %v919_v57, %v4828_v40 }
  0xd1   :  { %v932_v6 = vpop.f32.mrf.mxu1  ;;  %1339 = vmatpush.bf16.msra.mxu1 %v4453_v53  ;;  %v4062_v56 = vpop.eup %4061 }
  0xd2   :  { %v1026_v59 = vmul.f32 %v4062_v56, %v1024_v28  ;;  %vm1031_vm2 = vweird.f32 %v4062_v56  ;;  %v933_v52 = vadd.f32 %v932_v6, %v920_v49  ;;  %v6485_v28 = vld [vmem:[#allocation46_spill] sm:$0xff]  ;;  %v6486_v6 = vld [vmem:[#allocation49_spill] sm:$0xff]  ;;  %v6488_v49 = vld [vmem:[#allocation48_spill] sm:$0xff] }
  0xd3   :  { %1319 = vmatpush.bf16.msra.mxu0 %v4369_v13  ;;  %vm1032_vm4 = vmor %vm1030_vm3, %vm1031_vm2 }
  0xd4   :  { %1345 = vmatpush.bf16.msra.mxu2 %v4366_v9  ;;  %v1027_v2 = vsub.f32 1.0, %v1026_v59  ;;  %v1042_v59 = vrot.slane %v4785_v25, 4  ;;  %v6484_v25 = vld [vmem:[#allocation53_spill] sm:$0xff] }
  0xd6   :  { %v1028_v53 = vmul.f32 %v4062_v56, %v1027_v2  ;;  %v6489_v2 = vld [vmem:[#allocation51_spill] sm:$0xff] }
  0xd7   :  { %1320 = vmatpush.bf16.msra.mxu0 %v4380_v26  ;;  %v921_v31 = vpop.f32.mrf.mxu0 }
  0xd8   :  { %1346 = vmatpush.bf16.msra.mxu2 %v4378_v22  ;;  %v1029_v62 = vadd.f32 %v4062_v56, %v1028_v53 }
  0xd9   :  { %v934_v11 = vpop.f32.mrf.mxu1 }
  0xda   :  { %v1033_v27 = vsel %vm1032_vm4, %v4062_v56, %v1029_v62  ;;  %v6487_v56 = vld [vmem:[#allocation57_spill] sm:$0xff] }
  0xdb   :  { %1321 = vmatpush.bf16.msra.mxu0 %v4392_v39  ;;  %v1038_v57 = vsel %vm1035_vm5, %v1037_v46, %v1033_v27 }
  0xdc   :  { %1347 = vmatpush.bf16.msra.mxu2 %v4389_v35  ;;  %v1040_v31 = vmul.f32 %v1038_v57, %v933_v52  ;;  %v1048_v46 = vrot.slane %v1038_v57, 2  ;;  %v6490_v57 = vld [vmem:[#allocation75_spill] sm:$0xff] }
  0xde   :  { %v1044_v11 = vadd.f32 %v1042_v59, %v1040_v31  ;;  %v6491_v31 = vld [vmem:[#allocation52_spill] sm:$0xff]  ;;  %v6492_v59 = vld [vmem:[#allocation55_spill] sm:$0xff] }
  0xdf   :  { %1322 = vmatpush.bf16.msra.mxu0 %v4404_v51 }
  0xe0   :  { %1348 = vmatpush.bf16.msra.mxu2 %v4401_v47  ;;  %4063 = vtanh.f32 %v1044_v11  ;;  %v6493_v11 = vld [vmem:[#allocation78_spill] sm:$0xff] }
  0xe3   :  { %1323 = vmatpush.bf16.msra.mxu0 %v4419_v1 }
  0xe4   :  { %1349 = vmatpush.bf16.msra.mxu2 %v4416_v60 }
  0xe6   :  { %v4064_v0 = vpop.eup %4063 }
  0xe7   :  { %1324 = vmatpush.bf16.msra.mxu0 %v4431_v19  ;;  %v1046_v53 = vsub.f32 0.0, %v4064_v0 }
  0xe8   :  { %1350 = vmatpush.bf16.msra.mxu2 %v4428_v12 }
  0xe9   :  { %v1050_v27 = vmul.f32 %v1048_v46, %v1046_v53  ;;  %v6495_v53 = vld [vmem:[#allocation59_spill] sm:$0xff]  ;;  %v6496_v46 = vld [vmem:[#allocation81_spill] sm:$0xff] }
  0xeb   :  { %1325 = vmatpush.bf16.msra.mxu0 %v4446_v38  ;;  %v4846_v62 = vadd.f32 %v4064_v0, %v1050_v27  ;;  %v6494_v0 = vld [vmem:[#allocation56_spill] sm:$0xff] }
  0xec   :  { %1351 = vmatpush.bf16.msra.mxu2 %v4443_v32  ;;  %v6497_v27 = vld [vmem:[#allocation60_spill] sm:$0xff] }
  0xed   :  { %v4851_v52 = vpack.c.bf16 %v4846_v62, %v4846_v62 }
  0xef   :  { %1326 = vmatpush.bf16.msra.mxu0 %v4458_v55  ;;  %1241 = vmatmul.bf16.vlgmr.msrb.gmra.mxu1 %v4851_v52 }
  0xf0   :  { %1352 = vmatpush.bf16.msra.mxu2 %v6483_v48  ;;  %1228 = vmatmul.bf16.vlgmr.msrb.gmra.mxu0 %v4851_v52 }
  0xf1   :  { %1254 = vmatmul.bf16.vlgmr.msrb.gmra.mxu2 %v4851_v52  ;;  %1314 = vmatmul.bf16.vlgmr.msrb.gmra.mxu3 %v4851_v52 }
  0xf2   :  { %1384 = vmatpush.bf16.msrb.mxu1 %v6484_v25  ;;  %1410 = vmatpush.bf16.msrb.mxu3 %v4629_v61 }
  0xf3   :  { %1371 = vmatpush.bf16.msrb.mxu0 %v6485_v28 }
  0xf4   :  { %1397 = vmatpush.bf16.msrb.mxu2 %v6486_v6 }
  0xf6   :  { %1385 = vmatpush.bf16.msrb.mxu1 %v6487_v56  ;;  %1411 = vmatpush.bf16.msrb.mxu3 %v4647_v20 }
  0xf7   :  { %1372 = vmatpush.bf16.msrb.mxu0 %v6488_v49 }
  0xf8   :  { %1398 = vmatpush.bf16.msrb.mxu2 %v6489_v2 }
  0xfa   :  { %1386 = vmatpush.bf16.msrb.mxu1 %v6490_v57  ;;  %1412 = vmatpush.bf16.msrb.mxu3 %v4663_v4 }
  0xfb   :  { %1373 = vmatpush.bf16.msrb.mxu0 %v6491_v31  ;;  %v6498_v31 = vld [vmem:[#allocation62_spill] sm:$0xff] }
  0xfc   :  { %1399 = vmatpush.bf16.msrb.mxu2 %v6492_v59  ;;  %v6499_v59 = vld [vmem:[#allocation84_spill] sm:$0xff] }
  0xfe   :  { %1387 = vmatpush.bf16.msrb.mxu1 %v6493_v11  ;;  %1413 = vmatpush.bf16.msrb.mxu3 %v4678_v44  ;;  %v6500_v44 = vld [vmem:[#allocation63_spill] sm:$0xff]  ;;  %v6503_v11 = vld [vmem:[#allocation66_spill] sm:$0xff] }
  0xff   :  { %1374 = vmatpush.bf16.msrb.mxu0 %v6494_v0  ;;  %1340 = vmatmul.bf16.vlgmr.msra.gmra.mxu1 %v4851_v52  ;;  %v6501_v0 = vld [vmem:[#allocation65_spill] sm:$0xff] }
 0x100   :  { %1400 = vmatpush.bf16.msrb.mxu2 %v6495_v53  ;;  %v6502_v53 = vld [vmem:[#allocation87_spill] sm:$0xff] }
 0x101   :  { %1366 = vmatmul.bf16.vlgmr.msra.gmra.mxu3 %v4851_v52 }
 0x102   :  { %1388 = vmatpush.bf16.msrb.mxu1 %v6496_v46  ;;  %1414 = vmatpush.bf16.msrb.mxu3 %v4691_v33  ;;  %v6504_v46 = vld [vmem:[#allocation68_spill] sm:$0xff] }
 0x103   :  { %1375 = vmatpush.bf16.msrb.mxu0 %v6497_v27  ;;  %v6505_v33 = vld [vmem:[#allocation96_spill] sm:$0xff] }
 0x104   :  { %1401 = vmatpush.bf16.msrb.mxu2 %v6498_v31  ;;  %v958_v31 = vpop.f32.mrf.mxu3 }
 0x106   :  { %1389 = vmatpush.bf16.msrb.mxu1 %v6499_v59  ;;  %1415 = vmatpush.bf16.msrb.mxu3 %v4703_v54  ;;  %v6506_v59 = vld [vmem:[#allocation97_spill] sm:$0xff] }
 0x107   :  { %1376 = vmatpush.bf16.msrb.mxu0 %v6500_v44  ;;  %v6507_v54 = vld [vmem:[#allocation69_spill] sm:$0xff]  ;;  %v6508_v44 = vld [vmem:[#allocation71_spill] sm:$0xff] }
 0x108   :  { %1402 = vmatpush.bf16.msrb.mxu2 %v6501_v0 }
 0x10a   :  { %1390 = vmatpush.bf16.msrb.mxu1 %v6502_v53  ;;  %1416 = vmatpush.bf16.msrb.mxu3 %v4719_v43 }
 0x10b   :  { %1377 = vmatpush.bf16.msrb.mxu0 %v6503_v11  ;;  %v6509_v11 = vld [vmem:[#allocation101_spill] sm:$0xff] }
 0x10c   :  { %1403 = vmatpush.bf16.msrb.mxu2 %v6504_v46  ;;  %v6510_v46 = vld [vmem:[#allocation103_spill] sm:$0xff] }
 0x10e   :  { %1391 = vmatpush.bf16.msrb.mxu1 %v6505_v33  ;;  %1417 = vmatpush.bf16.msrb.mxu3 %v4730_v37  ;;  %v960_v33 = vpop.f32.mrf.mxu3  ;;  %v4899_v37 = vperm.slane %v4742_v58, 3 }
 0x10f   :  { %1378 = vmatpush.bf16.msrb.mxu0 %v6507_v54 }
 0x110   :  { %1404 = vmatpush.bf16.msrb.mxu2 %v6508_v44  ;;  %6511 = vst [vmem:[#allocation53_spill] sm:$0xff] %v4899_v37  ;;  %v945_v44 = vpop.f32.mrf.mxu2 }
 0x111   :  { %1392 = vmatmul.bf16.vlgmr.msrb.gmra.mxu1 %v4851_v52  ;;  %1418 = vmatmul.bf16.vlgmr.msrb.gmra.mxu3 %v4851_v52  ;;  %v946_v54 = vadd.f32 %v945_v44, %v4899_v37  ;;  %v6512_v44 = vld [vmem:[#allocation119_spill] sm:$0xff] }
 0x112   :  { %1436 = vmatpush.bf16.msra.mxu1 %v6506_v59  ;;  %1502 = vmatpush.bf16.msra.mxu3 %v4737_v14  ;;  %v984_v14 = vpop.f32.mrf.mxu1 }
 0x113   :  { %v959_v59 = vadd.f32 %v958_v31, %v946_v54  ;;  %v4917_v54 = vperm.slane %v4742_v58, 4  ;;  %v6514_v31 = vld [vmem:[#allocation124_spill] sm:$0xff] }
 0x115   :  { %6513 = vst [vmem:[#allocation46_spill] sm:$0xff] %v4917_v54 }
 0x116   :  { %1437 = vmatpush.bf16.msra.mxu1 %v6509_v11  ;;  %1503 = vmatpush.bf16.msra.mxu3 %v4756_v30  ;;  %v1010_v11 = vpop.f32.mrf.mxu3 }
 0x118   :  { %v947_v33 = vpop.f32.mrf.mxu2 }
 0x11a   :  { %1438 = vmatpush.bf16.msra.mxu1 %v6510_v46  ;;  %1504 = vmatpush.bf16.msra.mxu3 %v4771_v8  ;;  %v986_v46 = vpop.f32.mrf.mxu1 }
 0x11e   :  { %1439 = vmatpush.bf16.msra.mxu1 %v4686_v50  ;;  %1505 = vmatpush.bf16.msra.mxu3 %v4780_v63  ;;  %v1012_v8 = vpop.f32.mrf.mxu3 }
 0x122   :  { %1440 = vmatpush.bf16.msra.mxu1 %v4696_v15  ;;  %1506 = vmatpush.bf16.msra.mxu3 %v4792_v16 }
 0x126   :  { %1441 = vmatpush.bf16.msra.mxu1 %v4707_v42  ;;  %1507 = vmatpush.bf16.msra.mxu3 %v4800_v10 }
 0x12a   :  { %1442 = vmatpush.bf16.msra.mxu1 %v4723_v45  ;;  %1508 = vmatpush.bf16.msra.mxu3 %v4808_v17 }
 0x12e   :  { %1443 = vmatpush.bf16.msra.mxu1 %v4735_v36  ;;  %1509 = vmatpush.bf16.msra.mxu3 %v4816_v24  ;;  %v4925_v24 = vperm.slane %v4742_v58, 5 }
 0x12f   :  { %v971_v8 = vpop.f32.mrf.mxu0 }
 0x130   :  { %v972_v46 = vadd.f32 %v971_v8, %v4917_v54  ;;  %6515 = vst [vmem:[#allocation49_spill] sm:$0xff] %v4925_v24 }
 0x131   :  { %1444 = vmatmul.bf16.vlgmr.msra.gmra.mxu1 %v4851_v52 }
 0x132   :  { %1528 = vmatpush.bf16.msrb.mxu1 %v6512_v44  ;;  %1601 = vmatpush.bf16.msrb.mxu3 %v4369_v13  ;;  %v985_v33 = vadd.f32 %v984_v14, %v972_v46 }
 0x136   :  { %1529 = vmatpush.bf16.msrb.mxu1 %v6514_v31  ;;  %1602 = vmatpush.bf16.msrb.mxu3 %v4380_v26  ;;  %v997_v52 = vpop.f32.mrf.mxu2 }
 0x137   :  { %v998_v31 = vadd.f32 %v997_v52, %v4925_v24  ;;  %v973_v13 = vpop.f32.mrf.mxu0 }
 0x138   :  { %v268_v13 = vld [vmem:[%s6072_s6] sm:$0x7] }
 0x139   :  { %v4930_v26 = vadd.f32 %v1010_v11, %v998_v31  ;;  %v4951_v58 = vperm.slane %v268_v13, 0  ;;  %v4953_v11 = vperm.slane %v268_v13, 1 }
 0x13a   :  { %1530 = vmatpush.bf16.msrb.mxu1 %v4775_v7  ;;  %1603 = vmatpush.bf16.msrb.mxu3 %v4392_v39 }
 0x13b   :  { %6516 = vst [vmem:[#allocation57_spill] sm:$0xff] %v4951_v58 }
 0x13c   :  { %6517 = vst [vmem:[#allocation48_spill] sm:$0xff] %v4953_v11 }
 0x13e   :  { %1531 = vmatpush.bf16.msrb.mxu1 %v4783_v21  ;;  %1604 = vmatpush.bf16.msrb.mxu3 %v4404_v51  ;;  %v999_v14 = vpop.f32.mrf.mxu2 }
 0x142   :  { %1532 = vmatpush.bf16.msrb.mxu1 %v4795_v29  ;;  %1605 = vmatpush.bf16.msrb.mxu3 %v4419_v1 }
 0x146   :  { %1533 = vmatpush.bf16.msrb.mxu1 %v4803_v3  ;;  %1606 = vmatpush.bf16.msrb.mxu3 %v4431_v19 }
 0x14a   :  { %1534 = vmatpush.bf16.msrb.mxu1 %v4811_v41  ;;  %1607 = vmatpush.bf16.msrb.mxu3 %v4446_v38 }
 0x14e   :  { %1535 = vmatpush.bf16.msrb.mxu1 %v4821_v23  ;;  %1608 = vmatpush.bf16.msrb.mxu3 %v4458_v55 }
 0x152   :  { %1627 = vmatpush.bf16.msra.mxu1 %v4366_v9 }
 0x156   :  { %1628 = vmatpush.bf16.msra.mxu1 %v4378_v22 }
 0x15a   :  { %1629 = vmatpush.bf16.msra.mxu1 %v4389_v35 }
 0x15e   :  { %1630 = vmatpush.bf16.msra.mxu1 %v4401_v47 }
 0x162   :  { %1631 = vmatpush.bf16.msra.mxu1 %v4416_v60 }
 0x166   :  { %1632 = vmatpush.bf16.msra.mxu1 %v4428_v12 }
 0x16a   :  { %1633 = vmatpush.bf16.msra.mxu1 %v4443_v32 }
 0x16c   :  { %v1242_v8 = vpop.f32.mrf.mxu1 }
 0x16d   :  { %v1229_v31 = vpop.f32.mrf.mxu0  ;;  %v1243_v52 = vadd.f32 %v1242_v8, %v4953_v11 }
 0x16e   :  { %1634 = vmatpush.bf16.msra.mxu1 %v6483_v48  ;;  %v1230_v46 = vadd.f32 %v1229_v31, %v4951_v58 }
 0x16f   :  { %v1260_v12 = vadd.f32 %v1243_v52, %v985_v33 }
 0x170   :  { %v1259_v14 = vadd.f32 %v1230_v46, %v959_v59 }
 0x171   :  { %v3862_v32 = vmul.f32 -1.442695, %v1260_v12 }
 0x172   :  { %v3861_v60 = vmul.f32 -1.442695, %v1259_v14 }
 0x174   :  { %4065 = vpow2.f32 %v3861_v60  ;;  %v1255_v48 = vpop.f32.mrf.mxu2  ;;  %v4957_v47 = vpop.f32.mrf.mxu3 }
 0x175   :  { %4067 = vpow2.f32 %v3862_v32  ;;  %v1231_v35 = vpop.f32.mrf.mxu0  ;;  %v1244_v22 = vpop.f32.mrf.mxu1 }
 0x17a   :  { %v4066_v55 = vpop.eup %4065 }
 0x17b   :  { %v4068_v9 = vpop.eup %4067  ;;  %v1267_v23 = vadd.f32 1.0, %v4066_v55  ;;  %v4963_v55 = vperm.slane %v268_v13, 2 }
 0x17c   :  { %v1268_v38 = vadd.f32 1.0, %v4068_v9  ;;  %v1257_v41 = vpop.f32.mrf.mxu2  ;;  %v1317_v19 = vpop.f32.mrf.mxu3 }
 0x17d   :  { %4069 = vrcp.f32 %v1267_v23  ;;  %v4959_v31 = vpop.f32.mrf.mxu1  ;;  %v1280_v35 = vand.u32 2147483648, %v1267_v23  ;;  %v1278_v52 = vand.u32 2147483647, %v1267_v23  ;;  %vm1274_vm7 = vweird.f32 %v1267_v23 }
 0x17e   :  { %4071 = vrcp.f32 %v1268_v38  ;;  %v1256_v3 = vadd.f32 %v1255_v48, %v4963_v55  ;;  %vm1289_vm11 = vweird.f32 %v1268_v38 }
 0x17f   :  { %v1281_v41 = vor.u32 1.1754944e-38, %v1280_v35  ;;  %vm1279_vm9 = vcmp.eq.f32.partialorder %v1278_v52, 8.507059e+37 }
 0x183   :  { %v4070_v59 = vpop.eup %4069 }
 0x184   :  { %v4072_v33 = vpop.eup %4071  ;;  %v1270_v12 = vmul.f32 %v4070_v59, %v1267_v23  ;;  %v4961_v60 = vpop.f32.mrf.mxu3  ;;  %vm1275_vm6 = vweird.f32 %v4070_v59 }
 0x185   :  { %v1343_v8 = vpop.f32.mrf.mxu1  ;;  %v1285_v32 = vmul.f32 %v4072_v33, %v1268_v38  ;;  %vm1276_vm8 = vmor %vm1274_vm7, %vm1275_vm6  ;;  %vm1290_vm10 = vweird.f32 %v4072_v33 }
 0x186   :  { %v1271_v46 = vsub.f32 1.0, %v1270_v12  ;;  %vm1291_vm12 = vmor %vm1289_vm11, %vm1290_vm10 }
 0x187   :  { %v1286_v19 = vsub.f32 1.0, %v1285_v32  ;;  %v1293_v32 = vand.u32 2147483647, %v1268_v38 }
 0x188   :  { %v1272_v22 = vmul.f32 %v4070_v59, %v1271_v46 }
 0x189   :  { %v1287_v46 = vmul.f32 %v4072_v33, %v1286_v19  ;;  %vm1294_vm13 = vcmp.eq.f32.partialorder %v1293_v32, 8.507059e+37  ;;  %v6526_v32 = vld [vmem:[#allocation82_spill] sm:$0xff] }
 0x18a   :  { %v1273_v9 = vadd.f32 %v4070_v59, %v1272_v22  ;;  %v1295_v22 = vand.u32 2147483648, %v1268_v38  ;;  %v6519_v38 = vld [vmem:[#allocation72_spill] sm:$0xff] }
 0x18b   :  { %v1288_v13 = vadd.f32 %v4072_v33, %v1287_v46 }
 0x18c   :  { %v1277_v14 = vsel %vm1276_vm8, %v4070_v59, %v1273_v9  ;;  %v1369_v58 = vpop.f32.mrf.mxu3  ;;  %v1296_v52 = vor.u32 1.1754944e-38, %v1295_v22  ;;  %v6525_v22 = vld [vmem:[#allocation80_spill] sm:$0xff] }
 0x18d   :  { %v1282_v11 = vsel %vm1279_vm9, %v1281_v41, %v1277_v14  ;;  %v1292_v58 = vsel %vm1291_vm12, %v4072_v33, %v1288_v13  ;;  %v6520_v41 = vld [vmem:[#allocation73_spill] sm:$0xff]  ;;  %v6521_v33 = vld [vmem:[#allocation74_spill] sm:$0xff]  ;;  %v6522_v14 = vld [vmem:[#allocation76_spill] sm:$0xff] }
 0x18e   :  { %v1299_v12 = vmul.f32 %v1282_v11, %v4930_v26  ;;  %v4967_v8 = vpop.f32.mrf.mxu1  ;;  %v1297_v26 = vsel %vm1294_vm13, %v1296_v52, %v1292_v58  ;;  %v6524_v13 = vld [vmem:[#allocation79_spill] sm:$0xff]  ;;  %v6529_v52 = vld [vmem:[#allocation86_spill] sm:$0xff] }
 0x190   :  { %v1300_v1 = vadd.f32 %v1299_v12, %v1256_v3  ;;  %v6518_v3 = vld [vmem:[#allocation70_spill] sm:$0xff]  ;;  %v6523_v12 = vld [vmem:[#allocation77_spill] sm:$0xff] }
 0x192   :  { %4073 = vtanh.f32 %v1300_v1 }
 0x194   :  { %v4969_v23 = vpop.f32.mrf.mxu3 }
 0x196   :  { %v1395_v59 = vpop.f32.mrf.mxu1 }
 0x197   :  { %v6527_v59 = vld [vmem:[#allocation83_spill] sm:$0xff] }
 0x198   :  { %v4074_v35 = vpop.eup %4073 }
 0x199   :  { %v1302_v48 = vsub.f32 0.0, %v4074_v35 }
 0x19b   :  { %v1303_v11 = vmul.f32 %v1302_v48, %v1297_v26  ;;  %v6530_v48 = vld [vmem:[#allocation90_spill] sm:$0xff]  ;;  %v6531_v26 = vld [vmem:[#allocation93_spill] sm:$0xff] }
 0x19c   :  { %v1421_v9 = vpop.f32.mrf.mxu3 }
 0x19d   :  { %v4971_v19 = vadd.f32 %v4074_v35, %v1303_v11  ;;  %v6528_v35 = vld [vmem:[#allocation85_spill] sm:$0xff]  ;;  %v6532_v11 = vld [vmem:[#allocation98_spill] sm:$0xff]  ;;  %v6533_v9 = vld [vmem:[#allocation99_spill] sm:$0xff] }
 0x19f   :  { %v1305_v1 = vpack.c.bf16 %v4971_v19, %v4971_v19 }
 0x1a1   :  { %1327 = vmatmul.bf16.vlgmr.msra.gmra.mxu0 %v1305_v1  ;;  %1353 = vmatmul.bf16.vlgmr.msra.gmra.mxu2 %v1305_v1 }
 0x1a2   :  { %1423 = vmatpush.bf16.msra.mxu0 %v6518_v3  ;;  %1449 = vmatpush.bf16.msra.mxu2 %v6519_v38 }
 0x1a6   :  { %1424 = vmatpush.bf16.msra.mxu0 %v6520_v41  ;;  %1450 = vmatpush.bf16.msra.mxu2 %v6521_v33 }
 0x1aa   :  { %1425 = vmatpush.bf16.msra.mxu0 %v6522_v14  ;;  %1451 = vmatpush.bf16.msra.mxu2 %v6523_v12  ;;  %v1394_v14 = vadd.f32 %v4967_v8, %v4899_v37 }
 0x1ae   :  { %v4981_v46 = vpop.f32.mrf.mxu1  ;;  %1426 = vmatpush.bf16.msra.mxu0 %v6524_v13  ;;  %1452 = vmatpush.bf16.msra.mxu2 %v6525_v22  ;;  %v6534_v22 = vld [vmem:[#allocation100_spill] sm:$0xff]  ;;  %v6535_v13 = vld [vmem:[#allocation13_spill] sm:$0xff] }
 0x1b1   :  { %1379 = vmatmul.bf16.vlgmr.msrb.gmra.mxu0 %v1305_v1  ;;  %1405 = vmatmul.bf16.vlgmr.msrb.gmra.mxu2 %v1305_v1 }
 0x1b2   :  { %1427 = vmatpush.bf16.msra.mxu0 %v6526_v32  ;;  %1453 = vmatpush.bf16.msra.mxu2 %v6527_v59  ;;  %v6536_v59 = vld [vmem:[#allocation102_spill] sm:$0xff]  ;;  %v1463_v32 = vld [vmem:[#allocation2 + $0x6] sm:$0x3f] }
 0x1b6   :  { %v1447_v58 = vpop.f32.mrf.mxu1  ;;  %1428 = vmatpush.bf16.msra.mxu0 %v6528_v35  ;;  %1454 = vmatpush.bf16.msra.mxu2 %v6529_v52  ;;  %v6538_v35 = vld [vmem:[#allocation104_spill] sm:$0xff]  ;;  %v6539_v52 = vld [vmem:[#allocation21_spill] sm:$0xff] }
 0x1b7   :  { %v6537_v58 = vld [vmem:[#allocation17_spill] sm:$0xff] }
 0x1ba   :  { %1429 = vmatpush.bf16.msra.mxu0 %v6530_v48  ;;  %1455 = vmatpush.bf16.msra.mxu2 %v6531_v26  ;;  %v6540_v48 = vld [vmem:[#allocation107_spill] sm:$0xff]  ;;  %v6541_v26 = vld [vmem:[#allocation25_spill] sm:$0xff] }
 0x1be   :  { %1430 = vmatpush.bf16.msra.mxu0 %v6532_v11  ;;  %1456 = vmatpush.bf16.msra.mxu2 %v6533_v9  ;;  %v6542_v11 = vld [vmem:[#allocation110_spill] sm:$0xff]  ;;  %v6543_v9 = vld [vmem:[#allocation29_spill] sm:$0xff] }
 0x1c1   :  { %1431 = vmatmul.bf16.vlgmr.msra.gmra.mxu0 %v1305_v1  ;;  %1457 = vmatmul.bf16.vlgmr.msra.gmra.mxu2 %v1305_v1  ;;  %v6546_v1 = vld [vmem:[#allocation115_spill] sm:$0xff] }
 0x1c2   :  { %1515 = vmatpush.bf16.msrb.mxu0 %v6534_v22  ;;  %1588 = vmatpush.bf16.msrb.mxu2 %v6535_v13  ;;  %v6544_v22 = vld [vmem:[#allocation113_spill] sm:$0xff] }
 0x1c3   :  { %v6545_v13 = vld [vmem:[#allocation33_spill] sm:$0xff] }
 0x1c6   :  { %1516 = vmatpush.bf16.msrb.mxu0 %v6536_v59  ;;  %1589 = vmatpush.bf16.msrb.mxu2 %v6537_v58  ;;  %v6547_v59 = vld [vmem:[#allocation37_spill] sm:$0xff] }
 0x1c7   :  { %v6548_v58 = vld [vmem:[#allocation121_spill] sm:$0xff] }
 0x1ca   :  { %1517 = vmatpush.bf16.msrb.mxu0 %v6538_v35  ;;  %1590 = vmatpush.bf16.msrb.mxu2 %v6539_v52  ;;  %v6549_v35 = vld [vmem:[#allocation41_spill] sm:$0xff]  ;;  %v6550_v52 = vld [vmem:[#allocation14_spill] sm:$0xff] }
 0x1ce   :  { %1518 = vmatpush.bf16.msrb.mxu0 %v6540_v48  ;;  %1591 = vmatpush.bf16.msrb.mxu2 %v6541_v26  ;;  %v6551_v48 = vld [vmem:[#allocation45_spill] sm:$0xff] }
 0x1d2   :  { %1519 = vmatpush.bf16.msrb.mxu0 %v6542_v11  ;;  %1592 = vmatpush.bf16.msrb.mxu2 %v6543_v9 }
 0x1d6   :  { %1520 = vmatpush.bf16.msrb.mxu0 %v6544_v22  ;;  %1593 = vmatpush.bf16.msrb.mxu2 %v6545_v13  ;;  %v6552_v22 = vld [vmem:[#allocation50_spill] sm:$0xff] }
 0x1d7   :  { %v6553_v13 = vld [vmem:[#allocation26_spill] sm:$0xff] }
 0x1da   :  { %1521 = vmatpush.bf16.msrb.mxu0 %v6546_v1  ;;  %1594 = vmatpush.bf16.msrb.mxu2 %v6547_v59  ;;  %v6554_v1 = vld [vmem:[#allocation54_spill] sm:$0xff] }
 0x1db   :  { %v6555_v59 = vld [vmem:[#allocation30_spill] sm:$0xff] }
 0x1de   :  { %1522 = vmatpush.bf16.msrb.mxu0 %v6548_v58  ;;  %1595 = vmatpush.bf16.msrb.mxu2 %v6549_v35  ;;  %v6556_v58 = vld [vmem:[#allocation58_spill] sm:$0xff] }
 0x1df   :  { %v6557_v35 = vld [vmem:[#allocation34_spill] sm:$0xff] }
 0x1e2   :  { %1614 = vmatpush.bf16.msra.mxu0 %v6550_v52  ;;  %1640 = vmatpush.bf16.msra.mxu2 %v6551_v48  ;;  %v6558_v52 = vld [vmem:[#allocation61_spill] sm:$0xff]  ;;  %v6559_v48 = vld [vmem:[#allocation38_spill] sm:$0xff] }
 0x1e6   :  { %1615 = vmatpush.bf16.msra.mxu0 %v4375_v18  ;;  %1641 = vmatpush.bf16.msra.mxu2 %v4472_v5  ;;  %v6560_v18 = vld [vmem:[#allocation64_spill] sm:$0xff]  ;;  %v6561_v5 = vld [vmem:[#allocation42_spill] sm:$0xff] }
 0x1ea   :  { %1616 = vmatpush.bf16.msra.mxu0 %v4387_v34  ;;  %1642 = vmatpush.bf16.msra.mxu2 %v6552_v22  ;;  %v6562_v34 = vld [vmem:[#allocation67_spill] sm:$0xff] }
 0x1ee   :  { %1617 = vmatpush.bf16.msra.mxu0 %v6553_v13  ;;  %1643 = vmatpush.bf16.msra.mxu2 %v6554_v1  ;;  %v6563_v13 = vld [vmem:[#allocation123_spill] sm:$0xff] }
 0x1ef   :  { %v1342_v1 = vadd.f32 %v4959_v31, %v6563_v13 }
 0x1f2   :  { %1618 = vmatpush.bf16.msra.mxu0 %v6555_v59  ;;  %1644 = vmatpush.bf16.msra.mxu2 %v6556_v58  ;;  %v6564_v59 = vld [vmem:[#allocation120_spill] sm:$0xff] }
 0x1f3   :  { %v1316_v58 = vadd.f32 %v4957_v47, %v6564_v59 }
 0x1f6   :  { %1619 = vmatpush.bf16.msra.mxu0 %v6557_v35  ;;  %1645 = vmatpush.bf16.msra.mxu2 %v6558_v52 }
 0x1fa   :  { %1620 = vmatpush.bf16.msra.mxu0 %v6559_v48  ;;  %1646 = vmatpush.bf16.msra.mxu2 %v6560_v18 }
 0x1fe   :  { %1621 = vmatpush.bf16.msra.mxu0 %v6561_v5  ;;  %1647 = vmatpush.bf16.msra.mxu2 %v6562_v34 }
 0x21e   :  { %v1328_v22 = vpop.f32.mrf.mxu0 }
 0x21f   :  { %v1329_v26 = vadd.f32 %v1328_v22, %v1316_v58 }
 0x224   :  { %v1354_v9 = vpop.f32.mrf.mxu2 }
 0x225   :  { %v1355_v11 = vadd.f32 %v1354_v9, %v1342_v1 }
 0x226   :  { %v1330_v35 = vpop.f32.mrf.mxu0 }
 0x227   :  { %v1466_v52 = vrot.slane %v1355_v11, 6 }
 0x229   :  { %v1467_v48 = vsel %vm233_vm0, %v1329_v26, %v1466_v52  ;;  %v1420_v52 = vadd.f32 %v4969_v23, %v4917_v54 }
 0x22a   :  { %v1469_v18 = vadd.f32 %v1467_v48, %v1463_v32 }
 0x22c   :  { %v3863_v12 = vmul.f32 -1.442695, %v1469_v18  ;;  %v1356_v5 = vpop.f32.mrf.mxu2 }
 0x22e   :  { %4075 = vpow2.f32 %v3863_v12  ;;  %v1380_v34 = vpop.f32.mrf.mxu0 }
 0x234   :  { %v4076_v31 = vpop.eup %4075  ;;  %v1406_v13 = vpop.f32.mrf.mxu2 }
 0x235   :  { %v1473_v33 = vadd.f32 1.0, %v4076_v31  ;;  %v5032_v41 = vadd.f32 %v1406_v13, %v1394_v14  ;;  %v1446_v14 = vadd.f32 %v4981_v46, %v4925_v24  ;;  %v1368_v13 = vadd.f32 %v4961_v60, %v4828_v40 }
 0x236   :  { %v1382_v47 = vpop.f32.mrf.mxu0 }
 0x237   :  { %4077 = vrcp.f32 %v1473_v33  ;;  %v1485_v26 = vand.u32 2147483648, %v1473_v33  ;;  %v1483_v8 = vand.u32 2147483647, %v1473_v33  ;;  %vm1479_vm15 = vweird.f32 %v1473_v33 }
 0x238   :  { %v1381_v31 = vadd.f32 %v1380_v34, %v1368_v13  ;;  %v6565_v34 = vld [vmem:[#allocation52_spill] sm:$0xff] }
 0x239   :  { %v1486_v23 = vor.u32 1.1754944e-38, %v1485_v26  ;;  %vm1484_vm3 = vcmp.eq.f32.partialorder %v1483_v8, 8.507059e+37  ;;  %v6570_v8 = vld [vmem:[#allocation59_spill] sm:$0xff]  ;;  %v6572_v13 = vld [vmem:[#allocation108_spill] sm:$0xff] }
 0x23c   :  { %v1408_v22 = vpop.f32.mrf.mxu2 }
 0x23d   :  { %v4078_v35 = vpop.eup %4077 }
 0x23e   :  { %v1475_v48 = vmul.f32 %v4078_v35, %v1473_v33  ;;  %v1432_v18 = vpop.f32.mrf.mxu0  ;;  %vm1480_vm14 = vweird.f32 %v4078_v35 }
 0x23f   :  { %v5036_v5 = vadd.f32 %v1432_v18, %v1420_v52  ;;  %vm1481_vm2 = vmor %vm1479_vm15, %vm1480_vm14  ;;  %v1491_v18 = vrot.slane %v1463_v32, 4  ;;  %v6568_v32 = vld [vmem:[#allocation105_spill] sm:$0xff] }
 0x240   :  { %v1476_v12 = vsub.f32 1.0, %v1475_v48 }
 0x242   :  { %v1477_v11 = vmul.f32 %v4078_v35, %v1476_v12 }
 0x244   :  { %v1478_v9 = vadd.f32 %v4078_v35, %v1477_v11  ;;  %v1458_v58 = vpop.f32.mrf.mxu2 }
 0x245   :  { %v5042_v1 = vadd.f32 %v1458_v58, %v1446_v14  ;;  %v6571_v14 = vld [vmem:[#allocation81_spill] sm:$0xff]  ;;  %v6574_v58 = vld [vmem:[#allocation84_spill] sm:$0xff] }
 0x246   :  { %v1482_v47 = vsel %vm1481_vm2, %v4078_v35, %v1478_v9  ;;  %v1434_v22 = vpop.f32.mrf.mxu0  ;;  %v6569_v35 = vld [vmem:[#allocation56_spill] sm:$0xff]  ;;  %v6573_v9 = vld [vmem:[#allocation62_spill] sm:$0xff] }
 0x247   :  { %v1487_v52 = vsel %vm1484_vm3, %v1486_v23, %v1482_v47  ;;  %v6575_v23 = vld [vmem:[#allocation111_spill] sm:$0xff]  ;;  %v6577_v47 = vld [vmem:[#allocation66_spill] sm:$0xff]  ;;  %v6578_v22 = vld [vmem:[#allocation68_spill] sm:$0xff] }
 0x248   :  { %v1489_v48 = vmul.f32 %v1487_v52, %v1381_v31  ;;  %v1497_v11 = vrot.slane %v1487_v52, 2  ;;  %v6576_v31 = vld [vmem:[#allocation63_spill] sm:$0xff]  ;;  %v6579_v52 = vld [vmem:[#allocation96_spill] sm:$0xff] }
 0x24a   :  { %v1493_v12 = vadd.f32 %v1491_v18, %v1489_v48  ;;  %v6580_v48 = vld [vmem:[#allocation116_spill] sm:$0xff]  ;;  %v6581_v18 = vld [vmem:[#allocation97_spill] sm:$0xff] }
 0x24c   :  { %4079 = vtanh.f32 %v1493_v12  ;;  %v1460_v46 = vpop.f32.mrf.mxu2  ;;  %v6582_v12 = vld [vmem:[#allocation69_spill] sm:$0xff] }
 0x24d   :  { %v6583_v46 = vld [vmem:[#allocation71_spill] sm:$0xff] }
 0x252   :  { %v4080_v54 = vpop.eup %4079 }
 0x253   :  { %v1495_v60 = vsub.f32 %v4846_v62, %v4080_v54  ;;  %v6566_v62 = vld [vmem:[#allocation55_spill] sm:$0xff] }
 0x255   :  { %v1499_v33 = vmul.f32 %v1497_v11, %v1495_v60  ;;  %v6584_v60 = vld [vmem:[#allocation118_spill] sm:$0xff]  ;;  %v6585_v11 = vld [vmem:[#allocation101_spill] sm:$0xff] }
 0x257   :  { %v5045_v40 = vadd.f32 %v4080_v54, %v1499_v33  ;;  %v6567_v54 = vld [vmem:[#allocation78_spill] sm:$0xff]  ;;  %v6586_v33 = vld [vmem:[#allocation103_spill] sm:$0xff] }
 0x259   :  { %v1501_v26 = vpack.c.bf16 %v5045_v40, %v5045_v40 }
 0x25b   :  { %1510 = vmatmul.bf16.vlgmr.msra.gmra.mxu3 %v1501_v26  ;;  %1523 = vmatmul.bf16.vlgmr.msrb.gmra.mxu0 %v1501_v26 }
 0x25c   :  { %1536 = vmatmul.bf16.vlgmr.msrb.gmra.mxu1 %v1501_v26  ;;  %1596 = vmatmul.bf16.vlgmr.msrb.gmra.mxu2 %v1501_v26 }
 0x25d   :  { %1666 = vmatpush.bf16.msrb.mxu0 %v6484_v25  ;;  %1692 = vmatpush.bf16.msrb.mxu2 %v4629_v61 }
 0x25e   :  { %1653 = vmatpush.bf16.msra.mxu3 %v6485_v28  ;;  %1679 = vmatpush.bf16.msrb.mxu1 %v6486_v6 }
 0x261   :  { %1667 = vmatpush.bf16.msrb.mxu0 %v6487_v56  ;;  %1693 = vmatpush.bf16.msrb.mxu2 %v4647_v20 }
 0x262   :  { %1654 = vmatpush.bf16.msra.mxu3 %v6488_v49  ;;  %1680 = vmatpush.bf16.msrb.mxu1 %v6489_v2 }
 0x265   :  { %1668 = vmatpush.bf16.msrb.mxu0 %v6490_v57  ;;  %1694 = vmatpush.bf16.msrb.mxu2 %v4663_v4 }
 0x266   :  { %1655 = vmatpush.bf16.msra.mxu3 %v6565_v34  ;;  %1681 = vmatpush.bf16.msrb.mxu1 %v6566_v62 }
 0x269   :  { %1669 = vmatpush.bf16.msrb.mxu0 %v6567_v54  ;;  %1695 = vmatpush.bf16.msrb.mxu2 %v6568_v32 }
 0x26a   :  { %1656 = vmatpush.bf16.msra.mxu3 %v6569_v35  ;;  %1682 = vmatpush.bf16.msrb.mxu1 %v6570_v8 }
 0x26b   :  { %1622 = vmatmul.bf16.vlgmr.msra.gmra.mxu0 %v1501_v26 }
 0x26c   :  { %1648 = vmatmul.bf16.vlgmr.msra.gmra.mxu2 %v1501_v26 }
 0x26d   :  { %1670 = vmatpush.bf16.msrb.mxu0 %v6571_v14  ;;  %1696 = vmatpush.bf16.msrb.mxu2 %v6572_v13 }
 0x26e   :  { %1657 = vmatpush.bf16.msra.mxu3 %v6497_v27  ;;  %1683 = vmatpush.bf16.msrb.mxu1 %v6573_v9 }
 0x271   :  { %1671 = vmatpush.bf16.msrb.mxu0 %v6574_v58  ;;  %1697 = vmatpush.bf16.msrb.mxu2 %v6575_v23 }
 0x272   :  { %1658 = vmatpush.bf16.msra.mxu3 %v6576_v31  ;;  %1684 = vmatpush.bf16.msrb.mxu1 %v6501_v0 }
 0x275   :  { %1672 = vmatpush.bf16.msrb.mxu0 %v6502_v53  ;;  %1698 = vmatpush.bf16.msrb.mxu2 %v4719_v43 }
 0x276   :  { %1659 = vmatpush.bf16.msra.mxu3 %v6577_v47  ;;  %1685 = vmatpush.bf16.msrb.mxu1 %v6578_v22  ;;  %v6587_v22 = vld [vmem:[#allocation125_spill] sm:$0xff] }
 0x279   :  { %1673 = vmatpush.bf16.msrb.mxu0 %v6579_v52  ;;  %1699 = vmatpush.bf16.msrb.mxu2 %v6580_v48 }
 0x27a   :  { %1660 = vmatpush.bf16.msra.mxu3 %v6582_v12  ;;  %1686 = vmatpush.bf16.msrb.mxu1 %v6583_v46 }
 0x27c   :  { %1674 = vmatmul.bf16.vlgmr.msrb.gmra.mxu0 %v1501_v26  ;;  %1700 = vmatmul.bf16.vlgmr.msrb.gmra.mxu2 %v1501_v26 }
 0x27d   :  { %1718 = vmatpush.bf16.msra.mxu0 %v6581_v18  ;;  %1784 = vmatpush.bf16.msra.mxu2 %v6584_v60 }
 0x281   :  { %1719 = vmatpush.bf16.msra.mxu0 %v6585_v11  ;;  %1785 = vmatpush.bf16.msra.mxu2 %v4756_v30 }
 0x285   :  { %1720 = vmatpush.bf16.msra.mxu0 %v6586_v33  ;;  %1786 = vmatpush.bf16.msra.mxu2 %v6587_v22  ;;  %v6588_v22 = vld [vmem:[#allocation135_spill] sm:$0xff] }
 0x289   :  { %1721 = vmatpush.bf16.msra.mxu0 %v4686_v50  ;;  %1787 = vmatpush.bf16.msra.mxu2 %v4780_v63  ;;  %v6589_v50 = vld [vmem:[#allocation16_spill] sm:$0xff] }
 0x28d   :  { %1722 = vmatpush.bf16.msra.mxu0 %v4696_v15  ;;  %1788 = vmatpush.bf16.msra.mxu2 %v4792_v16  ;;  %v6590_v15 = vld [vmem:[#allocation124_spill] sm:$0xff] }
 0x28e   :  { %v6591_v16 = vld [vmem:[#allocation20_spill] sm:$0xff] }
 0x291   :  { %1723 = vmatpush.bf16.msra.mxu0 %v4707_v42  ;;  %1789 = vmatpush.bf16.msra.mxu2 %v4800_v10 }
 0x295   :  { %1724 = vmatpush.bf16.msra.mxu0 %v4723_v45  ;;  %1790 = vmatpush.bf16.msra.mxu2 %v4808_v17  ;;  %v6608_v45 = vld [vmem:[#allocation57_spill] sm:$0xff] }
 0x299   :  { %1725 = vmatpush.bf16.msra.mxu0 %v4735_v36  ;;  %1791 = vmatpush.bf16.msra.mxu2 %v6588_v22  ;;  %v6593_v22 = vld [vmem:[#allocation132_spill] sm:$0xff] }
 0x29c   :  { %1726 = vmatmul.bf16.vlgmr.msra.gmra.mxu0 %v1501_v26  ;;  %v6595_v26 = vld [vmem:[#allocation134_spill] sm:$0xff] }
 0x29d   :  { %1810 = vmatpush.bf16.msrb.mxu0 %v6512_v44  ;;  %1883 = vmatpush.bf16.msrb.mxu2 %v6589_v50  ;;  %v6592_v44 = vld [vmem:[#allocation32_spill] sm:$0xff] }
 0x29e   :  { %v6594_v50 = vld [vmem:[#allocation36_spill] sm:$0xff] }
 0x2a1   :  { %1811 = vmatpush.bf16.msrb.mxu0 %v6590_v15  ;;  %1884 = vmatpush.bf16.msrb.mxu2 %v6591_v16  ;;  %v6596_v15 = vld [vmem:[#allocation40_spill] sm:$0xff] }
 0x2a2   :  { %v6597_v16 = vld [vmem:[#allocation136_spill] sm:$0xff] }
 0x2a5   :  { %1812 = vmatpush.bf16.msrb.mxu0 %v4775_v7  ;;  %1885 = vmatpush.bf16.msrb.mxu2 %v4392_v39  ;;  %v6598_v7 = vld [vmem:[#allocation15_spill] sm:$0xff]  ;;  %v6599_v39 = vld [vmem:[#allocation44_spill] sm:$0xff] }
 0x2a9   :  { %1813 = vmatpush.bf16.msrb.mxu0 %v4783_v21  ;;  %1886 = vmatpush.bf16.msrb.mxu2 %v4404_v51  ;;  %v6600_v21 = vld [vmem:[#allocation19_spill] sm:$0xff] }
 0x2aa   :  { %v6601_v51 = vld [vmem:[#allocation23_spill] sm:$0xff] }
 0x2ad   :  { %1814 = vmatpush.bf16.msrb.mxu0 %v4795_v29  ;;  %1887 = vmatpush.bf16.msrb.mxu2 %v6592_v44  ;;  %v6602_v29 = vld [vmem:[#allocation27_spill] sm:$0xff] }
 0x2ae   :  { %v6603_v44 = vld [vmem:[#allocation31_spill] sm:$0xff] }
 0x2b1   :  { %1815 = vmatpush.bf16.msrb.mxu0 %v6593_v22  ;;  %1888 = vmatpush.bf16.msrb.mxu2 %v6594_v50  ;;  %v6604_v22 = vld [vmem:[#allocation35_spill] sm:$0xff] }
 0x2b2   :  { %v6605_v50 = vld [vmem:[#allocation39_spill] sm:$0xff] }
 0x2b5   :  { %1816 = vmatpush.bf16.msrb.mxu0 %v6595_v26  ;;  %1889 = vmatpush.bf16.msrb.mxu2 %v6596_v15  ;;  %v6606_v26 = vld [vmem:[#allocation43_spill] sm:$0xff] }
 0x2b9   :  { %1817 = vmatpush.bf16.msrb.mxu0 %v6597_v16  ;;  %1890 = vmatpush.bf16.msrb.mxu2 %v6599_v39  ;;  %v6607_v16 = vld [vmem:[#allocation48_spill] sm:$0xff] }
 0x2bd   :  { %1909 = vmatpush.bf16.msra.mxu0 %v6598_v7 }
 0x2c1   :  { %1910 = vmatpush.bf16.msra.mxu0 %v6600_v21 }
 0x2c5   :  { %1911 = vmatpush.bf16.msra.mxu0 %v6601_v51 }
 0x2c9   :  { %1912 = vmatpush.bf16.msra.mxu0 %v6602_v29 }
 0x2cd   :  { %1913 = vmatpush.bf16.msra.mxu0 %v6603_v44 }
 0x2d1   :  { %1914 = vmatpush.bf16.msra.mxu0 %v6604_v22 }
 0x2d5   :  { %1915 = vmatpush.bf16.msra.mxu0 %v6605_v50 }
 0x2d8   :  { %v1524_v15 = vpop.f32.mrf.mxu0 }
 0x2d9   :  { %1916 = vmatpush.bf16.msra.mxu0 %v6606_v26  ;;  %v1525_v36 = vadd.f32 %v1524_v15, %v6607_v16  ;;  %v1537_v7 = vpop.f32.mrf.mxu1  ;;  %v83_v26 = vld [vmem:[%s6066_s0 + $0x4] sm:$0x3] }
 0x2da   :  { %102 = vperm.xlu1 %4056, %v83_v26  }
 0x2db   :  { %v1542_v39 = vadd.f32 %v1525_v36, %v5036_v5 }
 0x2dd   :  { %v3865_v17 = vmul.f32 -1.442695, %v1542_v39 }
 0x2de   :  { %v1511_v21 = vpop.f32.mrf.mxu3 }
 0x2df   :  { %v1512_v51 = vadd.f32 %v1511_v21, %v6608_v45  ;;  %v5124_v10 = vpop.f32.mrf.mxu2  ;;  %4081 = vpow2.f32 %v3865_v17  ;;  %v84_v21 = vld [vmem:[%s6066_s0 + $0x6] sm:$0x3] }
 0x2e0   :  { %v1526_v29 = vpop.f32.mrf.mxu0 }
 0x2e1   :  { %v1541_v44 = vadd.f32 %v1512_v51, %v5032_v41  ;;  %v1539_v22 = vpop.f32.mrf.mxu1 }
 0x2e2   :  { %107 = vperm.xlu1 %4056, %v84_v21  }
 0x2e3   :  { %v3864_v50 = vmul.f32 -1.442695, %v1541_v44 }
 0x2e5   :  { %4083 = vpow2.f32 %v3864_v50  ;;  %v4082_v39 = vpop.eup %4081  ;;  %v88_v50 = vld [vmem:[%s6066_s0 + $0xe] sm:$0x3] }
 0x2e6   :  { %v1513_v15 = vpop.f32.mrf.mxu3  ;;  %v1550_v51 = vadd.f32 1.0, %v4082_v39 }
 0x2e7   :  { %v1599_v36 = vpop.f32.mrf.mxu2 }
 0x2e8   :  { %v5130_v5 = vpop.f32.mrf.mxu0  ;;  %vm1571_vm9 = vweird.f32 %v1550_v51 }
 0x2ea   :  { %127 = vperm.xlu1 %4056, %v88_v50   ;;  %v1538_v50 = vadd.f32 %v1537_v7, %v4963_v55 }
 0x2eb   :  { %v4084_v29 = vpop.eup %4083 }
 0x2ec   :  { %v1549_v41 = vadd.f32 1.0, %v4084_v29 }
 0x2ee   :  { %4085 = vrcp.f32 %v1549_v41  ;;  %v1562_v42 = vand.u32 2147483648, %v1549_v41  ;;  %v1560_v21 = vand.u32 2147483647, %v1549_v41  ;;  %vm1556_vm5 = vweird.f32 %v1549_v41 }
 0x2ef   :  { %4087 = vrcp.f32 %v1550_v51  ;;  %v5135_v17 = vpop.f32.mrf.mxu2 }
 0x2f0   :  { %v1625_v44 = vpop.f32.mrf.mxu0  ;;  %v1563_v33 = vor.u32 1.1754944e-38, %v1562_v42  ;;  %vm1561_vm7 = vcmp.eq.f32.partialorder %v1560_v21, 8.507059e+37  ;;  %v6613_v21 = vld [vmem:[#allocation79_spill] sm:$0xff] }
 0x2f4   :  { %v4086_v22 = vpop.eup %4085 }
 0x2f5   :  { %v4088_v26 = vpop.eup %4087  ;;  %v1552_v15 = vmul.f32 %v4086_v22, %v1549_v41  ;;  %vm1557_vm4 = vweird.f32 %v4086_v22 }
 0x2f6   :  { %v1567_v45 = vmul.f32 %v4088_v26, %v1550_v51  ;;  %vm1558_vm6 = vmor %vm1556_vm5, %vm1557_vm4  ;;  %vm1572_vm8 = vweird.f32 %v4088_v26 }
 0x2f7   :  { %v1553_v36 = vsub.f32 1.0, %v1552_v15  ;;  %v1651_v16 = vpop.f32.mrf.mxu2  ;;  %vm1573_vm10 = vmor %vm1571_vm9, %vm1572_vm8 }
 0x2f8   :  { %v1568_v44 = vsub.f32 1.0, %v1567_v45  ;;  %v1575_v45 = vand.u32 2147483647, %v1550_v51 }
 0x2f9   :  { %v1554_v39 = vmul.f32 %v4086_v22, %v1553_v36  ;;  %v5140_v29 = vpop.f32.mrf.mxu0 }
 0x2fa   :  { %v1569_v60 = vmul.f32 %v4088_v26, %v1568_v44  ;;  %vm1576_vm11 = vcmp.eq.f32.partialorder %v1575_v45, 8.507059e+37  ;;  %v6614_v44 = vld [vmem:[#allocation80_spill] sm:$0xff]  ;;  %v6619_v45 = vld [vmem:[#allocation90_spill] sm:$0xff] }
 0x2fb   :  { %v1555_v63 = vadd.f32 %v4086_v22, %v1554_v39  ;;  %v1577_v39 = vand.u32 2147483648, %v1550_v51  ;;  %v6610_v51 = vld [vmem:[#allocation74_spill] sm:$0xff] }
 0x2fc   :  { %v1570_v12 = vadd.f32 %v4088_v26, %v1569_v60 }
 0x2fd   :  { %v1559_v30 = vsel %vm1558_vm6, %v4086_v22, %v1555_v63  ;;  %v6612_v22 = vld [vmem:[#allocation77_spill] sm:$0xff] }
 0x2fe   :  { %v1564_v11 = vsel %vm1561_vm7, %v1563_v33, %v1559_v30  ;;  %v1574_v63 = vsel %vm1573_vm10, %v4088_v26, %v1570_v12  ;;  %v1578_v30 = vor.u32 1.1754944e-38, %v1577_v39  ;;  %v6609_v12 = vld [vmem:[#allocation73_spill] sm:$0xff]  ;;  %v6618_v39 = vld [vmem:[#allocation86_spill] sm:$0xff] }
 0x2ff   :  { %v1581_v15 = vmul.f32 %v1564_v11, %v5042_v1  ;;  %v5144_v16 = vpop.f32.mrf.mxu2 }
 0x300   :  { %v1579_v1 = vsel %vm1576_vm11, %v1578_v30, %v1574_v63  ;;  %v6621_v63 = vld [vmem:[#allocation98_spill] sm:$0xff]  ;;  %v6623_v30 = vld [vmem:[#allocation100_spill] sm:$0xff] }
 0x301   :  { %v1582_v36 = vadd.f32 %v1581_v15, %v1538_v50  ;;  %v1677_v46 = vpop.f32.mrf.mxu0  ;;  %v6615_v50 = vld [vmem:[#allocation82_spill] sm:$0xff]  ;;  %v6616_v15 = vld [vmem:[#allocation83_spill] sm:$0xff] }
 0x303   :  { %4089 = vtanh.f32 %v1582_v36  ;;  %v6617_v36 = vld [vmem:[#allocation85_spill] sm:$0xff] }
 0x307   :  { %v1703_v42 = vpop.f32.mrf.mxu2 }
 0x308   :  { %v6620_v42 = vld [vmem:[#allocation93_spill] sm:$0xff] }
 0x309   :  { %v4090_v41 = vpop.eup %4089 }
 0x30a   :  { %v1584_v7 = vsub.f32 %v4971_v19, %v4090_v41  ;;  %v6611_v19 = vld [vmem:[#allocation76_spill] sm:$0xff] }
 0x30c   :  { %v1585_v11 = vmul.f32 %v1584_v7, %v1579_v1  ;;  %v6624_v7 = vld [vmem:[#allocation13_spill] sm:$0xff]  ;;  %v6625_v1 = vld [vmem:[#allocation102_spill] sm:$0xff] }
 0x30e   :  { %v5147_v33 = vadd.f32 %v4090_v41, %v1585_v11  ;;  %v6622_v41 = vld [vmem:[#allocation99_spill] sm:$0xff]  ;;  %v6626_v11 = vld [vmem:[#allocation17_spill] sm:$0xff] }
 0x310   :  { %v1587_v46 = vpack.c.bf16 %v5147_v33, %v5147_v33 }
 0x312   :  { %1609 = vmatmul.bf16.vlgmr.msrb.gmra.mxu3 %v1587_v46  ;;  %1635 = vmatmul.bf16.vlgmr.msra.gmra.mxu1 %v1587_v46 }
 0x313   :  { %1705 = vmatpush.bf16.msrb.mxu3 %v6518_v3  ;;  %1731 = vmatpush.bf16.msra.mxu1 %v6519_v38 }
 0x317   :  { %1706 = vmatpush.bf16.msrb.mxu3 %v6609_v12  ;;  %1732 = vmatpush.bf16.msra.mxu1 %v6610_v51  ;;  %v6653_v51 = vld [vmem:[#allocation30_spill] sm:$0xff] }
 0x318   :  { %v6654_v12 = vld [vmem:[#allocation58_spill] sm:$0xff] }
 0x319   :  { %v5153_v60 = vpop.f32.mrf.mxu0 }
 0x31b   :  { %1707 = vmatpush.bf16.msrb.mxu3 %v6611_v19  ;;  %1733 = vmatpush.bf16.msra.mxu1 %v6612_v22 }
 0x31f   :  { %1708 = vmatpush.bf16.msrb.mxu3 %v6613_v21  ;;  %1734 = vmatpush.bf16.msra.mxu1 %v6614_v44 }
 0x321   :  { %v1729_v26 = vpop.f32.mrf.mxu0 }
 0x322   :  { %1661 = vmatmul.bf16.vlgmr.msra.gmra.mxu3 %v1587_v46  ;;  %1687 = vmatmul.bf16.vlgmr.msrb.gmra.mxu1 %v1587_v46  ;;  %v6627_v26 = vld [vmem:[#allocation104_spill] sm:$0xff] }
 0x323   :  { %1709 = vmatpush.bf16.msrb.mxu3 %v6615_v50  ;;  %1735 = vmatpush.bf16.msra.mxu1 %v6616_v15 }
 0x327   :  { %1710 = vmatpush.bf16.msrb.mxu3 %v6617_v36  ;;  %1736 = vmatpush.bf16.msra.mxu1 %v6618_v39  ;;  %v6628_v39 = vld [vmem:[#allocation21_spill] sm:$0xff] }
 0x32b   :  { %1711 = vmatpush.bf16.msrb.mxu3 %v6619_v45  ;;  %1737 = vmatpush.bf16.msra.mxu1 %v6620_v42  ;;  %v6629_v45 = vld [vmem:[#allocation107_spill] sm:$0xff]  ;;  %v6630_v42 = vld [vmem:[#allocation25_spill] sm:$0xff] }
 0x32f   :  { %1712 = vmatpush.bf16.msrb.mxu3 %v6621_v63  ;;  %1738 = vmatpush.bf16.msra.mxu1 %v6622_v41  ;;  %v6631_v63 = vld [vmem:[#allocation110_spill] sm:$0xff]  ;;  %v6632_v41 = vld [vmem:[#allocation29_spill] sm:$0xff] }
 0x332   :  { %1713 = vmatmul.bf16.vlgmr.msrb.gmra.mxu3 %v1587_v46  ;;  %1739 = vmatmul.bf16.vlgmr.msra.gmra.mxu1 %v1587_v46  ;;  %v6635_v46 = vld [vmem:[#allocation115_spill] sm:$0xff] }
 0x333   :  { %1797 = vmatpush.bf16.msra.mxu3 %v6623_v30  ;;  %1870 = vmatpush.bf16.msrb.mxu1 %v6624_v7  ;;  %v6633_v30 = vld [vmem:[#allocation113_spill] sm:$0xff] }
 0x334   :  { %v6634_v7 = vld [vmem:[#allocation33_spill] sm:$0xff] }
 0x337   :  { %1798 = vmatpush.bf16.msra.mxu3 %v6625_v1  ;;  %1871 = vmatpush.bf16.msrb.mxu1 %v6626_v11  ;;  %v6636_v1 = vld [vmem:[#allocation37_spill] sm:$0xff] }
 0x338   :  { %v6637_v11 = vld [vmem:[#allocation121_spill] sm:$0xff] }
 0x33b   :  { %1799 = vmatpush.bf16.msra.mxu3 %v6627_v26  ;;  %1872 = vmatpush.bf16.msrb.mxu1 %v6628_v39  ;;  %v6638_v26 = vld [vmem:[#allocation41_spill] sm:$0xff]  ;;  %v6639_v39 = vld [vmem:[#allocation14_spill] sm:$0xff] }
 0x33f   :  { %1800 = vmatpush.bf16.msra.mxu3 %v6629_v45  ;;  %1873 = vmatpush.bf16.msrb.mxu1 %v6630_v42  ;;  %v6640_v45 = vld [vmem:[#allocation45_spill] sm:$0xff]  ;;  %v6641_v42 = vld [vmem:[#allocation18_spill] sm:$0xff] }
 0x343   :  { %1801 = vmatpush.bf16.msra.mxu3 %v6631_v63  ;;  %1874 = vmatpush.bf16.msrb.mxu1 %v6632_v41  ;;  %v6642_v63 = vld [vmem:[#allocation47_spill] sm:$0xff]  ;;  %v6643_v41 = vld [vmem:[#allocation22_spill] sm:$0xff] }
 0x347   :  { %1802 = vmatpush.bf16.msra.mxu3 %v6633_v30  ;;  %1875 = vmatpush.bf16.msrb.mxu1 %v6634_v7  ;;  %v6644_v30 = vld [vmem:[#allocation50_spill] sm:$0xff] }
 0x34b   :  { %1803 = vmatpush.bf16.msra.mxu3 %v6635_v46  ;;  %1876 = vmatpush.bf16.msrb.mxu1 %v6636_v1  ;;  %v6645_v46 = vld [vmem:[#allocation88_spill] sm:$0xff]  ;;  %v6646_v1 = vld [vmem:[#allocation89_spill] sm:$0xff] }
 0x34c   :  { %v103_v7 = vpop.permute.xlu1 %102 }
 0x34d   :  { %v143_v36 = vmul.f32 %v6645_v46, %v103_v7  ;;  %v144_v15 = vmul.f32 %v6646_v1, %v103_v7 }
 0x34f   :  { %1804 = vmatpush.bf16.msra.mxu3 %v6637_v11  ;;  %1877 = vmatpush.bf16.msrb.mxu1 %v6638_v26  ;;  %v6647_v11 = vld [vmem:[#allocation91_spill] sm:$0xff]  ;;  %v6648_v26 = vld [vmem:[#allocation92_spill] sm:$0xff] }
 0x350   :  { %v145_v50 = vmul.f32 %v6647_v11, %v103_v7  ;;  %v175_v44 = vadd.f32 %v6648_v26, %v143_v36 }
 0x353   :  { %1896 = vmatpush.bf16.msrb.mxu3 %v6639_v39  ;;  %1922 = vmatpush.bf16.msra.mxu1 %v6640_v45  ;;  %v6649_v39 = vld [vmem:[#allocation94_spill] sm:$0xff]  ;;  %v6650_v45 = vld [vmem:[#allocation95_spill] sm:$0xff] }
 0x354   :  { %v176_v21 = vadd.f32 %v6649_v39, %v144_v15  ;;  %v177_v22 = vadd.f32 %v6650_v45, %v145_v50  ;;  %v108_v38 = vpop.permute.xlu1 %107 }
 0x355   :  { %v146_v15 = vmul.f32 %v6645_v46, %v108_v38  ;;  %v147_v50 = vmul.f32 %v6646_v1, %v108_v38  ;;  %v148_v36 = vmul.f32 %v6647_v11, %v108_v38 }
 0x356   :  { %v222_v19 = vrot.slane %v177_v22, 4 }
 0x357   :  { %1897 = vmatpush.bf16.msrb.mxu3 %v6641_v42  ;;  %1923 = vmatpush.bf16.msra.mxu1 %v6642_v63  ;;  %v6651_v42 = vld [vmem:[#allocation26_spill] sm:$0xff]  ;;  %v179_v22 = vadd.f32 %v6649_v39, %v147_v50 }
 0x358   :  { %v6652_v63 = vld [vmem:[#allocation54_spill] sm:$0xff] }
 0x35b   :  { %1898 = vmatpush.bf16.msrb.mxu3 %v6643_v41  ;;  %1924 = vmatpush.bf16.msra.mxu1 %v6644_v30  ;;  %v221_v41 = vrot.slane %v176_v21, 6  ;;  %v180_v21 = vadd.f32 %v6650_v45, %v148_v36 }
 0x35d   :  { %v239_v30 = vsel %vm233_vm0, %v175_v44, %v221_v41  ;;  %v6655_v44 = vld [vmem:[#allocation34_spill] sm:$0xff]  ;;  %v6656_v41 = vld [vmem:[#allocation61_spill] sm:$0xff] }
 0x35e   :  { %v240_v7 = vsel %vm235_vm1, %v239_v30, %v222_v19  ;;  %v224_v19 = vrot.slane %v180_v21, 4  ;;  %v6660_v21 = vld [vmem:[#allocation67_spill] sm:$0xff] }
 0x35f   :  { %1899 = vmatpush.bf16.msrb.mxu3 %v6651_v42  ;;  %1925 = vmatpush.bf16.msra.mxu1 %v6652_v63  ;;  %261 = vst [vmem:[#allocation2 + $0xc] sm:$0x3f] %v240_v7  ;;  %v178_v63 = vadd.f32 %v6648_v26, %v146_v15  ;;  %v6657_v7 = vld [vmem:[#allocation38_spill] sm:$0xff]  ;;  %v128_v42 = vpop.permute.xlu1 %127 }
 0x360   :  { %v158_v15 = vmul.f32 %v6645_v46, %v128_v42  ;;  %v159_v50 = vmul.f32 %v6646_v1, %v128_v42  ;;  %v160_v36 = vmul.f32 %v6647_v11, %v128_v42  ;;  %v6661_v46 = vld [vmem:[#allocation123_spill] sm:$0xff] }
 0x361   :  { %v1624_v42 = vadd.f32 %v5130_v5, %v6661_v46 }
 0x363   :  { %1900 = vmatpush.bf16.msrb.mxu3 %v6653_v51  ;;  %1926 = vmatpush.bf16.msra.mxu1 %v6654_v12  ;;  %v223_v12 = vrot.slane %v179_v22, 6  ;;  %v6658_v51 = vld [vmem:[#allocation64_spill] sm:$0xff]  ;;  %v191_v22 = vadd.f32 %v6649_v39, %v159_v50  ;;  %v1598_v50 = vadd.f32 %v5124_v10, %v6564_v59 }
 0x365   :  { %v241_v30 = vsel %vm233_vm0, %v178_v63, %v223_v12  ;;  %v192_v12 = vadd.f32 %v6650_v45, %v160_v36  ;;  %v6659_v63 = vld [vmem:[#allocation42_spill] sm:$0xff] }
 0x366   :  { %v242_v38 = vsel %vm235_vm1, %v241_v30, %v224_v19  ;;  %v1745_v11 = vld [vmem:[#allocation2 + $0xc] sm:$0x3f] }
 0x367   :  { %1901 = vmatpush.bf16.msrb.mxu3 %v6655_v44  ;;  %1927 = vmatpush.bf16.msra.mxu1 %v6656_v41  ;;  %262 = vst [vmem:[#allocation2 + $0x12] sm:$0x3f] %v242_v38  ;;  %v190_v41 = vadd.f32 %v6648_v26, %v158_v15  ;;  %v232_v19 = vrot.slane %v192_v12, 4 }
 0x36b   :  { %1902 = vmatpush.bf16.msrb.mxu3 %v6657_v7  ;;  %1928 = vmatpush.bf16.msra.mxu1 %v6658_v51  ;;  %v231_v51 = vrot.slane %v191_v22, 6 }
 0x36d   :  { %v249_v30 = vsel %vm233_vm0, %v190_v41, %v231_v51 }
 0x36e   :  { %v250_v38 = vsel %vm235_vm1, %v249_v30, %v232_v19  ;;  %v1676_v19 = vadd.f32 %v5140_v29, %v4899_v37 }
 0x36f   :  { %1903 = vmatpush.bf16.msrb.mxu3 %v6659_v63  ;;  %1929 = vmatpush.bf16.msra.mxu1 %v6660_v21  ;;  %266 = vst [vmem:[#allocation2 + $0x2a] sm:$0x3f] %v250_v38 }
 0x38f   :  { %v1636_v1 = vpop.f32.mrf.mxu1 }
 0x390   :  { %v1637_v15 = vadd.f32 %v1636_v1, %v1624_v42 }
 0x392   :  { %v1748_v45 = vrot.slane %v1637_v15, 6 }
 0x395   :  { %v1610_v36 = vpop.f32.mrf.mxu3 }
 0x396   :  { %v1611_v39 = vadd.f32 %v1610_v36, %v1598_v50 }
 0x397   :  { %v1638_v26 = vpop.f32.mrf.mxu1 }
 0x398   :  { %v1749_v22 = vsel %vm233_vm0, %v1611_v39, %v1748_v45  ;;  %v1728_v39 = vadd.f32 %v5153_v60, %v4925_v24 }
 0x399   :  { %v1751_v12 = vadd.f32 %v1749_v22, %v1745_v11 }
 0x39b   :  { %v3866_v51 = vmul.f32 -1.442695, %v1751_v12 }
 0x39d   :  { %4091 = vpow2.f32 %v3866_v51  ;;  %v1612_v41 = vpop.f32.mrf.mxu3 }
 0x39e   :  { %v6662_v41 = vld [vmem:[#allocation137_spill] sm:$0xff] }
 0x39f   :  { %v1688_v30 = vpop.f32.mrf.mxu1 }
 0x3a0   :  { %v5232_v5 = vadd.f32 %v1688_v30, %v1676_v19  ;;  %v1650_v19 = vadd.f32 %v5135_v17, %v6662_v41 }
 0x3a3   :  { %v4092_v1 = vpop.eup %4091 }
 0x3a4   :  { %v1755_v38 = vadd.f32 1.0, %v4092_v1  ;;  %v6663_v1 = vld [vmem:[#allocation46_spill] sm:$0xff] }
 0x3a5   :  { %v1662_v10 = vpop.f32.mrf.mxu3 }
 0x3a6   :  { %4093 = vrcp.f32 %v1755_v38  ;;  %v1767_v22 = vand.u32 2147483648, %v1755_v38  ;;  %v1765_v51 = vand.u32 2147483647, %v1755_v38  ;;  %vm1761_vm13 = vweird.f32 %v1755_v38 }
 0x3a7   :  { %v1690_v42 = vpop.f32.mrf.mxu1  ;;  %v1663_v37 = vadd.f32 %v1662_v10, %v1650_v19  ;;  %v6674_v19 = vld [vmem:[#allocation109_spill] sm:$0xff] }
 0x3a8   :  { %v1702_v42 = vadd.f32 %v5144_v16, %v6663_v1  ;;  %vm1766_vm15 = vcmp.eq.f32.partialorder %v1765_v51, 8.507059e+37  ;;  %v6672_v51 = vld [vmem:[#allocation106_spill] sm:$0xff] }
 0x3ac   :  { %v4094_v15 = vpop.eup %4093 }
 0x3ad   :  { %v1757_v26 = vmul.f32 %v4094_v15, %v1755_v38  ;;  %v1664_v50 = vpop.f32.mrf.mxu3  ;;  %vm1762_vm12 = vweird.f32 %v4094_v15 }
 0x3ae   :  { %vm1763_vm14 = vmor %vm1761_vm13, %vm1762_vm12  ;;  %v1768_v50 = vor.u32 1.1754944e-38, %v1767_v22  ;;  %v6671_v22 = vld [vmem:[#allocation125_spill] sm:$0xff] }
 0x3af   :  { %v1758_v45 = vsub.f32 1.0, %v1757_v26  ;;  %v1740_v36 = vpop.f32.mrf.mxu1 }
 0x3b0   :  { %v5236_v12 = vadd.f32 %v1740_v36, %v1728_v39  ;;  %v1773_v36 = vrot.slane %v1745_v11, 4  ;;  %v6668_v11 = vld [vmem:[#allocation101_spill] sm:$0xff] }
 0x3b1   :  { %v1759_v29 = vmul.f32 %v4094_v15, %v1758_v45 }
 0x3b3   :  { %v1760_v30 = vadd.f32 %v4094_v15, %v1759_v29 }
 0x3b5   :  { %v1764_v60 = vsel %vm1763_vm14, %v4094_v15, %v1760_v30  ;;  %v1714_v26 = vpop.f32.mrf.mxu3  ;;  %v6670_v15 = vld [vmem:[#allocation103_spill] sm:$0xff]  ;;  %v6675_v30 = vld [vmem:[#allocation129_spill] sm:$0xff] }
 0x3b6   :  { %v1769_v24 = vsel %vm1766_vm15, %v1768_v50, %v1764_v60  ;;  %v5242_v39 = vadd.f32 %v1714_v26, %v1702_v42  ;;  %v6676_v42 = vld [vmem:[#allocation112_spill] sm:$0xff]  ;;  %v6677_v50 = vld [vmem:[#allocation131_spill] sm:$0xff]  ;;  %v6678_v60 = vld [vmem:[#allocation114_spill] sm:$0xff] }
 0x3b7   :  { %v1771_v45 = vmul.f32 %v1769_v24, %v1663_v37  ;;  %v1742_v59 = vpop.f32.mrf.mxu1  ;;  %v1779_v41 = vrot.slane %v1769_v24, 2  ;;  %v6664_v24 = vld [vmem:[#allocation68_spill] sm:$0xff]  ;;  %v6665_v37 = vld [vmem:[#allocation69_spill] sm:$0xff] }
 0x3b8   :  { %v6667_v59 = vld [vmem:[#allocation118_spill] sm:$0xff]  ;;  %v6679_v26 = vld [vmem:[#allocation133_spill] sm:$0xff] }
 0x3b9   :  { %v1775_v46 = vadd.f32 %v1773_v36, %v1771_v45  ;;  %v6680_v45 = vld [vmem:[#allocation117_spill] sm:$0xff]  ;;  %v6681_v36 = vld [vmem:[#allocation119_spill] sm:$0xff] }
 0x3bb   :  { %4095 = vtanh.f32 %v1775_v46  ;;  %v6669_v46 = vld [vmem:[#allocation122_spill] sm:$0xff] }
 0x3bd   :  { %v1716_v17 = vpop.f32.mrf.mxu3 }
 0x3be   :  { %v6682_v17 = vld [vmem:[#allocation135_spill] sm:$0xff] }
 0x3c1   :  { %v4096_v29 = vpop.eup %4095 }
 0x3c2   :  { %v1777_v38 = vsub.f32 %v5045_v40, %v4096_v29  ;;  %v6666_v40 = vld [vmem:[#allocation71_spill] sm:$0xff] }
 0x3c4   :  { %v1781_v16 = vmul.f32 %v1779_v41, %v1777_v38  ;;  %v6673_v41 = vld [vmem:[#allocation127_spill] sm:$0xff]  ;;  %v6684_v38 = vld [vmem:[#allocation124_spill] sm:$0xff] }
 0x3c6   :  { %v5245_v1 = vadd.f32 %v4096_v29, %v1781_v16  ;;  %v6683_v29 = vld [vmem:[#allocation16_spill] sm:$0xff] }
 0x3c7   :  { %v6685_v16 = vld [vmem:[#allocation20_spill] sm:$0xff] }
 0x3c8   :  { %v1783_v10 = vpack.c.bf16 %v5245_v1, %v5245_v1 }
 0x3ca   :  { %1792 = vmatmul.bf16.vlgmr.msra.gmra.mxu2 %v1783_v10  ;;  %1805 = vmatmul.bf16.vlgmr.msra.gmra.mxu3 %v1783_v10 }
 0x3cb   :  { %1818 = vmatmul.bf16.vlgmr.msrb.gmra.mxu0 %v1783_v10  ;;  %1878 = vmatmul.bf16.vlgmr.msrb.gmra.mxu1 %v1783_v10 }
 0x3cc   :  { %1948 = vmatpush.bf16.msra.mxu3 %v6484_v25  ;;  %1974 = vmatpush.bf16.msrb.mxu1 %v4629_v61 }
 0x3cd   :  { %1935 = vmatpush.bf16.msra.mxu2 %v6485_v28  ;;  %1961 = vmatpush.bf16.msrb.mxu0 %v6486_v6 }
 0x3d0   :  { %1949 = vmatpush.bf16.msra.mxu3 %v6487_v56  ;;  %1975 = vmatpush.bf16.msrb.mxu1 %v4647_v20 }
 0x3d1   :  { %1936 = vmatpush.bf16.msra.mxu2 %v6488_v49  ;;  %1962 = vmatpush.bf16.msrb.mxu0 %v6489_v2 }
 0x3d4   :  { %1950 = vmatpush.bf16.msra.mxu3 %v6490_v57  ;;  %1976 = vmatpush.bf16.msrb.mxu1 %v4663_v4 }
 0x3d5   :  { %1937 = vmatpush.bf16.msra.mxu2 %v6565_v34  ;;  %1963 = vmatpush.bf16.msrb.mxu0 %v6566_v62 }
 0x3d8   :  { %1951 = vmatpush.bf16.msra.mxu3 %v6567_v54  ;;  %1977 = vmatpush.bf16.msrb.mxu1 %v6568_v32 }
 0x3d9   :  { %1938 = vmatpush.bf16.msra.mxu2 %v6569_v35  ;;  %1964 = vmatpush.bf16.msrb.mxu0 %v6570_v8 }
 0x3da   :  { %1904 = vmatmul.bf16.vlgmr.msrb.gmra.mxu3 %v1783_v10 }
 0x3db   :  { %1930 = vmatmul.bf16.vlgmr.msra.gmra.mxu1 %v1783_v10 }
 0x3dc   :  { %1952 = vmatpush.bf16.msra.mxu3 %v6571_v14  ;;  %1978 = vmatpush.bf16.msrb.mxu1 %v6572_v13 }
 0x3dd   :  { %1939 = vmatpush.bf16.msra.mxu2 %v6497_v27  ;;  %1965 = vmatpush.bf16.msrb.mxu0 %v6573_v9 }
 0x3e0   :  { %1953 = vmatpush.bf16.msra.mxu3 %v6574_v58  ;;  %1979 = vmatpush.bf16.msrb.mxu1 %v6575_v23 }
 0x3e1   :  { %1940 = vmatpush.bf16.msra.mxu2 %v6576_v31  ;;  %1966 = vmatpush.bf16.msrb.mxu0 %v6501_v0 }
 0x3e4   :  { %1954 = vmatpush.bf16.msra.mxu3 %v6502_v53  ;;  %1980 = vmatpush.bf16.msrb.mxu1 %v4719_v43 }
 0x3e5   :  { %1941 = vmatpush.bf16.msra.mxu2 %v6577_v47  ;;  %1967 = vmatpush.bf16.msrb.mxu0 %v6664_v24 }
 0x3e8   :  { %1955 = vmatpush.bf16.msra.mxu3 %v6579_v52  ;;  %1981 = vmatpush.bf16.msrb.mxu1 %v6580_v48 }
 0x3e9   :  { %1942 = vmatpush.bf16.msra.mxu2 %v6665_v37  ;;  %1968 = vmatpush.bf16.msrb.mxu0 %v6666_v40 }
 0x3eb   :  { %1956 = vmatmul.bf16.vlgmr.msra.gmra.mxu3 %v1783_v10  ;;  %1982 = vmatmul.bf16.vlgmr.msrb.gmra.mxu1 %v1783_v10 }
 0x3ec   :  { %2000 = vmatpush.bf16.msrb.mxu3 %v6581_v18  ;;  %2066 = vmatpush.bf16.msra.mxu1 %v6667_v59 }
 0x3f0   :  { %2001 = vmatpush.bf16.msrb.mxu3 %v6668_v11  ;;  %2067 = vmatpush.bf16.msra.mxu1 %v6669_v46 }
 0x3f4   :  { %2002 = vmatpush.bf16.msrb.mxu3 %v6670_v15  ;;  %2068 = vmatpush.bf16.msra.mxu1 %v6671_v22 }
 0x3f8   :  { %2003 = vmatpush.bf16.msrb.mxu3 %v6672_v51  ;;  %2069 = vmatpush.bf16.msra.mxu1 %v6673_v41 }
 0x3fc   :  { %2004 = vmatpush.bf16.msrb.mxu3 %v6674_v19  ;;  %2070 = vmatpush.bf16.msra.mxu1 %v6675_v30 }
 0x400   :  { %2005 = vmatpush.bf16.msrb.mxu3 %v6676_v42  ;;  %2071 = vmatpush.bf16.msra.mxu1 %v6677_v50  ;;  %v6686_v42 = vld [vmem:[#allocation126_spill] sm:$0xff]  ;;  %v6687_v50 = vld [vmem:[#allocation24_spill] sm:$0xff] }
 0x404   :  { %2006 = vmatpush.bf16.msrb.mxu3 %v6678_v60  ;;  %2072 = vmatpush.bf16.msra.mxu1 %v6679_v26  ;;  %v6688_v60 = vld [vmem:[#allocation128_spill] sm:$0xff] }
 0x405   :  { %v6689_v26 = vld [vmem:[#allocation28_spill] sm:$0xff] }
 0x408   :  { %2007 = vmatpush.bf16.msrb.mxu3 %v6680_v45  ;;  %2073 = vmatpush.bf16.msra.mxu1 %v6682_v17  ;;  %v6690_v45 = vld [vmem:[#allocation130_spill] sm:$0xff]  ;;  %v6692_v17 = vld [vmem:[#allocation132_spill] sm:$0xff] }
 0x40b   :  { %2008 = vmatmul.bf16.vlgmr.msrb.gmra.mxu3 %v1783_v10  ;;  %v6694_v10 = vld [vmem:[#allocation134_spill] sm:$0xff] }
 0x40c   :  { %2092 = vmatpush.bf16.msra.mxu3 %v6681_v36  ;;  %2165 = vmatpush.bf16.msrb.mxu1 %v6683_v29  ;;  %v6691_v36 = vld [vmem:[#allocation32_spill] sm:$0xff] }
 0x40d   :  { %v6693_v29 = vld [vmem:[#allocation36_spill] sm:$0xff] }
 0x410   :  { %2093 = vmatpush.bf16.msra.mxu3 %v6684_v38  ;;  %2166 = vmatpush.bf16.msrb.mxu1 %v6685_v16  ;;  %v6695_v38 = vld [vmem:[#allocation40_spill] sm:$0xff] }
 0x411   :  { %v6696_v16 = vld [vmem:[#allocation136_spill] sm:$0xff] }
 0x414   :  { %2094 = vmatpush.bf16.msra.mxu3 %v6686_v42  ;;  %2167 = vmatpush.bf16.msrb.mxu1 %v6687_v50  ;;  %v6697_v42 = vld [vmem:[#allocation15_spill] sm:$0xff]  ;;  %v6698_v50 = vld [vmem:[#allocation44_spill] sm:$0xff] }
 0x418   :  { %2095 = vmatpush.bf16.msra.mxu3 %v6688_v60  ;;  %2168 = vmatpush.bf16.msrb.mxu1 %v6689_v26  ;;  %v6699_v60 = vld [vmem:[#allocation19_spill] sm:$0xff] }
 0x419   :  { %v6700_v26 = vld [vmem:[#allocation23_spill] sm:$0xff] }
 0x41c   :  { %2096 = vmatpush.bf16.msra.mxu3 %v6690_v45  ;;  %2169 = vmatpush.bf16.msrb.mxu1 %v6691_v36  ;;  %v6701_v45 = vld [vmem:[#allocation27_spill] sm:$0xff] }
 0x41d   :  { %v6702_v36 = vld [vmem:[#allocation31_spill] sm:$0xff] }
 0x420   :  { %2097 = vmatpush.bf16.msra.mxu3 %v6692_v17  ;;  %2170 = vmatpush.bf16.msrb.mxu1 %v6693_v29  ;;  %v6703_v17 = vld [vmem:[#allocation35_spill] sm:$0xff] }
 0x421   :  { %v6704_v29 = vld [vmem:[#allocation39_spill] sm:$0xff] }
 0x424   :  { %2098 = vmatpush.bf16.msra.mxu3 %v6694_v10  ;;  %2171 = vmatpush.bf16.msrb.mxu1 %v6695_v38  ;;  %v6705_v10 = vld [vmem:[#allocation43_spill] sm:$0xff] }
 0x428   :  { %2099 = vmatpush.bf16.msra.mxu3 %v6696_v16  ;;  %2172 = vmatpush.bf16.msrb.mxu1 %v6698_v50  ;;  %v6706_v50 = vld [vmem:[#allocation57_spill] sm:$0xff] }
 0x42c   :  { %2191 = vmatpush.bf16.msrb.mxu3 %v6697_v42 }
 0x430   :  { %2192 = vmatpush.bf16.msrb.mxu3 %v6699_v60  ;;  %v6707_v60 = vld [vmem:[#allocation48_spill] sm:$0xff] }
 0x434   :  { %2193 = vmatpush.bf16.msrb.mxu3 %v6700_v26 }
 0x438   :  { %2194 = vmatpush.bf16.msrb.mxu3 %v6701_v45 }
 0x43c   :  { %2195 = vmatpush.bf16.msrb.mxu3 %v6702_v36 }
 0x440   :  { %2196 = vmatpush.bf16.msrb.mxu3 %v6703_v17 }
 0x444   :  { %2197 = vmatpush.bf16.msrb.mxu3 %v6704_v29 }
 0x448   :  { %2198 = vmatpush.bf16.msrb.mxu3 %v6705_v10  ;;  %v1819_v38 = vpop.f32.mrf.mxu0  ;;  %v5321_v16 = vpop.f32.mrf.mxu1 }
 0x44d   :  { %v1793_v42 = vpop.f32.mrf.mxu2  ;;  %v1806_v30 = vpop.f32.mrf.mxu3 }
 0x44e   :  { %v1794_v19 = vadd.f32 %v1793_v42, %v6706_v50  ;;  %v1807_v41 = vadd.f32 %v1806_v30, %v6707_v60  ;;  %v1820_v50 = vadd.f32 %v1819_v38, %v4963_v55 }
 0x450   :  { %v1823_v26 = vadd.f32 %v1794_v19, %v5232_v5  ;;  %v1824_v45 = vadd.f32 %v1807_v41, %v5242_v39  ;;  %v1821_v36 = vpop.f32.mrf.mxu0  ;;  %v1881_v51 = vpop.f32.mrf.mxu1 }
 0x452   :  { %v3867_v17 = vmul.f32 -1.442695, %v1823_v26  ;;  %v3868_v22 = vmul.f32 -1.442695, %v1824_v45 }
 0x454   :  { %4097 = vpow2.f32 %v3867_v17 }
 0x455   :  { %4099 = vpow2.f32 %v3868_v22  ;;  %v1795_v10 = vpop.f32.mrf.mxu2  ;;  %v1808_v29 = vpop.f32.mrf.mxu3 }
 0x458   :  { %v5327_v15 = vpop.f32.mrf.mxu1 }
 0x45a   :  { %v4098_v46 = vpop.eup %4097 }
 0x45b   :  { %v4100_v11 = vpop.eup %4099  ;;  %v1831_v59 = vadd.f32 1.0, %v4098_v46 }
 0x45c   :  { %v1832_v42 = vadd.f32 1.0, %v4100_v11 }
 0x45d   :  { %4101 = vrcp.f32 %v1831_v59  ;;  %v5329_v30 = vpop.f32.mrf.mxu3  ;;  %v1844_v45 = vand.u32 2147483648, %v1831_v59  ;;  %v1842_v17 = vand.u32 2147483647, %v1831_v59  ;;  %vm1838_vm3 = vweird.f32 %v1831_v59 }
 0x45e   :  { %4103 = vrcp.f32 %v1832_v42  ;;  %vm1853_vm7 = vweird.f32 %v1832_v42 }
 0x45f   :  { %v1845_v11 = vor.u32 1.1754944e-38, %v1844_v45  ;;  %vm1843_vm5 = vcmp.eq.f32.partialorder %v1842_v17, 8.507059e+37 }
 0x460   :  { %v1933_v5 = vpop.f32.mrf.mxu1 }
 0x463   :  { %v4102_v39 = vpop.eup %4101 }
 0x464   :  { %v4104_v41 = vpop.eup %4103  ;;  %v1834_v51 = vmul.f32 %v4102_v39, %v1831_v59  ;;  %vm1839_vm2 = vweird.f32 %v4102_v39  ;;  %v1857_v59 = vand.u32 2147483647, %v1832_v42 }
 0x465   :  { %v1907_v19 = vpop.f32.mrf.mxu3  ;;  %v1849_v22 = vmul.f32 %v4104_v41, %v1832_v42  ;;  %vm1840_vm4 = vmor %vm1838_vm3, %vm1839_vm2  ;;  %vm1854_vm6 = vweird.f32 %v4104_v41 }
 0x466   :  { %v1835_v26 = vsub.f32 1.0, %v1834_v51  ;;  %vm1855_vm8 = vmor %vm1853_vm7, %vm1854_vm6  ;;  %vm1858_vm9 = vcmp.eq.f32.partialorder %v1857_v59, 8.507059e+37  ;;  %v6718_v59 = vld [vmem:[#allocation86_spill] sm:$0xff] }
 0x467   :  { %v1850_v46 = vsub.f32 1.0, %v1849_v22 }
 0x468   :  { %v1836_v36 = vmul.f32 %v4102_v39, %v1835_v26  ;;  %v5331_v29 = vpop.f32.mrf.mxu1 }
 0x469   :  { %v1851_v40 = vmul.f32 %v4104_v41, %v1850_v46  ;;  %v6714_v46 = vld [vmem:[#allocation80_spill] sm:$0xff] }
 0x46a   :  { %v1837_v10 = vadd.f32 %v4102_v39, %v1836_v36  ;;  %v1859_v36 = vand.u32 2147483648, %v1832_v42  ;;  %v6711_v42 = vld [vmem:[#allocation76_spill] sm:$0xff] }
 0x46b   :  { %v1852_v18 = vadd.f32 %v4104_v41, %v1851_v40  ;;  %v6708_v40 = vld [vmem:[#allocation72_spill] sm:$0xff] }
 0x46c   :  { %v1841_v60 = vsel %vm1840_vm4, %v4102_v39, %v1837_v10 }
 0x46d   :  { %v1846_v5 = vsel %vm1843_vm5, %v1845_v11, %v1841_v60  ;;  %v1856_v39 = vsel %vm1855_vm8, %v4104_v41, %v1852_v18  ;;  %v1860_v60 = vor.u32 1.1754944e-38, %v1859_v36  ;;  %v6710_v18 = vld [vmem:[#allocation74_spill] sm:$0xff]  ;;  %v6713_v11 = vld [vmem:[#allocation79_spill] sm:$0xff]  ;;  %v6717_v36 = vld [vmem:[#allocation85_spill] sm:$0xff] }
 0x46e   :  { %v1863_v19 = vmul.f32 %v1846_v5, %v5236_v12  ;;  %v5335_v51 = vpop.f32.mrf.mxu3  ;;  %v6715_v5 = vld [vmem:[#allocation82_spill] sm:$0xff] }
 0x46f   :  { %v1861_v12 = vsel %vm1858_vm9, %v1860_v60, %v1856_v39  ;;  %v6720_v39 = vld [vmem:[#allocation93_spill] sm:$0xff]  ;;  %v6722_v60 = vld [vmem:[#allocation99_spill] sm:$0xff] }
 0x470   :  { %v1864_v26 = vadd.f32 %v1863_v19, %v1820_v50  ;;  %v1985_v37 = vpop.f32.mrf.mxu1  ;;  %v6709_v50 = vld [vmem:[#allocation73_spill] sm:$0xff]  ;;  %v6716_v19 = vld [vmem:[#allocation83_spill] sm:$0xff] }
 0x472   :  { %4105 = vtanh.f32 %v1864_v26 }
 0x476   :  { %v1959_v45 = vpop.f32.mrf.mxu3 }
 0x477   :  { %v6719_v45 = vld [vmem:[#allocation90_spill] sm:$0xff] }
 0x478   :  { %v4106_v22 = vpop.eup %4105 }
 0x479   :  { %v1866_v38 = vsub.f32 %v5147_v33, %v4106_v22  ;;  %v6712_v33 = vld [vmem:[#allocation77_spill] sm:$0xff] }
 0x47b   :  { %v1867_v17 = vmul.f32 %v1866_v38, %v1861_v12  ;;  %v6723_v38 = vld [vmem:[#allocation100_spill] sm:$0xff]  ;;  %v6724_v12 = vld [vmem:[#allocation13_spill] sm:$0xff] }
 0x47d   :  { %v5338_v10 = vadd.f32 %v4106_v22, %v1867_v17  ;;  %v6721_v22 = vld [vmem:[#allocation98_spill] sm:$0xff] }
 0x47e   :  { %v6725_v17 = vld [vmem:[#allocation102_spill] sm:$0xff] }
 0x47f   :  { %v1869_v37 = vpack.c.bf16 %v5338_v10, %v5338_v10 }
 0x481   :  { %1891 = vmatmul.bf16.vlgmr.msrb.gmra.mxu2 %v1869_v37  ;;  %1917 = vmatmul.bf16.vlgmr.msra.gmra.mxu0 %v1869_v37 }
 0x482   :  { %1987 = vmatpush.bf16.msrb.mxu2 %v6518_v3  ;;  %2013 = vmatpush.bf16.msra.mxu0 %v6708_v40 }
 0x486   :  { %1988 = vmatpush.bf16.msrb.mxu2 %v6709_v50  ;;  %2014 = vmatpush.bf16.msra.mxu0 %v6710_v18 }
 0x48a   :  { %1989 = vmatpush.bf16.msrb.mxu2 %v6711_v42  ;;  %2015 = vmatpush.bf16.msra.mxu0 %v6712_v33 }
 0x48e   :  { %v5348_v41 = vpop.f32.mrf.mxu3  ;;  %1990 = vmatpush.bf16.msrb.mxu2 %v6713_v11  ;;  %2016 = vmatpush.bf16.msra.mxu0 %v6714_v46 }
 0x491   :  { %1943 = vmatmul.bf16.vlgmr.msra.gmra.mxu2 %v1869_v37  ;;  %1969 = vmatmul.bf16.vlgmr.msrb.gmra.mxu0 %v1869_v37 }
 0x492   :  { %1991 = vmatpush.bf16.msrb.mxu2 %v6715_v5  ;;  %2017 = vmatpush.bf16.msra.mxu0 %v6716_v19 }
 0x496   :  { %v2011_v26 = vpop.f32.mrf.mxu3  ;;  %1992 = vmatpush.bf16.msrb.mxu2 %v6717_v36  ;;  %2018 = vmatpush.bf16.msra.mxu0 %v6718_v59  ;;  %v6727_v36 = vld [vmem:[#allocation104_spill] sm:$0xff]  ;;  %v6728_v59 = vld [vmem:[#allocation21_spill] sm:$0xff] }
 0x497   :  { %v6726_v26 = vld [vmem:[#allocation17_spill] sm:$0xff] }
 0x49a   :  { %1993 = vmatpush.bf16.msrb.mxu2 %v6719_v45  ;;  %2019 = vmatpush.bf16.msra.mxu0 %v6720_v39  ;;  %v6729_v45 = vld [vmem:[#allocation107_spill] sm:$0xff]  ;;  %v6730_v39 = vld [vmem:[#allocation25_spill] sm:$0xff] }
 0x49e   :  { %1994 = vmatpush.bf16.msrb.mxu2 %v6721_v22  ;;  %2020 = vmatpush.bf16.msra.mxu0 %v6722_v60  ;;  %v6731_v22 = vld [vmem:[#allocation110_spill] sm:$0xff]  ;;  %v6732_v60 = vld [vmem:[#allocation29_spill] sm:$0xff] }
 0x4a1   :  { %1995 = vmatmul.bf16.vlgmr.msrb.gmra.mxu2 %v1869_v37  ;;  %2021 = vmatmul.bf16.vlgmr.msra.gmra.mxu0 %v1869_v37  ;;  %v6735_v37 = vld [vmem:[#allocation115_spill] sm:$0xff] }
 0x4a2   :  { %2079 = vmatpush.bf16.msra.mxu2 %v6723_v38  ;;  %2152 = vmatpush.bf16.msrb.mxu0 %v6724_v12  ;;  %v6733_v38 = vld [vmem:[#allocation113_spill] sm:$0xff] }
 0x4a3   :  { %v6734_v12 = vld [vmem:[#allocation33_spill] sm:$0xff] }
 0x4a6   :  { %2080 = vmatpush.bf16.msra.mxu2 %v6725_v17  ;;  %2153 = vmatpush.bf16.msrb.mxu0 %v6726_v26  ;;  %v6736_v17 = vld [vmem:[#allocation37_spill] sm:$0xff] }
 0x4a7   :  { %v6737_v26 = vld [vmem:[#allocation121_spill] sm:$0xff] }
 0x4aa   :  { %2081 = vmatpush.bf16.msra.mxu2 %v6727_v36  ;;  %2154 = vmatpush.bf16.msrb.mxu0 %v6728_v59  ;;  %v6738_v36 = vld [vmem:[#allocation41_spill] sm:$0xff]  ;;  %v6739_v59 = vld [vmem:[#allocation14_spill] sm:$0xff] }
 0x4ae   :  { %2082 = vmatpush.bf16.msra.mxu2 %v6729_v45  ;;  %2155 = vmatpush.bf16.msrb.mxu0 %v6730_v39  ;;  %v6740_v45 = vld [vmem:[#allocation45_spill] sm:$0xff]  ;;  %v6741_v39 = vld [vmem:[#allocation18_spill] sm:$0xff] }
 0x4b2   :  { %2083 = vmatpush.bf16.msra.mxu2 %v6731_v22  ;;  %2156 = vmatpush.bf16.msrb.mxu0 %v6732_v60  ;;  %v6742_v22 = vld [vmem:[#allocation47_spill] sm:$0xff]  ;;  %v6743_v60 = vld [vmem:[#allocation22_spill] sm:$0xff] }
 0x4b6   :  { %2084 = vmatpush.bf16.msra.mxu2 %v6733_v38  ;;  %2157 = vmatpush.bf16.msrb.mxu0 %v6734_v12  ;;  %v6744_v38 = vld [vmem:[#allocation50_spill] sm:$0xff] }
 0x4b7   :  { %v6745_v12 = vld [vmem:[#allocation26_spill] sm:$0xff] }
 0x4ba   :  { %2085 = vmatpush.bf16.msra.mxu2 %v6735_v37  ;;  %2158 = vmatpush.bf16.msrb.mxu0 %v6736_v17  ;;  %v6746_v37 = vld [vmem:[#allocation54_spill] sm:$0xff] }
 0x4bb   :  { %v6747_v17 = vld [vmem:[#allocation30_spill] sm:$0xff] }
 0x4be   :  { %2086 = vmatpush.bf16.msra.mxu2 %v6737_v26  ;;  %2159 = vmatpush.bf16.msrb.mxu0 %v6738_v36  ;;  %v6748_v26 = vld [vmem:[#allocation58_spill] sm:$0xff]  ;;  %v2027_v36 = vld [vmem:[#allocation2 + $0x12] sm:$0x3f] }
 0x4c2   :  { %2178 = vmatpush.bf16.msrb.mxu2 %v6739_v59  ;;  %2204 = vmatpush.bf16.msra.mxu0 %v6740_v45  ;;  %v6749_v59 = vld [vmem:[#allocation61_spill] sm:$0xff] }
 0x4c6   :  { %2179 = vmatpush.bf16.msrb.mxu2 %v6741_v39  ;;  %2205 = vmatpush.bf16.msra.mxu0 %v6742_v22  ;;  %v6750_v39 = vld [vmem:[#allocation64_spill] sm:$0xff] }
 0x4ca   :  { %2180 = vmatpush.bf16.msrb.mxu2 %v6743_v60  ;;  %2206 = vmatpush.bf16.msra.mxu0 %v6744_v38 }
 0x4ce   :  { %2181 = vmatpush.bf16.msrb.mxu2 %v6745_v12  ;;  %2207 = vmatpush.bf16.msra.mxu0 %v6746_v37  ;;  %v6751_v12 = vld [vmem:[#allocation123_spill] sm:$0xff] }
 0x4cf   :  { %v1906_v37 = vadd.f32 %v5329_v30, %v6751_v12 }
 0x4d2   :  { %2182 = vmatpush.bf16.msrb.mxu2 %v6747_v17  ;;  %2208 = vmatpush.bf16.msra.mxu0 %v6748_v26  ;;  %v6752_v17 = vld [vmem:[#allocation120_spill] sm:$0xff] }
 0x4d3   :  { %v1880_v26 = vadd.f32 %v5321_v16, %v6752_v17  ;;  %v6754_v17 = vld [vmem:[#allocation49_spill] sm:$0xff] }
 0x4d6   :  { %2183 = vmatpush.bf16.msrb.mxu2 %v6655_v44  ;;  %2209 = vmatpush.bf16.msra.mxu0 %v6749_v59 }
 0x4da   :  { %2184 = vmatpush.bf16.msrb.mxu2 %v6657_v7  ;;  %2210 = vmatpush.bf16.msra.mxu0 %v6750_v39 }
 0x4de   :  { %2185 = vmatpush.bf16.msrb.mxu2 %v6659_v63  ;;  %2211 = vmatpush.bf16.msra.mxu0 %v6660_v21  ;;  %v6753_v21 = vld [vmem:[#allocation53_spill] sm:$0xff] }
 0x4df   :  { %v1958_v5 = vadd.f32 %v5335_v51, %v6753_v21 }
 0x4fe   :  { %v1918_v38 = vpop.f32.mrf.mxu0 }
 0x4ff   :  { %v1919_v60 = vadd.f32 %v1918_v38, %v1906_v37 }
 0x501   :  { %v2030_v44 = vrot.slane %v1919_v60, 6 }
 0x504   :  { %v1892_v22 = vpop.f32.mrf.mxu2 }
 0x505   :  { %v1893_v45 = vadd.f32 %v1892_v22, %v1880_v26 }
 0x506   :  { %v1920_v59 = vpop.f32.mrf.mxu0 }
 0x507   :  { %v2031_v7 = vsel %vm233_vm0, %v1893_v45, %v2030_v44  ;;  %v2010_v44 = vadd.f32 %v5348_v41, %v6754_v17 }
 0x508   :  { %v2033_v39 = vadd.f32 %v2031_v7, %v2027_v36 }
 0x50a   :  { %v3869_v19 = vmul.f32 -1.442695, %v2033_v39 }
 0x50c   :  { %4107 = vpow2.f32 %v3869_v19  ;;  %v1894_v63 = vpop.f32.mrf.mxu2 }
 0x50e   :  { %v1970_v46 = vpop.f32.mrf.mxu0 }
 0x50f   :  { %v5399_v30 = vadd.f32 %v1970_v46, %v1958_v5  ;;  %v6755_v5 = vld [vmem:[#allocation137_spill] sm:$0xff] }
 0x510   :  { %v1932_v39 = vadd.f32 %v5327_v15, %v6755_v5 }
 0x512   :  { %v4108_v38 = vpop.eup %4107 }
 0x513   :  { %v2037_v37 = vadd.f32 1.0, %v4108_v38 }
 0x514   :  { %v1944_v16 = vpop.f32.mrf.mxu2 }
 0x515   :  { %4109 = vrcp.f32 %v2037_v37  ;;  %v2049_v63 = vand.u32 2147483648, %v2037_v37  ;;  %v2047_v46 = vand.u32 2147483647, %v2037_v37  ;;  %vm2043_vm11 = vweird.f32 %v2037_v37 }
 0x516   :  { %v1972_v60 = vpop.f32.mrf.mxu0  ;;  %v1945_v12 = vadd.f32 %v1944_v16, %v1932_v39  ;;  %v6768_v39 = vld [vmem:[#allocation129_spill] sm:$0xff] }
 0x517   :  { %v6756_v60 = vld [vmem:[#allocation46_spill] sm:$0xff]  ;;  %vm2048_vm13 = vcmp.eq.f32.partialorder %v2047_v46, 8.507059e+37  ;;  %v6766_v46 = vld [vmem:[#allocation127_spill] sm:$0xff] }
 0x518   :  { %v1984_v21 = vadd.f32 %v5331_v29, %v6756_v60 }
 0x51b   :  { %v4110_v22 = vpop.eup %4109 }
 0x51c   :  { %v2039_v59 = vmul.f32 %v4110_v22, %v2037_v37  ;;  %v1946_v26 = vpop.f32.mrf.mxu2  ;;  %vm2044_vm10 = vweird.f32 %v4110_v22 }
 0x51d   :  { %vm2045_vm12 = vmor %vm2043_vm11, %vm2044_vm10  ;;  %v2050_v26 = vor.u32 1.1754944e-38, %v2049_v63  ;;  %v6765_v63 = vld [vmem:[#allocation106_spill] sm:$0xff] }
 0x51e   :  { %v2040_v7 = vsub.f32 1.0, %v2039_v59  ;;  %v2022_v19 = vpop.f32.mrf.mxu0 }
 0x51f   :  { %v5403_v45 = vadd.f32 %v2022_v19, %v2010_v44  ;;  %v2055_v19 = vrot.slane %v2027_v36, 4  ;;  %v6761_v36 = vld [vmem:[#allocation101_spill] sm:$0xff] }
 0x520   :  { %v2041_v51 = vmul.f32 %v4110_v22, %v2040_v7 }
 0x522   :  { %v2042_v38 = vadd.f32 %v4110_v22, %v2041_v51 }
 0x524   :  { %v2046_v41 = vsel %vm2045_vm12, %v4110_v22, %v2042_v38  ;;  %v1996_v59 = vpop.f32.mrf.mxu2  ;;  %v6764_v22 = vld [vmem:[#allocation125_spill] sm:$0xff]  ;;  %v6769_v38 = vld [vmem:[#allocation112_spill] sm:$0xff] }
 0x525   :  { %v2051_v17 = vsel %vm2048_vm13, %v2050_v26, %v2046_v41  ;;  %v5409_v44 = vadd.f32 %v1996_v59, %v1984_v21  ;;  %v6757_v21 = vld [vmem:[#allocation97_spill] sm:$0xff]  ;;  %v6770_v26 = vld [vmem:[#allocation131_spill] sm:$0xff]  ;;  %v6771_v41 = vld [vmem:[#allocation114_spill] sm:$0xff] }
 0x526   :  { %v2053_v7 = vmul.f32 %v2051_v17, %v1945_v12  ;;  %v2024_v11 = vpop.f32.mrf.mxu0  ;;  %v2061_v5 = vrot.slane %v2051_v17, 2  ;;  %v6762_v12 = vld [vmem:[#allocation122_spill] sm:$0xff]  ;;  %v6763_v17 = vld [vmem:[#allocation103_spill] sm:$0xff]  ;;  %v6772_v59 = vld [vmem:[#allocation133_spill] sm:$0xff] }
 0x527   :  { %v6760_v11 = vld [vmem:[#allocation118_spill] sm:$0xff] }
 0x528   :  { %v2057_v33 = vadd.f32 %v2055_v19, %v2053_v7  ;;  %v6773_v7 = vld [vmem:[#allocation117_spill] sm:$0xff]  ;;  %v6774_v19 = vld [vmem:[#allocation119_spill] sm:$0xff] }
 0x52a   :  { %4111 = vtanh.f32 %v2057_v33  ;;  %v6759_v33 = vld [vmem:[#allocation71_spill] sm:$0xff] }
 0x52c   :  { %v1998_v15 = vpop.f32.mrf.mxu2 }
 0x52d   :  { %v6775_v15 = vld [vmem:[#allocation135_spill] sm:$0xff] }
 0x530   :  { %v4112_v51 = vpop.eup %4111 }
 0x531   :  { %v2059_v37 = vsub.f32 %v5245_v1, %v4112_v51  ;;  %v6758_v1 = vld [vmem:[#allocation69_spill] sm:$0xff] }
 0x533   :  { %v2063_v29 = vmul.f32 %v2061_v5, %v2059_v37  ;;  %v6767_v5 = vld [vmem:[#allocation109_spill] sm:$0xff]  ;;  %v6777_v37 = vld [vmem:[#allocation124_spill] sm:$0xff] }
 0x535   :  { %v5412_v60 = vadd.f32 %v4112_v51, %v2063_v29  ;;  %v6776_v51 = vld [vmem:[#allocation16_spill] sm:$0xff] }
 0x536   :  { %v6778_v29 = vld [vmem:[#allocation20_spill] sm:$0xff] }
 0x537   :  { %v2065_v16 = vpack.c.bf16 %v5412_v60, %v5412_v60 }
 0x539   :  { %2074 = vmatmul.bf16.vlgmr.msra.gmra.mxu1 %v2065_v16  ;;  %2087 = vmatmul.bf16.vlgmr.msra.gmra.mxu2 %v2065_v16 }
 0x53a   :  { %2100 = vmatmul.bf16.vlgmr.msra.gmra.mxu3 %v2065_v16  ;;  %2160 = vmatmul.bf16.vlgmr.msrb.gmra.mxu0 %v2065_v16 }
 0x53b   :  { %2230 = vmatpush.bf16.msra.mxu2 %v6484_v25  ;;  %2256 = vmatpush.bf16.msrb.mxu0 %v4629_v61 }
 0x53c   :  { %2217 = vmatpush.bf16.msra.mxu1 %v6485_v28  ;;  %2243 = vmatpush.bf16.msra.mxu3 %v6486_v6 }
 0x53f   :  { %2231 = vmatpush.bf16.msra.mxu2 %v6487_v56  ;;  %2257 = vmatpush.bf16.msrb.mxu0 %v4647_v20 }
 0x540   :  { %2218 = vmatpush.bf16.msra.mxu1 %v6488_v49  ;;  %2244 = vmatpush.bf16.msra.mxu3 %v6489_v2 }
 0x543   :  { %2232 = vmatpush.bf16.msra.mxu2 %v6490_v57  ;;  %2258 = vmatpush.bf16.msrb.mxu0 %v4663_v4 }
 0x544   :  { %2219 = vmatpush.bf16.msra.mxu1 %v6565_v34  ;;  %2245 = vmatpush.bf16.msra.mxu3 %v6566_v62 }
 0x547   :  { %2233 = vmatpush.bf16.msra.mxu2 %v6567_v54  ;;  %2259 = vmatpush.bf16.msrb.mxu0 %v6568_v32 }
 0x548   :  { %2220 = vmatpush.bf16.msra.mxu1 %v6569_v35  ;;  %2246 = vmatpush.bf16.msra.mxu3 %v6570_v8 }
 0x549   :  { %2186 = vmatmul.bf16.vlgmr.msrb.gmra.mxu2 %v2065_v16 }
 0x54a   :  { %2212 = vmatmul.bf16.vlgmr.msra.gmra.mxu0 %v2065_v16 }
 0x54b   :  { %2234 = vmatpush.bf16.msra.mxu2 %v6571_v14  ;;  %2260 = vmatpush.bf16.msrb.mxu0 %v6572_v13 }
 0x54c   :  { %2221 = vmatpush.bf16.msra.mxu1 %v6497_v27  ;;  %2247 = vmatpush.bf16.msra.mxu3 %v6573_v9 }
 0x54f   :  { %2235 = vmatpush.bf16.msra.mxu2 %v6574_v58  ;;  %2261 = vmatpush.bf16.msrb.mxu0 %v6575_v23 }
 0x550   :  { %2222 = vmatpush.bf16.msra.mxu1 %v6576_v31  ;;  %2248 = vmatpush.bf16.msra.mxu3 %v6501_v0 }
 0x553   :  { %2236 = vmatpush.bf16.msra.mxu2 %v6502_v53  ;;  %2262 = vmatpush.bf16.msrb.mxu0 %v4719_v43 }
 0x554   :  { %2223 = vmatpush.bf16.msra.mxu1 %v6577_v47  ;;  %2249 = vmatpush.bf16.msra.mxu3 %v6664_v24 }
 0x557   :  { %2237 = vmatpush.bf16.msra.mxu2 %v6579_v52  ;;  %2263 = vmatpush.bf16.msrb.mxu0 %v6580_v48 }
 0x558   :  { %2224 = vmatpush.bf16.msra.mxu1 %v6758_v1  ;;  %2250 = vmatpush.bf16.msra.mxu3 %v6759_v33 }
 0x55a   :  { %2238 = vmatmul.bf16.vlgmr.msra.gmra.mxu2 %v2065_v16  ;;  %2264 = vmatmul.bf16.vlgmr.msrb.gmra.mxu0 %v2065_v16 }
 0x55b   :  { %2282 = vmatpush.bf16.msrb.mxu2 %v6757_v21  ;;  %2348 = vmatpush.bf16.msra.mxu0 %v6760_v11 }
 0x55f   :  { %2283 = vmatpush.bf16.msrb.mxu2 %v6761_v36  ;;  %2349 = vmatpush.bf16.msra.mxu0 %v6762_v12 }
 0x563   :  { %2284 = vmatpush.bf16.msrb.mxu2 %v6763_v17  ;;  %2350 = vmatpush.bf16.msra.mxu0 %v6764_v22 }
 0x567   :  { %2285 = vmatpush.bf16.msrb.mxu2 %v6765_v63  ;;  %2351 = vmatpush.bf16.msra.mxu0 %v6766_v46 }
 0x56b   :  { %2286 = vmatpush.bf16.msrb.mxu2 %v6767_v5  ;;  %2352 = vmatpush.bf16.msra.mxu0 %v6768_v39 }
 0x56f   :  { %2287 = vmatpush.bf16.msrb.mxu2 %v6769_v38  ;;  %2353 = vmatpush.bf16.msra.mxu0 %v6770_v26  ;;  %v6779_v38 = vld [vmem:[#allocation126_spill] sm:$0xff]  ;;  %v6780_v26 = vld [vmem:[#allocation24_spill] sm:$0xff] }
 0x573   :  { %2288 = vmatpush.bf16.msrb.mxu2 %v6771_v41  ;;  %2354 = vmatpush.bf16.msra.mxu0 %v6772_v59  ;;  %v6781_v41 = vld [vmem:[#allocation128_spill] sm:$0xff] }
 0x574   :  { %v6782_v59 = vld [vmem:[#allocation28_spill] sm:$0xff] }
 0x577   :  { %2289 = vmatpush.bf16.msrb.mxu2 %v6773_v7  ;;  %2355 = vmatpush.bf16.msra.mxu0 %v6775_v15  ;;  %v6783_v7 = vld [vmem:[#allocation130_spill] sm:$0xff]  ;;  %v6785_v15 = vld [vmem:[#allocation132_spill] sm:$0xff] }
 0x57a   :  { %2290 = vmatmul.bf16.vlgmr.msrb.gmra.mxu2 %v2065_v16  ;;  %v6787_v16 = vld [vmem:[#allocation134_spill] sm:$0xff] }
 0x57b   :  { %2374 = vmatpush.bf16.msra.mxu2 %v6774_v19  ;;  %2447 = vmatpush.bf16.msrb.mxu0 %v6776_v51  ;;  %v6784_v19 = vld [vmem:[#allocation32_spill] sm:$0xff] }
 0x57c   :  { %v6786_v51 = vld [vmem:[#allocation36_spill] sm:$0xff] }
 0x57f   :  { %2375 = vmatpush.bf16.msra.mxu2 %v6777_v37  ;;  %2448 = vmatpush.bf16.msrb.mxu0 %v6778_v29  ;;  %v6788_v37 = vld [vmem:[#allocation40_spill] sm:$0xff] }
 0x580   :  { %v6789_v29 = vld [vmem:[#allocation136_spill] sm:$0xff] }
 0x583   :  { %2376 = vmatpush.bf16.msra.mxu2 %v6779_v38  ;;  %2449 = vmatpush.bf16.msrb.mxu0 %v6780_v26  ;;  %v6790_v38 = vld [vmem:[#allocation15_spill] sm:$0xff]  ;;  %v6791_v26 = vld [vmem:[#allocation44_spill] sm:$0xff] }
 0x587   :  { %2377 = vmatpush.bf16.msra.mxu2 %v6781_v41  ;;  %2450 = vmatpush.bf16.msrb.mxu0 %v6782_v59  ;;  %v6792_v41 = vld [vmem:[#allocation19_spill] sm:$0xff] }
 0x588   :  { %v6793_v59 = vld [vmem:[#allocation23_spill] sm:$0xff] }
 0x58b   :  { %2378 = vmatpush.bf16.msra.mxu2 %v6783_v7  ;;  %2451 = vmatpush.bf16.msrb.mxu0 %v6784_v19  ;;  %v6794_v7 = vld [vmem:[#allocation27_spill] sm:$0xff] }
 0x58c   :  { %v6795_v19 = vld [vmem:[#allocation31_spill] sm:$0xff] }
 0x58f   :  { %2379 = vmatpush.bf16.msra.mxu2 %v6785_v15  ;;  %2452 = vmatpush.bf16.msrb.mxu0 %v6786_v51  ;;  %v6796_v15 = vld [vmem:[#allocation35_spill] sm:$0xff] }
 0x590   :  { %v6797_v51 = vld [vmem:[#allocation39_spill] sm:$0xff] }
 0x593   :  { %2380 = vmatpush.bf16.msra.mxu2 %v6787_v16  ;;  %2453 = vmatpush.bf16.msrb.mxu0 %v6788_v37  ;;  %v6798_v16 = vld [vmem:[#allocation43_spill] sm:$0xff] }
 0x597   :  { %2381 = vmatpush.bf16.msra.mxu2 %v6789_v29  ;;  %2454 = vmatpush.bf16.msrb.mxu0 %v6791_v26  ;;  %v6799_v29 = vld [vmem:[#allocation57_spill] sm:$0xff] }
 0x59b   :  { %2473 = vmatpush.bf16.msrb.mxu2 %v6790_v38 }
 0x59f   :  { %2474 = vmatpush.bf16.msrb.mxu2 %v6792_v41 }
 0x5a3   :  { %2475 = vmatpush.bf16.msrb.mxu2 %v6793_v59  ;;  %v6800_v59 = vld [vmem:[#allocation48_spill] sm:$0xff] }
 0x5a7   :  { %2476 = vmatpush.bf16.msrb.mxu2 %v6794_v7 }
 0x5ab   :  { %2477 = vmatpush.bf16.msrb.mxu2 %v6795_v19 }
 0x5af   :  { %2478 = vmatpush.bf16.msrb.mxu2 %v6796_v15 }
 0x5b3   :  { %2479 = vmatpush.bf16.msrb.mxu2 %v6797_v51 }
 0x5b6   :  { %v2075_v37 = vpop.f32.mrf.mxu1 }
 0x5b7   :  { %2480 = vmatpush.bf16.msrb.mxu2 %v6798_v16  ;;  %v2076_v39 = vadd.f32 %v2075_v37, %v6799_v29  ;;  %v5489_v38 = vpop.f32.mrf.mxu0 }
 0x5b9   :  { %v2105_v26 = vadd.f32 %v2076_v39, %v5399_v30 }
 0x5bb   :  { %v3870_v41 = vmul.f32 -1.442695, %v2105_v26 }
 0x5bc   :  { %v2088_v5 = vpop.f32.mrf.mxu2 }
 0x5bd   :  { %4113 = vpow2.f32 %v3870_v41  ;;  %v2089_v7 = vadd.f32 %v2088_v5, %v6800_v59  ;;  %v2101_v46 = vpop.f32.mrf.mxu3 }
 0x5be   :  { %v2077_v19 = vpop.f32.mrf.mxu1  ;;  %v2102_v11 = vadd.f32 %v2101_v46, %v4963_v55 }
 0x5bf   :  { %v2106_v15 = vadd.f32 %v2089_v7, %v5409_v44  ;;  %v2163_v63 = vpop.f32.mrf.mxu0 }
 0x5c1   :  { %v3871_v51 = vmul.f32 -1.442695, %v2106_v15 }
 0x5c3   :  { %v4114_v22 = vpop.eup %4113  ;;  %4115 = vpow2.f32 %v3871_v51 }
 0x5c4   :  { %v2113_v16 = vadd.f32 1.0, %v4114_v22  ;;  %v2090_v17 = vpop.f32.mrf.mxu2 }
 0x5c5   :  { %v2103_v37 = vpop.f32.mrf.mxu3 }
 0x5c6   :  { %4117 = vrcp.f32 %v2113_v16  ;;  %v2126_v44 = vand.u32 2147483648, %v2113_v16  ;;  %v2124_v7 = vand.u32 2147483647, %v2113_v16  ;;  %vm2120_vm15 = vweird.f32 %v2113_v16 }
 0x5c7   :  { %v5494_v29 = vpop.f32.mrf.mxu0 }
 0x5c8   :  { %v2127_v51 = vor.u32 1.1754944e-38, %v2126_v44  ;;  %vm2125_vm3 = vcmp.eq.f32.partialorder %v2124_v7, 8.507059e+37 }
 0x5c9   :  { %v4116_v30 = vpop.eup %4115 }
 0x5ca   :  { %v2114_v39 = vadd.f32 1.0, %v4116_v30 }
 0x5cc   :  { %v4118_v26 = vpop.eup %4117  ;;  %4119 = vrcp.f32 %v2114_v39  ;;  %v5496_v41 = vpop.f32.mrf.mxu2  ;;  %v2141_v44 = vand.u32 2147483648, %v2114_v39  ;;  %vm2135_vm5 = vweird.f32 %v2114_v39  ;;  %v2139_v7 = vand.u32 2147483647, %v2114_v39 }
 0x5cd   :  { %v2116_v5 = vmul.f32 %v4118_v26, %v2113_v16  ;;  %vm2121_vm14 = vweird.f32 %v4118_v26  ;;  %v85_v16 = vld [vmem:[%s6066_s0 + $0x8] sm:$0x3] }
 0x5ce   :  { %vm2122_vm2 = vmor %vm2120_vm15, %vm2121_vm14  ;;  %112 = vperm.xlu2 %4057, %v85_v16   ;;  %vm2140_vm7 = vcmp.eq.f32.partialorder %v2139_v7, 8.507059e+37  ;;  %v6805_v16 = vld [vmem:[#allocation83_spill] sm:$0xff] }
 0x5cf   :  { %v2117_v19 = vsub.f32 1.0, %v2116_v5  ;;  %v2215_v59 = vpop.f32.mrf.mxu0 }
 0x5d1   :  { %v2118_v63 = vmul.f32 %v4118_v26, %v2117_v19 }
 0x5d2   :  { %v4120_v15 = vpop.eup %4119 }
 0x5d3   :  { %v2131_v22 = vmul.f32 %v4120_v15, %v2114_v39  ;;  %v2119_v17 = vadd.f32 %v4118_v26, %v2118_v63  ;;  %vm2136_vm4 = vweird.f32 %v4120_v15 }
 0x5d4   :  { %v2189_v37 = vpop.f32.mrf.mxu2  ;;  %vm2137_vm6 = vmor %vm2135_vm5, %vm2136_vm4 }
 0x5d5   :  { %v2132_v12 = vsub.f32 1.0, %v2131_v22  ;;  %v2123_v30 = vsel %vm2122_vm2, %v4118_v26, %v2119_v17  ;;  %v2142_v22 = vor.u32 1.1754944e-38, %v2141_v44  ;;  %v6807_v44 = vld [vmem:[#allocation86_spill] sm:$0xff] }
 0x5d6   :  { %v2128_v36 = vsel %vm2125_vm3, %v2127_v51, %v2123_v30  ;;  %v6803_v30 = vld [vmem:[#allocation80_spill] sm:$0xff] }
 0x5d7   :  { %v2145_v5 = vmul.f32 %v2128_v36, %v5403_v45  ;;  %v5500_v59 = vpop.f32.mrf.mxu0  ;;  %v2133_v19 = vmul.f32 %v4120_v15, %v2132_v12  ;;  %v86_v12 = vld [vmem:[%s6066_s0 + $0xa] sm:$0x3] }
 0x5d8   :  { %117 = vperm.xlu2 %4057, %v86_v12   ;;  %v6814_v12 = vld [vmem:[#allocation102_spill] sm:$0xff] }
 0x5d9   :  { %v2146_v33 = vadd.f32 %v2145_v5, %v2102_v11  ;;  %v2134_v63 = vadd.f32 %v4120_v15, %v2133_v19  ;;  %v6804_v19 = vld [vmem:[#allocation82_spill] sm:$0xff] }
 0x5db   :  { %4121 = vtanh.f32 %v2146_v33  ;;  %v2138_v45 = vsel %vm2137_vm6, %v4120_v15, %v2134_v63  ;;  %v6802_v15 = vld [vmem:[#allocation79_spill] sm:$0xff]  ;;  %v6806_v63 = vld [vmem:[#allocation85_spill] sm:$0xff] }
 0x5dc   :  { %v2143_v11 = vsel %vm2140_vm7, %v2142_v22, %v2138_v45  ;;  %v6809_v45 = vld [vmem:[#allocation93_spill] sm:$0xff]  ;;  %v6811_v22 = vld [vmem:[#allocation99_spill] sm:$0xff] }
 0x5dd   :  { %v5505_v26 = vpop.f32.mrf.mxu2 }
 0x5df   :  { %v2267_v46 = vpop.f32.mrf.mxu0 }
 0x5e0   :  { %v6808_v46 = vld [vmem:[#allocation90_spill] sm:$0xff] }
 0x5e1   :  { %v4122_v36 = vpop.eup %4121 }
 0x5e2   :  { %v2148_v33 = vsub.f32 %v5338_v10, %v4122_v36  ;;  %v6801_v10 = vld [vmem:[#allocation77_spill] sm:$0xff] }
 0x5e4   :  { %v2149_v17 = vmul.f32 %v2148_v33, %v2143_v11  ;;  %v6812_v33 = vld [vmem:[#allocation100_spill] sm:$0xff]  ;;  %v6813_v11 = vld [vmem:[#allocation13_spill] sm:$0xff] }
 0x5e5   :  { %v2241_v51 = vpop.f32.mrf.mxu2 }
 0x5e6   :  { %v5511_v37 = vadd.f32 %v4122_v36, %v2149_v17  ;;  %v6810_v36 = vld [vmem:[#allocation98_spill] sm:$0xff]  ;;  %v6815_v17 = vld [vmem:[#allocation17_spill] sm:$0xff]  ;;  %v6816_v51 = vld [vmem:[#allocation104_spill] sm:$0xff] }
 0x5e8   :  { %v2151_v39 = vpack.c.bf16 %v5511_v37, %v5511_v37 }
 0x5ea   :  { %2173 = vmatmul.bf16.vlgmr.msrb.gmra.mxu1 %v2151_v39  ;;  %2199 = vmatmul.bf16.vlgmr.msrb.gmra.mxu3 %v2151_v39 }
 0x5eb   :  { %2269 = vmatpush.bf16.msrb.mxu1 %v6518_v3  ;;  %2295 = vmatpush.bf16.msrb.mxu3 %v6708_v40 }
 0x5ef   :  { %2270 = vmatpush.bf16.msrb.mxu1 %v6709_v50  ;;  %2296 = vmatpush.bf16.msrb.mxu3 %v6710_v18  ;;  %v6847_v18 = vld [vmem:[#allocation64_spill] sm:$0xff] }
 0x5f3   :  { %2271 = vmatpush.bf16.msrb.mxu1 %v6711_v42  ;;  %2297 = vmatpush.bf16.msrb.mxu3 %v6801_v10  ;;  %v6846_v42 = vld [vmem:[#allocation38_spill] sm:$0xff] }
 0x5f7   :  { %2272 = vmatpush.bf16.msrb.mxu1 %v6802_v15  ;;  %2298 = vmatpush.bf16.msrb.mxu3 %v6803_v30 }
 0x5fa   :  { %2225 = vmatmul.bf16.vlgmr.msra.gmra.mxu1 %v2151_v39  ;;  %2251 = vmatmul.bf16.vlgmr.msra.gmra.mxu3 %v2151_v39 }
 0x5fb   :  { %2273 = vmatpush.bf16.msrb.mxu1 %v6804_v19  ;;  %2299 = vmatpush.bf16.msrb.mxu3 %v6805_v16 }
 0x5fd   :  { %v5523_v5 = vpop.f32.mrf.mxu2 }
 0x5ff   :  { %2274 = vmatpush.bf16.msrb.mxu1 %v6806_v63  ;;  %2300 = vmatpush.bf16.msrb.mxu3 %v6807_v44 }
 0x603   :  { %2275 = vmatpush.bf16.msrb.mxu1 %v6808_v46  ;;  %2301 = vmatpush.bf16.msrb.mxu3 %v6809_v45  ;;  %v6818_v46 = vld [vmem:[#allocation107_spill] sm:$0xff]  ;;  %v6819_v45 = vld [vmem:[#allocation25_spill] sm:$0xff] }
 0x605   :  { %v2293_v7 = vpop.f32.mrf.mxu2 }
 0x606   :  { %v6817_v7 = vld [vmem:[#allocation21_spill] sm:$0xff] }
 0x607   :  { %2276 = vmatpush.bf16.msrb.mxu1 %v6810_v36  ;;  %2302 = vmatpush.bf16.msrb.mxu3 %v6811_v22  ;;  %v6820_v36 = vld [vmem:[#allocation110_spill] sm:$0xff]  ;;  %v6821_v22 = vld [vmem:[#allocation29_spill] sm:$0xff] }
 0x60a   :  { %2277 = vmatmul.bf16.vlgmr.msrb.gmra.mxu1 %v2151_v39  ;;  %2303 = vmatmul.bf16.vlgmr.msrb.gmra.mxu3 %v2151_v39  ;;  %v6824_v39 = vld [vmem:[#allocation115_spill] sm:$0xff] }
 0x60b   :  { %2361 = vmatpush.bf16.msra.mxu1 %v6812_v33  ;;  %2434 = vmatpush.bf16.msra.mxu3 %v6813_v11  ;;  %v6822_v33 = vld [vmem:[#allocation113_spill] sm:$0xff] }
 0x60c   :  { %v6823_v11 = vld [vmem:[#allocation33_spill] sm:$0xff] }
 0x60f   :  { %2362 = vmatpush.bf16.msra.mxu1 %v6814_v12  ;;  %2435 = vmatpush.bf16.msra.mxu3 %v6815_v17  ;;  %v6825_v12 = vld [vmem:[#allocation37_spill] sm:$0xff] }
 0x610   :  { %v6826_v17 = vld [vmem:[#allocation121_spill] sm:$0xff] }
 0x613   :  { %2363 = vmatpush.bf16.msra.mxu1 %v6816_v51  ;;  %2436 = vmatpush.bf16.msra.mxu3 %v6817_v7  ;;  %v6827_v51 = vld [vmem:[#allocation41_spill] sm:$0xff]  ;;  %v6828_v7 = vld [vmem:[#allocation14_spill] sm:$0xff] }
 0x617   :  { %2364 = vmatpush.bf16.msra.mxu1 %v6818_v46  ;;  %2437 = vmatpush.bf16.msra.mxu3 %v6819_v45  ;;  %v6829_v46 = vld [vmem:[#allocation45_spill] sm:$0xff]  ;;  %v6830_v45 = vld [vmem:[#allocation18_spill] sm:$0xff] }
 0x61b   :  { %2365 = vmatpush.bf16.msra.mxu1 %v6820_v36  ;;  %2438 = vmatpush.bf16.msra.mxu3 %v6821_v22  ;;  %v6831_v36 = vld [vmem:[#allocation47_spill] sm:$0xff]  ;;  %v6832_v22 = vld [vmem:[#allocation22_spill] sm:$0xff] }
 0x61f   :  { %2366 = vmatpush.bf16.msra.mxu1 %v6822_v33  ;;  %2439 = vmatpush.bf16.msra.mxu3 %v6823_v11  ;;  %v6833_v33 = vld [vmem:[#allocation50_spill] sm:$0xff] }
 0x620   :  { %v6834_v11 = vld [vmem:[#allocation26_spill] sm:$0xff] }
 0x623   :  { %2367 = vmatpush.bf16.msra.mxu1 %v6824_v39  ;;  %2440 = vmatpush.bf16.msra.mxu3 %v6825_v12  ;;  %v6835_v39 = vld [vmem:[#allocation54_spill] sm:$0xff] }
 0x624   :  { %v6836_v12 = vld [vmem:[#allocation30_spill] sm:$0xff] }
 0x627   :  { %2368 = vmatpush.bf16.msra.mxu1 %v6826_v17  ;;  %2441 = vmatpush.bf16.msra.mxu3 %v6827_v51  ;;  %v6837_v17 = vld [vmem:[#allocation58_spill] sm:$0xff] }
 0x628   :  { %v113_v51 = vpop.permute.xlu2 %112 }
 0x62b   :  { %2460 = vmatpush.bf16.msrb.mxu1 %v6828_v7  ;;  %2486 = vmatpush.bf16.msrb.mxu3 %v6829_v46  ;;  %v6838_v7 = vld [vmem:[#allocation88_spill] sm:$0xff]  ;;  %v6839_v46 = vld [vmem:[#allocation89_spill] sm:$0xff] }
 0x62c   :  { %v149_v44 = vmul.f32 %v6838_v7, %v113_v51  ;;  %v150_v63 = vmul.f32 %v6839_v46, %v113_v51 }
 0x62f   :  { %2461 = vmatpush.bf16.msrb.mxu1 %v6830_v45  ;;  %2487 = vmatpush.bf16.msrb.mxu3 %v6831_v36  ;;  %v6840_v45 = vld [vmem:[#allocation91_spill] sm:$0xff]  ;;  %v6841_v36 = vld [vmem:[#allocation92_spill] sm:$0xff] }
 0x630   :  { %v151_v16 = vmul.f32 %v6840_v45, %v113_v51  ;;  %v181_v19 = vadd.f32 %v6841_v36, %v149_v44 }
 0x632   :  { %v118_v50 = vpop.permute.xlu2 %117 }
 0x633   :  { %2462 = vmatpush.bf16.msrb.mxu1 %v6832_v22  ;;  %2488 = vmatpush.bf16.msrb.mxu3 %v6833_v33  ;;  %v6842_v22 = vld [vmem:[#allocation94_spill] sm:$0xff]  ;;  %v6843_v33 = vld [vmem:[#allocation95_spill] sm:$0xff]  ;;  %v154_v44 = vmul.f32 %v6840_v45, %v118_v50 }
 0x634   :  { %v182_v30 = vadd.f32 %v6842_v22, %v150_v63  ;;  %v183_v15 = vadd.f32 %v6843_v33, %v151_v16  ;;  %v152_v63 = vmul.f32 %v6838_v7, %v118_v50  ;;  %v153_v16 = vmul.f32 %v6839_v46, %v118_v50 }
 0x636   :  { %v226_v10 = vrot.slane %v183_v15, 4  ;;  %v185_v15 = vadd.f32 %v6842_v22, %v153_v16 }
 0x637   :  { %2463 = vmatpush.bf16.msrb.mxu1 %v6834_v11  ;;  %2489 = vmatpush.bf16.msrb.mxu3 %v6835_v39  ;;  %v6844_v11 = vld [vmem:[#allocation34_spill] sm:$0xff]  ;;  %v6845_v39 = vld [vmem:[#allocation61_spill] sm:$0xff] }
 0x63b   :  { %2464 = vmatpush.bf16.msrb.mxu1 %v6836_v12  ;;  %2490 = vmatpush.bf16.msrb.mxu3 %v6837_v17  ;;  %v225_v12 = vrot.slane %v182_v30, 6  ;;  %v186_v30 = vadd.f32 %v6843_v33, %v154_v44 }
 0x63d   :  { %v243_v17 = vsel %vm233_vm0, %v181_v19, %v225_v12  ;;  %v6848_v19 = vld [vmem:[#allocation42_spill] sm:$0xff]  ;;  %v6849_v12 = vld [vmem:[#allocation67_spill] sm:$0xff] }
 0x63e   :  { %v244_v51 = vsel %vm235_vm1, %v243_v17, %v226_v10  ;;  %v228_v10 = vrot.slane %v186_v30, 4 }
 0x63f   :  { %2465 = vmatpush.bf16.msrb.mxu1 %v6844_v11  ;;  %2491 = vmatpush.bf16.msrb.mxu3 %v6845_v39  ;;  %263 = vst [vmem:[#allocation2 + $0x18] sm:$0x3f] %v244_v51  ;;  %v184_v39 = vadd.f32 %v6841_v36, %v152_v63  ;;  %v6850_v51 = vld [vmem:[#allocation123_spill] sm:$0xff]  ;;  %v6851_v36 = vld [vmem:[#allocation120_spill] sm:$0xff] }
 0x640   :  { %v2188_v50 = vadd.f32 %v5496_v41, %v6850_v51  ;;  %v2162_v22 = vadd.f32 %v5489_v38, %v6851_v36 }
 0x643   :  { %2466 = vmatpush.bf16.msrb.mxu1 %v6846_v42  ;;  %2492 = vmatpush.bf16.msrb.mxu3 %v6847_v18  ;;  %v227_v18 = vrot.slane %v185_v15, 6 }
 0x645   :  { %v245_v17 = vsel %vm233_vm0, %v184_v39, %v227_v18 }
 0x646   :  { %v246_v7 = vsel %vm235_vm1, %v245_v17, %v228_v10  ;;  %v6852_v17 = vld [vmem:[#allocation53_spill] sm:$0xff] }
 0x647   :  { %2467 = vmatpush.bf16.msrb.mxu1 %v6848_v19  ;;  %2493 = vmatpush.bf16.msrb.mxu3 %v6849_v12  ;;  %264 = vst [vmem:[#allocation2 + $0x1e] sm:$0x3f] %v246_v7  ;;  %v2309_v12 = vld [vmem:[#allocation2 + $0x18] sm:$0x3f]  ;;  %v2240_v7 = vadd.f32 %v5505_v26, %v6852_v17 }
 0x648   :  { %v2337_v17 = vrot.slane %v2309_v12, 4 }
 0x667   :  { %v2174_v46 = vpop.f32.mrf.mxu1 }
 0x668   :  { %v2175_v16 = vadd.f32 %v2174_v46, %v2162_v22 }
 0x66d   :  { %v2200_v45 = vpop.f32.mrf.mxu3 }
 0x66e   :  { %v2201_v33 = vadd.f32 %v2200_v45, %v2188_v50  ;;  %v6853_v45 = vld [vmem:[#allocation46_spill] sm:$0xff] }
 0x66f   :  { %v2176_v63 = vpop.f32.mrf.mxu1  ;;  %v2266_v22 = vadd.f32 %v5500_v59, %v6853_v45 }
 0x670   :  { %v2312_v44 = vrot.slane %v2201_v33, 6 }
 0x672   :  { %v2313_v15 = vsel %vm233_vm0, %v2175_v16, %v2312_v44 }
 0x673   :  { %v2315_v30 = vadd.f32 %v2313_v15, %v2309_v12  ;;  %v6857_v12 = vld [vmem:[#allocation118_spill] sm:$0xff] }
 0x675   :  { %v3872_v18 = vmul.f32 -1.442695, %v2315_v30  ;;  %v2202_v39 = vpop.f32.mrf.mxu3 }
 0x676   :  { %v6855_v39 = vld [vmem:[#allocation137_spill] sm:$0xff] }
 0x677   :  { %4123 = vpow2.f32 %v3872_v18  ;;  %v2226_v10 = vpop.f32.mrf.mxu1  ;;  %v6854_v18 = vld [vmem:[#allocation49_spill] sm:$0xff] }
 0x67d   :  { %v4124_v41 = vpop.eup %4123  ;;  %v2252_v51 = vpop.f32.mrf.mxu3 }
 0x67e   :  { %v2319_v19 = vadd.f32 1.0, %v4124_v41  ;;  %v5588_v42 = vadd.f32 %v2252_v51, %v2240_v7  ;;  %v2292_v51 = vadd.f32 %v5523_v5, %v6854_v18  ;;  %v2214_v7 = vadd.f32 %v5494_v29, %v6855_v39 }
 0x67f   :  { %v2228_v38 = vpop.f32.mrf.mxu1 }
 0x680   :  { %4125 = vrcp.f32 %v2319_v19  ;;  %v2331_v15 = vand.u32 2147483648, %v2319_v19  ;;  %v2329_v26 = vand.u32 2147483647, %v2319_v19  ;;  %vm2325_vm8 = vweird.f32 %v2319_v19 }
 0x682   :  { %v2332_v59 = vor.u32 1.1754944e-38, %v2331_v15  ;;  %vm2330_vm10 = vcmp.eq.f32.partialorder %v2329_v26, 8.507059e+37  ;;  %v6863_v26 = vld [vmem:[#allocation127_spill] sm:$0xff] }
 0x685   :  { %v2254_v46 = vpop.f32.mrf.mxu3 }
 0x686   :  { %v4126_v50 = vpop.eup %4125 }
 0x687   :  { %v2321_v33 = vmul.f32 %v4126_v50, %v2319_v19  ;;  %v2278_v63 = vpop.f32.mrf.mxu1  ;;  %vm2326_vm1 = vweird.f32 %v4126_v50 }
 0x688   :  { %v5592_v16 = vadd.f32 %v2278_v63, %v2266_v22  ;;  %vm2327_vm9 = vmor %vm2325_vm8, %vm2326_vm1  ;;  %v2227_v22 = vadd.f32 %v2226_v10, %v2214_v7  ;;  %v6859_v10 = vld [vmem:[#allocation122_spill] sm:$0xff]  ;;  %v6866_v7 = vld [vmem:[#allocation112_spill] sm:$0xff] }
 0x689   :  { %v2322_v44 = vsub.f32 1.0, %v2321_v33 }
 0x68b   :  { %v2323_v30 = vmul.f32 %v4126_v50, %v2322_v44 }
 0x68d   :  { %v2324_v41 = vadd.f32 %v4126_v50, %v2323_v30  ;;  %v2304_v38 = vpop.f32.mrf.mxu3 }
 0x68e   :  { %v5598_v46 = vadd.f32 %v2304_v38, %v2292_v51  ;;  %v6865_v51 = vld [vmem:[#allocation129_spill] sm:$0xff]  ;;  %v6868_v38 = vld [vmem:[#allocation114_spill] sm:$0xff] }
 0x68f   :  { %v2328_v63 = vsel %vm2327_vm9, %v4126_v50, %v2324_v41  ;;  %v2280_v33 = vpop.f32.mrf.mxu1  ;;  %v6861_v50 = vld [vmem:[#allocation125_spill] sm:$0xff]  ;;  %v6867_v41 = vld [vmem:[#allocation131_spill] sm:$0xff] }
 0x690   :  { %v2333_v44 = vsel %vm2330_vm10, %v2332_v59, %v2328_v63  ;;  %v6869_v59 = vld [vmem:[#allocation133_spill] sm:$0xff]  ;;  %v6871_v63 = vld [vmem:[#allocation119_spill] sm:$0xff] }
 0x691   :  { %v2335_v45 = vmul.f32 %v2333_v44, %v2227_v22  ;;  %v2343_v30 = vrot.slane %v2333_v44, 2  ;;  %v6870_v22 = vld [vmem:[#allocation117_spill] sm:$0xff]  ;;  %v6872_v33 = vld [vmem:[#allocation135_spill] sm:$0xff]  ;;  %v6873_v44 = vld [vmem:[#allocation16_spill] sm:$0xff] }
 0x693   :  { %v2339_v36 = vadd.f32 %v2337_v17, %v2335_v45  ;;  %v6860_v17 = vld [vmem:[#allocation103_spill] sm:$0xff]  ;;  %v6862_v45 = vld [vmem:[#allocation106_spill] sm:$0xff] }
 0x695   :  { %4127 = vtanh.f32 %v2339_v36  ;;  %v2306_v5 = vpop.f32.mrf.mxu3  ;;  %v6858_v36 = vld [vmem:[#allocation101_spill] sm:$0xff] }
 0x696   :  { %v6874_v5 = vld [vmem:[#allocation124_spill] sm:$0xff] }
 0x69b   :  { %v4128_v18 = vpop.eup %4127 }
 0x69c   :  { %v2341_v29 = vsub.f32 %v5412_v60, %v4128_v18  ;;  %v6856_v60 = vld [vmem:[#allocation71_spill] sm:$0xff] }
 0x69e   :  { %v2345_v19 = vmul.f32 %v2343_v30, %v2341_v29  ;;  %v6875_v29 = vld [vmem:[#allocation20_spill] sm:$0xff]  ;;  %v6876_v30 = vld [vmem:[#allocation126_spill] sm:$0xff] }
 0x6a0   :  { %v5601_v39 = vadd.f32 %v4128_v18, %v2345_v19  ;;  %v6864_v18 = vld [vmem:[#allocation109_spill] sm:$0xff]  ;;  %v6877_v19 = vld [vmem:[#allocation24_spill] sm:$0xff] }
 0x6a2   :  { %v2347_v15 = vpack.c.bf16 %v5601_v39, %v5601_v39 }
 0x6a4   :  { %2356 = vmatmul.bf16.vlgmr.msra.gmra.mxu0 %v2347_v15  ;;  %2369 = vmatmul.bf16.vlgmr.msra.gmra.mxu1 %v2347_v15 }
 0x6a5   :  { %2382 = vmatmul.bf16.vlgmr.msra.gmra.mxu2 %v2347_v15  ;;  %2442 = vmatmul.bf16.vlgmr.msra.gmra.mxu3 %v2347_v15 }
 0x6a6   :  { %2512 = vmatpush.bf16.msra.mxu1 %v6484_v25  ;;  %2538 = vmatpush.bf16.msra.mxu3 %v4629_v61 }
 0x6a7   :  { %2499 = vmatpush.bf16.msra.mxu0 %v6485_v28  ;;  %2525 = vmatpush.bf16.msra.mxu2 %v6486_v6 }
 0x6aa   :  { %2513 = vmatpush.bf16.msra.mxu1 %v6487_v56  ;;  %2539 = vmatpush.bf16.msra.mxu3 %v4647_v20 }
 0x6ab   :  { %2500 = vmatpush.bf16.msra.mxu0 %v6488_v49  ;;  %2526 = vmatpush.bf16.msra.mxu2 %v6489_v2 }
 0x6ae   :  { %2514 = vmatpush.bf16.msra.mxu1 %v6490_v57  ;;  %2540 = vmatpush.bf16.msra.mxu3 %v4663_v4 }
 0x6af   :  { %2501 = vmatpush.bf16.msra.mxu0 %v6565_v34  ;;  %2527 = vmatpush.bf16.msra.mxu2 %v6566_v62 }
 0x6b2   :  { %2515 = vmatpush.bf16.msra.mxu1 %v6567_v54  ;;  %2541 = vmatpush.bf16.msra.mxu3 %v6568_v32 }
 0x6b3   :  { %2502 = vmatpush.bf16.msra.mxu0 %v6569_v35  ;;  %2528 = vmatpush.bf16.msra.mxu2 %v6570_v8 }
 0x6b4   :  { %2468 = vmatmul.bf16.vlgmr.msrb.gmra.mxu1 %v2347_v15 }
 0x6b5   :  { %2494 = vmatmul.bf16.vlgmr.msrb.gmra.mxu3 %v2347_v15 }
 0x6b6   :  { %2516 = vmatpush.bf16.msra.mxu1 %v6571_v14  ;;  %2542 = vmatpush.bf16.msra.mxu3 %v6572_v13 }
 0x6b7   :  { %2503 = vmatpush.bf16.msra.mxu0 %v6497_v27  ;;  %2529 = vmatpush.bf16.msra.mxu2 %v6573_v9 }
 0x6ba   :  { %2517 = vmatpush.bf16.msra.mxu1 %v6574_v58  ;;  %2543 = vmatpush.bf16.msra.mxu3 %v6575_v23 }
 0x6bb   :  { %2504 = vmatpush.bf16.msra.mxu0 %v6576_v31  ;;  %2530 = vmatpush.bf16.msra.mxu2 %v6501_v0 }
 0x6be   :  { %2518 = vmatpush.bf16.msra.mxu1 %v6502_v53  ;;  %2544 = vmatpush.bf16.msra.mxu3 %v4719_v43 }
 0x6bf   :  { %2505 = vmatpush.bf16.msra.mxu0 %v6577_v47  ;;  %2531 = vmatpush.bf16.msra.mxu2 %v6664_v24 }
 0x6c2   :  { %2519 = vmatpush.bf16.msra.mxu1 %v6579_v52  ;;  %2545 = vmatpush.bf16.msra.mxu3 %v6580_v48 }
 0x6c3   :  { %2506 = vmatpush.bf16.msra.mxu0 %v6758_v1  ;;  %2532 = vmatpush.bf16.msra.mxu2 %v6856_v60 }
 0x6c5   :  { %2520 = vmatmul.bf16.vlgmr.msra.gmra.mxu1 %v2347_v15  ;;  %2546 = vmatmul.bf16.vlgmr.msra.gmra.mxu3 %v2347_v15 }
 0x6c6   :  { %2564 = vmatpush.bf16.msrb.mxu1 %v6757_v21  ;;  %2630 = vmatpush.bf16.msrb.mxu3 %v6857_v12 }
 0x6ca   :  { %2565 = vmatpush.bf16.msrb.mxu1 %v6858_v36  ;;  %2631 = vmatpush.bf16.msrb.mxu3 %v6859_v10 }
 0x6ce   :  { %2566 = vmatpush.bf16.msrb.mxu1 %v6860_v17  ;;  %2632 = vmatpush.bf16.msrb.mxu3 %v6861_v50 }
 0x6d2   :  { %2567 = vmatpush.bf16.msrb.mxu1 %v6862_v45  ;;  %2633 = vmatpush.bf16.msrb.mxu3 %v6863_v26 }
 0x6d6   :  { %2568 = vmatpush.bf16.msrb.mxu1 %v6864_v18  ;;  %2634 = vmatpush.bf16.msrb.mxu3 %v6865_v51 }
 0x6da   :  { %2569 = vmatpush.bf16.msrb.mxu1 %v6866_v7  ;;  %2635 = vmatpush.bf16.msrb.mxu3 %v6867_v41  ;;  %v6896_v41 = vld [vmem:[#allocation57_spill] sm:$0xff]  ;;  %v6897_v7 = vld [vmem:[#allocation48_spill] sm:$0xff] }
 0x6de   :  { %2570 = vmatpush.bf16.msrb.mxu1 %v6868_v38  ;;  %2636 = vmatpush.bf16.msrb.mxu3 %v6869_v59  ;;  %v6878_v38 = vld [vmem:[#allocation128_spill] sm:$0xff] }
 0x6df   :  { %v6879_v59 = vld [vmem:[#allocation28_spill] sm:$0xff] }
 0x6e2   :  { %2571 = vmatpush.bf16.msrb.mxu1 %v6870_v22  ;;  %2637 = vmatpush.bf16.msrb.mxu3 %v6872_v33  ;;  %v6880_v22 = vld [vmem:[#allocation130_spill] sm:$0xff]  ;;  %v6882_v33 = vld [vmem:[#allocation132_spill] sm:$0xff] }
 0x6e5   :  { %2572 = vmatmul.bf16.vlgmr.msrb.gmra.mxu1 %v2347_v15  ;;  %v6884_v15 = vld [vmem:[#allocation134_spill] sm:$0xff] }
 0x6e6   :  { %2656 = vmatpush.bf16.msra.mxu1 %v6871_v63  ;;  %2729 = vmatpush.bf16.msra.mxu3 %v6873_v44  ;;  %v6881_v63 = vld [vmem:[#allocation32_spill] sm:$0xff] }
 0x6e7   :  { %v6883_v44 = vld [vmem:[#allocation36_spill] sm:$0xff] }
 0x6ea   :  { %2657 = vmatpush.bf16.msra.mxu1 %v6874_v5  ;;  %2730 = vmatpush.bf16.msra.mxu3 %v6875_v29  ;;  %v6885_v5 = vld [vmem:[#allocation40_spill] sm:$0xff] }
 0x6eb   :  { %v6886_v29 = vld [vmem:[#allocation136_spill] sm:$0xff] }
 0x6ee   :  { %2658 = vmatpush.bf16.msra.mxu1 %v6876_v30  ;;  %2731 = vmatpush.bf16.msra.mxu3 %v6877_v19  ;;  %v6887_v30 = vld [vmem:[#allocation15_spill] sm:$0xff]  ;;  %v6888_v19 = vld [vmem:[#allocation44_spill] sm:$0xff] }
 0x6f2   :  { %2659 = vmatpush.bf16.msra.mxu1 %v6878_v38  ;;  %2732 = vmatpush.bf16.msra.mxu3 %v6879_v59  ;;  %v6889_v38 = vld [vmem:[#allocation19_spill] sm:$0xff] }
 0x6f3   :  { %v6890_v59 = vld [vmem:[#allocation23_spill] sm:$0xff] }
 0x6f6   :  { %2660 = vmatpush.bf16.msra.mxu1 %v6880_v22  ;;  %2733 = vmatpush.bf16.msra.mxu3 %v6881_v63  ;;  %v6891_v22 = vld [vmem:[#allocation27_spill] sm:$0xff] }
 0x6f7   :  { %v6892_v63 = vld [vmem:[#allocation31_spill] sm:$0xff] }
 0x6fa   :  { %2661 = vmatpush.bf16.msra.mxu1 %v6882_v33  ;;  %2734 = vmatpush.bf16.msra.mxu3 %v6883_v44  ;;  %v6893_v33 = vld [vmem:[#allocation35_spill] sm:$0xff] }
 0x6fb   :  { %v6894_v44 = vld [vmem:[#allocation39_spill] sm:$0xff] }
 0x6fe   :  { %2662 = vmatpush.bf16.msra.mxu1 %v6884_v15  ;;  %2735 = vmatpush.bf16.msra.mxu3 %v6885_v5  ;;  %v6895_v15 = vld [vmem:[#allocation43_spill] sm:$0xff] }
 0x702   :  { %2663 = vmatpush.bf16.msra.mxu1 %v6886_v29  ;;  %2736 = vmatpush.bf16.msra.mxu3 %v6888_v19 }
 0x706   :  { %2755 = vmatpush.bf16.msrb.mxu1 %v6887_v30 }
 0x70a   :  { %2756 = vmatpush.bf16.msrb.mxu1 %v6889_v38 }
 0x70e   :  { %2757 = vmatpush.bf16.msrb.mxu1 %v6890_v59 }
 0x712   :  { %2758 = vmatpush.bf16.msrb.mxu1 %v6891_v22 }
 0x716   :  { %2759 = vmatpush.bf16.msrb.mxu1 %v6892_v63 }
 0x71a   :  { %2760 = vmatpush.bf16.msrb.mxu1 %v6893_v33 }
 0x71e   :  { %2761 = vmatpush.bf16.msrb.mxu1 %v6894_v44 }
 0x721   :  { %v2357_v5 = vpop.f32.mrf.mxu0  ;;  %v2370_v29 = vpop.f32.mrf.mxu1 }
 0x722   :  { %2762 = vmatpush.bf16.msrb.mxu1 %v6895_v15  ;;  %v2358_v30 = vadd.f32 %v2357_v5, %v6896_v41  ;;  %v2371_v19 = vadd.f32 %v2370_v29, %v6897_v7 }
 0x724   :  { %v2387_v38 = vadd.f32 %v2358_v30, %v5588_v42  ;;  %v2388_v59 = vadd.f32 %v2371_v19, %v5592_v16 }
 0x726   :  { %v3873_v51 = vmul.f32 -1.442695, %v2387_v38  ;;  %v3874_v22 = vmul.f32 -1.442695, %v2388_v59 }
 0x728   :  { %4129 = vpow2.f32 %v3873_v51  ;;  %v2383_v63 = vpop.f32.mrf.mxu2  ;;  %v5681_v18 = vpop.f32.mrf.mxu3 }
 0x729   :  { %4131 = vpow2.f32 %v3874_v22  ;;  %v2359_v44 = vpop.f32.mrf.mxu0  ;;  %v2372_v33 = vpop.f32.mrf.mxu1  ;;  %v2384_v10 = vadd.f32 %v2383_v63, %v4963_v55 }
 0x72e   :  { %v4130_v15 = vpop.eup %4129 }
 0x72f   :  { %v4132_v26 = vpop.eup %4131  ;;  %v2395_v45 = vadd.f32 1.0, %v4130_v15 }
 0x730   :  { %v2396_v50 = vadd.f32 1.0, %v4132_v26  ;;  %v2385_v5 = vpop.f32.mrf.mxu2  ;;  %v2445_v41 = vpop.f32.mrf.mxu3 }
 0x731   :  { %4133 = vrcp.f32 %v2395_v45  ;;  %v5683_v29 = vpop.f32.mrf.mxu1  ;;  %v2408_v44 = vand.u32 2147483648, %v2395_v45  ;;  %v2406_v19 = vand.u32 2147483647, %v2395_v45  ;;  %vm2402_vm12 = vweird.f32 %v2395_v45 }
 0x732   :  { %4135 = vrcp.f32 %v2396_v50  ;;  %vm2417_vm2 = vweird.f32 %v2396_v50 }
 0x733   :  { %v2409_v41 = vor.u32 1.1754944e-38, %v2408_v44  ;;  %vm2407_vm14 = vcmp.eq.f32.partialorder %v2406_v19, 8.507059e+37 }
 0x737   :  { %v4134_v42 = vpop.eup %4133 }
 0x738   :  { %v4136_v16 = vpop.eup %4135  ;;  %v2398_v38 = vmul.f32 %v4134_v42, %v2395_v45  ;;  %v5685_v51 = vpop.f32.mrf.mxu3  ;;  %vm2403_vm11 = vweird.f32 %v4134_v42 }
 0x739   :  { %v2471_v59 = vpop.f32.mrf.mxu1  ;;  %v2413_v22 = vmul.f32 %v4136_v16, %v2396_v50  ;;  %vm2404_vm13 = vmor %vm2402_vm12, %vm2403_vm11  ;;  %vm2418_vm15 = vweird.f32 %v4136_v16 }
 0x73a   :  { %v2399_v30 = vsub.f32 1.0, %v2398_v38  ;;  %vm2419_vm3 = vmor %vm2417_vm2, %vm2418_vm15 }
 0x73b   :  { %v2414_v26 = vsub.f32 1.0, %v2413_v22  ;;  %v2421_v22 = vand.u32 2147483647, %v2396_v50 }
 0x73c   :  { %v2400_v33 = vmul.f32 %v4134_v42, %v2399_v30 }
 0x73d   :  { %v2415_v38 = vmul.f32 %v4136_v16, %v2414_v26  ;;  %vm2422_vm4 = vcmp.eq.f32.partialorder %v2421_v22, 8.507059e+37  ;;  %v6906_v22 = vld [vmem:[#allocation85_spill] sm:$0xff] }
 0x73e   :  { %v2401_v15 = vadd.f32 %v4134_v42, %v2400_v33  ;;  %v2423_v33 = vand.u32 2147483648, %v2396_v50  ;;  %v6899_v50 = vld [vmem:[#allocation74_spill] sm:$0xff] }
 0x73f   :  { %v2416_v30 = vadd.f32 %v4136_v16, %v2415_v38  ;;  %v6904_v38 = vld [vmem:[#allocation82_spill] sm:$0xff] }
 0x740   :  { %v2405_v5 = vsel %vm2404_vm13, %v4134_v42, %v2401_v15  ;;  %v2497_v7 = vpop.f32.mrf.mxu3  ;;  %v2424_v19 = vor.u32 1.1754944e-38, %v2423_v33 }
 0x741   :  { %v2410_v17 = vsel %vm2407_vm14, %v2409_v41, %v2405_v5  ;;  %v2420_v7 = vsel %vm2419_vm3, %v4136_v16, %v2416_v30  ;;  %v6900_v16 = vld [vmem:[#allocation76_spill] sm:$0xff]  ;;  %v6902_v41 = vld [vmem:[#allocation79_spill] sm:$0xff] }
 0x742   :  { %v2427_v36 = vmul.f32 %v2410_v17, %v5598_v46  ;;  %v5689_v59 = vpop.f32.mrf.mxu1  ;;  %v2425_v17 = vsel %vm2422_vm4, %v2424_v19, %v2420_v7  ;;  %v6903_v5 = vld [vmem:[#allocation80_spill] sm:$0xff]  ;;  %v6905_v30 = vld [vmem:[#allocation83_spill] sm:$0xff]  ;;  %v6908_v7 = vld [vmem:[#allocation90_spill] sm:$0xff] }
 0x743   :  { %v6910_v19 = vld [vmem:[#allocation98_spill] sm:$0xff] }
 0x744   :  { %v2428_v12 = vadd.f32 %v2427_v36, %v2384_v10  ;;  %v6898_v10 = vld [vmem:[#allocation73_spill] sm:$0xff] }
 0x746   :  { %4137 = vtanh.f32 %v2428_v12 }
 0x748   :  { %v5691_v45 = vpop.f32.mrf.mxu3 }
 0x74a   :  { %v2523_v42 = vpop.f32.mrf.mxu1 }
 0x74b   :  { %v6907_v42 = vld [vmem:[#allocation86_spill] sm:$0xff] }
 0x74c   :  { %v4138_v44 = vpop.eup %4137 }
 0x74d   :  { %v2430_v46 = vsub.f32 %v5511_v37, %v4138_v44  ;;  %v6901_v37 = vld [vmem:[#allocation77_spill] sm:$0xff] }
 0x74f   :  { %v2431_v63 = vmul.f32 %v2430_v46, %v2425_v17  ;;  %v6911_v46 = vld [vmem:[#allocation99_spill] sm:$0xff]  ;;  %v6912_v17 = vld [vmem:[#allocation100_spill] sm:$0xff] }
 0x750   :  { %v2549_v15 = vpop.f32.mrf.mxu3 }
 0x751   :  { %v5694_v36 = vadd.f32 %v4138_v44, %v2431_v63  ;;  %v6909_v44 = vld [vmem:[#allocation93_spill] sm:$0xff]  ;;  %v6914_v15 = vld [vmem:[#allocation102_spill] sm:$0xff] }
 0x752   :  { %v6913_v63 = vld [vmem:[#allocation13_spill] sm:$0xff] }
 0x753   :  { %v2433_v12 = vpack.c.bf16 %v5694_v36, %v5694_v36 }
 0x755   :  { %2455 = vmatmul.bf16.vlgmr.msrb.gmra.mxu0 %v2433_v12  ;;  %2481 = vmatmul.bf16.vlgmr.msrb.gmra.mxu2 %v2433_v12 }
 0x756   :  { %2551 = vmatpush.bf16.msrb.mxu0 %v6518_v3  ;;  %2577 = vmatpush.bf16.msrb.mxu2 %v6708_v40 }
 0x75a   :  { %2552 = vmatpush.bf16.msrb.mxu0 %v6898_v10  ;;  %2578 = vmatpush.bf16.msrb.mxu2 %v6899_v50 }
 0x75e   :  { %2553 = vmatpush.bf16.msrb.mxu0 %v6900_v16  ;;  %2579 = vmatpush.bf16.msrb.mxu2 %v6901_v37  ;;  %v6945_v37 = vld [vmem:[#allocation53_spill] sm:$0xff] }
 0x75f   :  { %v2522_v16 = vadd.f32 %v5689_v59, %v6945_v37 }
 0x762   :  { %v5704_v26 = vpop.f32.mrf.mxu1  ;;  %2554 = vmatpush.bf16.msrb.mxu0 %v6902_v41  ;;  %2580 = vmatpush.bf16.msrb.mxu2 %v6903_v5  ;;  %v2591_v5 = vld [vmem:[#allocation2 + $0x1e] sm:$0x3f] }
 0x763   :  { %v2619_v37 = vrot.slane %v2591_v5, 4 }
 0x765   :  { %2507 = vmatmul.bf16.vlgmr.msra.gmra.mxu0 %v2433_v12  ;;  %2533 = vmatmul.bf16.vlgmr.msra.gmra.mxu2 %v2433_v12 }
 0x766   :  { %2555 = vmatpush.bf16.msrb.mxu0 %v6904_v38  ;;  %2581 = vmatpush.bf16.msrb.mxu2 %v6905_v30 }
 0x76a   :  { %v2575_v33 = vpop.f32.mrf.mxu1  ;;  %2556 = vmatpush.bf16.msrb.mxu0 %v6906_v22  ;;  %2582 = vmatpush.bf16.msrb.mxu2 %v6907_v42  ;;  %v6916_v22 = vld [vmem:[#allocation104_spill] sm:$0xff]  ;;  %v6917_v42 = vld [vmem:[#allocation21_spill] sm:$0xff] }
 0x76b   :  { %v6915_v33 = vld [vmem:[#allocation17_spill] sm:$0xff] }
 0x76e   :  { %2557 = vmatpush.bf16.msrb.mxu0 %v6908_v7  ;;  %2583 = vmatpush.bf16.msrb.mxu2 %v6909_v44  ;;  %v6918_v7 = vld [vmem:[#allocation107_spill] sm:$0xff]  ;;  %v6919_v44 = vld [vmem:[#allocation25_spill] sm:$0xff] }
 0x772   :  { %2558 = vmatpush.bf16.msrb.mxu0 %v6910_v19  ;;  %2584 = vmatpush.bf16.msrb.mxu2 %v6911_v46  ;;  %v6920_v19 = vld [vmem:[#allocation110_spill] sm:$0xff]  ;;  %v6921_v46 = vld [vmem:[#allocation29_spill] sm:$0xff] }
 0x775   :  { %2559 = vmatmul.bf16.vlgmr.msrb.gmra.mxu0 %v2433_v12  ;;  %2585 = vmatmul.bf16.vlgmr.msrb.gmra.mxu2 %v2433_v12  ;;  %v6924_v12 = vld [vmem:[#allocation115_spill] sm:$0xff] }
 0x776   :  { %2643 = vmatpush.bf16.msra.mxu0 %v6912_v17  ;;  %2716 = vmatpush.bf16.msra.mxu2 %v6913_v63  ;;  %v6922_v17 = vld [vmem:[#allocation113_spill] sm:$0xff] }
 0x777   :  { %v6923_v63 = vld [vmem:[#allocation33_spill] sm:$0xff] }
 0x77a   :  { %2644 = vmatpush.bf16.msra.mxu0 %v6914_v15  ;;  %2717 = vmatpush.bf16.msra.mxu2 %v6915_v33  ;;  %v6925_v15 = vld [vmem:[#allocation37_spill] sm:$0xff] }
 0x77b   :  { %v6926_v33 = vld [vmem:[#allocation121_spill] sm:$0xff] }
 0x77e   :  { %2645 = vmatpush.bf16.msra.mxu0 %v6916_v22  ;;  %2718 = vmatpush.bf16.msra.mxu2 %v6917_v42  ;;  %v6927_v22 = vld [vmem:[#allocation41_spill] sm:$0xff]  ;;  %v6928_v42 = vld [vmem:[#allocation14_spill] sm:$0xff] }
 0x782   :  { %2646 = vmatpush.bf16.msra.mxu0 %v6918_v7  ;;  %2719 = vmatpush.bf16.msra.mxu2 %v6919_v44  ;;  %v6929_v7 = vld [vmem:[#allocation45_spill] sm:$0xff]  ;;  %v6930_v44 = vld [vmem:[#allocation18_spill] sm:$0xff] }
 0x786   :  { %2647 = vmatpush.bf16.msra.mxu0 %v6920_v19  ;;  %2720 = vmatpush.bf16.msra.mxu2 %v6921_v46  ;;  %v6931_v19 = vld [vmem:[#allocation47_spill] sm:$0xff]  ;;  %v6932_v46 = vld [vmem:[#allocation22_spill] sm:$0xff] }
 0x78a   :  { %2648 = vmatpush.bf16.msra.mxu0 %v6922_v17  ;;  %2721 = vmatpush.bf16.msra.mxu2 %v6923_v63  ;;  %v6933_v17 = vld [vmem:[#allocation50_spill] sm:$0xff] }
 0x78b   :  { %v6934_v63 = vld [vmem:[#allocation26_spill] sm:$0xff] }
 0x78e   :  { %2649 = vmatpush.bf16.msra.mxu0 %v6924_v12  ;;  %2722 = vmatpush.bf16.msra.mxu2 %v6925_v15  ;;  %v6935_v12 = vld [vmem:[#allocation54_spill] sm:$0xff] }
 0x78f   :  { %v6936_v15 = vld [vmem:[#allocation30_spill] sm:$0xff] }
 0x792   :  { %2650 = vmatpush.bf16.msra.mxu0 %v6926_v33  ;;  %2723 = vmatpush.bf16.msra.mxu2 %v6927_v22  ;;  %v6937_v33 = vld [vmem:[#allocation58_spill] sm:$0xff] }
 0x796   :  { %2742 = vmatpush.bf16.msrb.mxu0 %v6928_v42  ;;  %2768 = vmatpush.bf16.msrb.mxu2 %v6929_v7  ;;  %v6938_v42 = vld [vmem:[#allocation61_spill] sm:$0xff]  ;;  %v6939_v7 = vld [vmem:[#allocation38_spill] sm:$0xff] }
 0x79a   :  { %2743 = vmatpush.bf16.msrb.mxu0 %v6930_v44  ;;  %2769 = vmatpush.bf16.msrb.mxu2 %v6931_v19  ;;  %v6940_v44 = vld [vmem:[#allocation64_spill] sm:$0xff]  ;;  %v6941_v19 = vld [vmem:[#allocation42_spill] sm:$0xff] }
 0x79e   :  { %2744 = vmatpush.bf16.msrb.mxu0 %v6932_v46  ;;  %2770 = vmatpush.bf16.msrb.mxu2 %v6933_v17  ;;  %v6942_v46 = vld [vmem:[#allocation67_spill] sm:$0xff] }
 0x7a2   :  { %2745 = vmatpush.bf16.msrb.mxu0 %v6934_v63  ;;  %2771 = vmatpush.bf16.msrb.mxu2 %v6935_v12  ;;  %v6943_v63 = vld [vmem:[#allocation123_spill] sm:$0xff] }
 0x7a3   :  { %v2470_v12 = vadd.f32 %v5683_v29, %v6943_v63 }
 0x7a6   :  { %2746 = vmatpush.bf16.msrb.mxu0 %v6936_v15  ;;  %2772 = vmatpush.bf16.msrb.mxu2 %v6937_v33  ;;  %v6944_v15 = vld [vmem:[#allocation120_spill] sm:$0xff] }
 0x7a7   :  { %v2444_v33 = vadd.f32 %v5681_v18, %v6944_v15 }
 0x7aa   :  { %2747 = vmatpush.bf16.msrb.mxu0 %v6844_v11  ;;  %2773 = vmatpush.bf16.msrb.mxu2 %v6938_v42 }
 0x7ae   :  { %2748 = vmatpush.bf16.msrb.mxu0 %v6939_v7  ;;  %2774 = vmatpush.bf16.msrb.mxu2 %v6940_v44 }
 0x7b2   :  { %2749 = vmatpush.bf16.msrb.mxu0 %v6941_v19  ;;  %2775 = vmatpush.bf16.msrb.mxu2 %v6942_v46 }
 0x7d2   :  { %v2456_v17 = vpop.f32.mrf.mxu0 }
 0x7d3   :  { %v2457_v38 = vadd.f32 %v2456_v17, %v2444_v33  ;;  %v6947_v33 = vld [vmem:[#allocation49_spill] sm:$0xff] }
 0x7d8   :  { %v2482_v22 = vpop.f32.mrf.mxu2 }
 0x7d9   :  { %v2483_v30 = vadd.f32 %v2482_v22, %v2470_v12  ;;  %v6946_v22 = vld [vmem:[#allocation46_spill] sm:$0xff] }
 0x7da   :  { %v2458_v11 = vpop.f32.mrf.mxu0 }
 0x7db   :  { %v2594_v42 = vrot.slane %v2483_v30, 6 }
 0x7dd   :  { %v2595_v7 = vsel %vm233_vm0, %v2457_v38, %v2594_v42  ;;  %v2548_v38 = vadd.f32 %v5691_v45, %v6946_v22 }
 0x7de   :  { %v2597_v44 = vadd.f32 %v2595_v7, %v2591_v5  ;;  %v6951_v5 = vld [vmem:[#allocation122_spill] sm:$0xff] }
 0x7e0   :  { %v3875_v41 = vmul.f32 -1.442695, %v2597_v44  ;;  %v2484_v19 = vpop.f32.mrf.mxu2 }
 0x7e2   :  { %4139 = vpow2.f32 %v3875_v41  ;;  %v2508_v46 = vpop.f32.mrf.mxu0 }
 0x7e8   :  { %v4140_v29 = vpop.eup %4139  ;;  %v2534_v63 = vpop.f32.mrf.mxu2 }
 0x7e9   :  { %v2601_v50 = vadd.f32 1.0, %v4140_v29  ;;  %v5755_v10 = vadd.f32 %v2534_v63, %v2522_v16  ;;  %v2574_v16 = vadd.f32 %v5704_v26, %v6947_v33  ;;  %v6948_v63 = vld [vmem:[#allocation137_spill] sm:$0xff] }
 0x7ea   :  { %v2510_v18 = vpop.f32.mrf.mxu0  ;;  %v2496_v12 = vadd.f32 %v5685_v51, %v6948_v63 }
 0x7eb   :  { %4141 = vrcp.f32 %v2601_v50  ;;  %v2613_v19 = vand.u32 2147483648, %v2601_v50  ;;  %v2611_v59 = vand.u32 2147483647, %v2601_v50  ;;  %vm2607_vm6 = vweird.f32 %v2601_v50 }
 0x7ed   :  { %v2614_v45 = vor.u32 1.1754944e-38, %v2613_v19  ;;  %vm2612_vm1 = vcmp.eq.f32.partialorder %v2611_v59, 8.507059e+37  ;;  %v6956_v59 = vld [vmem:[#allocation109_spill] sm:$0xff] }
 0x7f0   :  { %v2536_v11 = vpop.f32.mrf.mxu2 }
 0x7f1   :  { %v4142_v30 = vpop.eup %4141 }
 0x7f2   :  { %v2603_v42 = vmul.f32 %v4142_v30, %v2601_v50  ;;  %v2560_v7 = vpop.f32.mrf.mxu0  ;;  %vm2608_vm5 = vweird.f32 %v4142_v30 }
 0x7f3   :  { %v5759_v44 = vadd.f32 %v2560_v7, %v2548_v38  ;;  %vm2609_vm7 = vmor %vm2607_vm6, %vm2608_vm5  ;;  %v2509_v38 = vadd.f32 %v2508_v46, %v2496_v12  ;;  %v6952_v46 = vld [vmem:[#allocation103_spill] sm:$0xff] }
 0x7f4   :  { %v2604_v41 = vsub.f32 1.0, %v2603_v42  ;;  %v6959_v12 = vld [vmem:[#allocation131_spill] sm:$0xff] }
 0x7f6   :  { %v2605_v17 = vmul.f32 %v4142_v30, %v2604_v41 }
 0x7f8   :  { %v2606_v29 = vadd.f32 %v4142_v30, %v2605_v17  ;;  %v2586_v18 = vpop.f32.mrf.mxu2 }
 0x7f9   :  { %v5765_v11 = vadd.f32 %v2586_v18, %v2574_v16  ;;  %v6958_v16 = vld [vmem:[#allocation112_spill] sm:$0xff]  ;;  %v6961_v18 = vld [vmem:[#allocation133_spill] sm:$0xff] }
 0x7fa   :  { %v2610_v7 = vsel %vm2609_vm7, %v4142_v30, %v2606_v29  ;;  %v2562_v42 = vpop.f32.mrf.mxu0  ;;  %v6954_v30 = vld [vmem:[#allocation106_spill] sm:$0xff] }
 0x7fb   :  { %v2615_v41 = vsel %vm2612_vm1, %v2614_v45, %v2610_v7  ;;  %v6960_v29 = vld [vmem:[#allocation114_spill] sm:$0xff]  ;;  %v6962_v45 = vld [vmem:[#allocation117_spill] sm:$0xff]  ;;  %v6964_v7 = vld [vmem:[#allocation135_spill] sm:$0xff] }
 0x7fc   :  { %v2617_v22 = vmul.f32 %v2615_v41, %v2509_v38  ;;  %v2625_v17 = vrot.slane %v2615_v41, 2  ;;  %v6963_v38 = vld [vmem:[#allocation119_spill] sm:$0xff]  ;;  %v6965_v42 = vld [vmem:[#allocation16_spill] sm:$0xff] }
 0x7fd   :  { %v6966_v41 = vld [vmem:[#allocation124_spill] sm:$0xff] }
 0x7fe   :  { %v2621_v15 = vadd.f32 %v2619_v37, %v2617_v22  ;;  %v6950_v37 = vld [vmem:[#allocation101_spill] sm:$0xff]  ;;  %v6955_v22 = vld [vmem:[#allocation127_spill] sm:$0xff] }
 0x800   :  { %4143 = vtanh.f32 %v2621_v15  ;;  %v2588_v26 = vpop.f32.mrf.mxu2  ;;  %v6953_v15 = vld [vmem:[#allocation125_spill] sm:$0xff] }
 0x801   :  { %v6967_v26 = vld [vmem:[#allocation20_spill] sm:$0xff] }
 0x806   :  { %v4144_v33 = vpop.eup %4143 }
 0x807   :  { %v2623_v51 = vsub.f32 %v5601_v39, %v4144_v33  ;;  %v6949_v39 = vld [vmem:[#allocation118_spill] sm:$0xff] }
 0x809   :  { %v2627_v50 = vmul.f32 %v2625_v17, %v2623_v51  ;;  %v6968_v51 = vld [vmem:[#allocation126_spill] sm:$0xff]  ;;  %v6969_v17 = vld [vmem:[#allocation24_spill] sm:$0xff] }
 0x80b   :  { %v5768_v63 = vadd.f32 %v4144_v33, %v2627_v50  ;;  %v6957_v33 = vld [vmem:[#allocation129_spill] sm:$0xff]  ;;  %v6970_v50 = vld [vmem:[#allocation128_spill] sm:$0xff] }
 0x80d   :  { %v2629_v19 = vpack.c.bf16 %v5768_v63, %v5768_v63 }
 0x80f   :  { %2638 = vmatmul.bf16.vlgmr.msrb.gmra.mxu3 %v2629_v19  ;;  %2651 = vmatmul.bf16.vlgmr.msra.gmra.mxu0 %v2629_v19 }
 0x810   :  { %2664 = vmatmul.bf16.vlgmr.msra.gmra.mxu1 %v2629_v19  ;;  %2724 = vmatmul.bf16.vlgmr.msra.gmra.mxu2 %v2629_v19 }
 0x811   :  { %2794 = vmatpush.bf16.msra.mxu0 %v6484_v25  ;;  %2820 = vmatpush.bf16.msra.mxu2 %v4629_v61 }
 0x812   :  { %2781 = vmatpush.bf16.msrb.mxu3 %v6485_v28  ;;  %2807 = vmatpush.bf16.msra.mxu1 %v6486_v6 }
 0x815   :  { %2795 = vmatpush.bf16.msra.mxu0 %v6487_v56  ;;  %2821 = vmatpush.bf16.msra.mxu2 %v4647_v20 }
 0x816   :  { %2782 = vmatpush.bf16.msrb.mxu3 %v6488_v49  ;;  %2808 = vmatpush.bf16.msra.mxu1 %v6489_v2 }
 0x819   :  { %2796 = vmatpush.bf16.msra.mxu0 %v6490_v57  ;;  %2822 = vmatpush.bf16.msra.mxu2 %v4663_v4 }
 0x81a   :  { %2783 = vmatpush.bf16.msrb.mxu3 %v6565_v34  ;;  %2809 = vmatpush.bf16.msra.mxu1 %v6566_v62 }
 0x81d   :  { %2797 = vmatpush.bf16.msra.mxu0 %v6567_v54  ;;  %2823 = vmatpush.bf16.msra.mxu2 %v6568_v32 }
 0x81e   :  { %2784 = vmatpush.bf16.msrb.mxu3 %v6569_v35  ;;  %2810 = vmatpush.bf16.msra.mxu1 %v6570_v8 }
 0x81f   :  { %2750 = vmatmul.bf16.vlgmr.msrb.gmra.mxu0 %v2629_v19 }
 0x820   :  { %2776 = vmatmul.bf16.vlgmr.msrb.gmra.mxu2 %v2629_v19 }
 0x821   :  { %2798 = vmatpush.bf16.msra.mxu0 %v6571_v14  ;;  %2824 = vmatpush.bf16.msra.mxu2 %v6572_v13 }
 0x822   :  { %2785 = vmatpush.bf16.msrb.mxu3 %v6497_v27  ;;  %2811 = vmatpush.bf16.msra.mxu1 %v6573_v9 }
 0x825   :  { %2799 = vmatpush.bf16.msra.mxu0 %v6574_v58  ;;  %2825 = vmatpush.bf16.msra.mxu2 %v6575_v23 }
 0x826   :  { %2786 = vmatpush.bf16.msrb.mxu3 %v6576_v31  ;;  %2812 = vmatpush.bf16.msra.mxu1 %v6501_v0 }
 0x829   :  { %2800 = vmatpush.bf16.msra.mxu0 %v6502_v53  ;;  %2826 = vmatpush.bf16.msra.mxu2 %v4719_v43 }
 0x82a   :  { %2787 = vmatpush.bf16.msrb.mxu3 %v6577_v47  ;;  %2813 = vmatpush.bf16.msra.mxu1 %v6664_v24 }
 0x82d   :  { %2801 = vmatpush.bf16.msra.mxu0 %v6579_v52  ;;  %2827 = vmatpush.bf16.msra.mxu2 %v6580_v48 }
 0x82e   :  { %2788 = vmatpush.bf16.msrb.mxu3 %v6758_v1  ;;  %2814 = vmatpush.bf16.msra.mxu1 %v6856_v60 }
 0x830   :  { %2802 = vmatmul.bf16.vlgmr.msra.gmra.mxu0 %v2629_v19  ;;  %2828 = vmatmul.bf16.vlgmr.msra.gmra.mxu2 %v2629_v19 }
 0x831   :  { %2846 = vmatpush.bf16.msrb.mxu0 %v6757_v21  ;;  %2912 = vmatpush.bf16.msrb.mxu2 %v6949_v39 }
 0x835   :  { %2847 = vmatpush.bf16.msrb.mxu0 %v6950_v37  ;;  %2913 = vmatpush.bf16.msrb.mxu2 %v6951_v5 }
 0x839   :  { %2848 = vmatpush.bf16.msrb.mxu0 %v6952_v46  ;;  %2914 = vmatpush.bf16.msrb.mxu2 %v6953_v15 }
 0x83d   :  { %2849 = vmatpush.bf16.msrb.mxu0 %v6954_v30  ;;  %2915 = vmatpush.bf16.msrb.mxu2 %v6955_v22 }
 0x841   :  { %2850 = vmatpush.bf16.msrb.mxu0 %v6956_v59  ;;  %2916 = vmatpush.bf16.msrb.mxu2 %v6957_v33 }
 0x845   :  { %2851 = vmatpush.bf16.msrb.mxu0 %v6958_v16  ;;  %2917 = vmatpush.bf16.msrb.mxu2 %v6959_v12  ;;  %v6989_v16 = vld [vmem:[#allocation57_spill] sm:$0xff] }
 0x849   :  { %2852 = vmatpush.bf16.msrb.mxu0 %v6960_v29  ;;  %2918 = vmatpush.bf16.msrb.mxu2 %v6961_v18  ;;  %v6971_v18 = vld [vmem:[#allocation28_spill] sm:$0xff] }
 0x84d   :  { %2853 = vmatpush.bf16.msrb.mxu0 %v6962_v45  ;;  %2919 = vmatpush.bf16.msrb.mxu2 %v6964_v7  ;;  %v6972_v45 = vld [vmem:[#allocation130_spill] sm:$0xff]  ;;  %v6974_v7 = vld [vmem:[#allocation132_spill] sm:$0xff] }
 0x850   :  { %2854 = vmatmul.bf16.vlgmr.msrb.gmra.mxu0 %v2629_v19  ;;  %v6976_v19 = vld [vmem:[#allocation134_spill] sm:$0xff] }
 0x851   :  { %2938 = vmatpush.bf16.msra.mxu0 %v6963_v38  ;;  %3011 = vmatpush.bf16.msra.mxu2 %v6965_v42  ;;  %v6973_v38 = vld [vmem:[#allocation32_spill] sm:$0xff] }
 0x852   :  { %v6975_v42 = vld [vmem:[#allocation36_spill] sm:$0xff] }
 0x855   :  { %2939 = vmatpush.bf16.msra.mxu0 %v6966_v41  ;;  %3012 = vmatpush.bf16.msra.mxu2 %v6967_v26  ;;  %v6977_v41 = vld [vmem:[#allocation40_spill] sm:$0xff] }
 0x856   :  { %v6978_v26 = vld [vmem:[#allocation136_spill] sm:$0xff] }
 0x859   :  { %2940 = vmatpush.bf16.msra.mxu0 %v6968_v51  ;;  %3013 = vmatpush.bf16.msra.mxu2 %v6969_v17  ;;  %v6979_v51 = vld [vmem:[#allocation15_spill] sm:$0xff]  ;;  %v6980_v17 = vld [vmem:[#allocation44_spill] sm:$0xff] }
 0x85d   :  { %2941 = vmatpush.bf16.msra.mxu0 %v6970_v50  ;;  %3014 = vmatpush.bf16.msra.mxu2 %v6971_v18  ;;  %v6981_v50 = vld [vmem:[#allocation19_spill] sm:$0xff] }
 0x85e   :  { %v6982_v18 = vld [vmem:[#allocation23_spill] sm:$0xff] }
 0x861   :  { %2942 = vmatpush.bf16.msra.mxu0 %v6972_v45  ;;  %3015 = vmatpush.bf16.msra.mxu2 %v6973_v38  ;;  %v6983_v45 = vld [vmem:[#allocation27_spill] sm:$0xff] }
 0x862   :  { %v6984_v38 = vld [vmem:[#allocation31_spill] sm:$0xff] }
 0x865   :  { %2943 = vmatpush.bf16.msra.mxu0 %v6974_v7  ;;  %3016 = vmatpush.bf16.msra.mxu2 %v6975_v42  ;;  %v6985_v7 = vld [vmem:[#allocation35_spill] sm:$0xff] }
 0x866   :  { %v6986_v42 = vld [vmem:[#allocation39_spill] sm:$0xff] }
 0x869   :  { %2944 = vmatpush.bf16.msra.mxu0 %v6976_v19  ;;  %3017 = vmatpush.bf16.msra.mxu2 %v6977_v41  ;;  %v6987_v19 = vld [vmem:[#allocation43_spill] sm:$0xff] }
 0x86d   :  { %2945 = vmatpush.bf16.msra.mxu0 %v6978_v26  ;;  %3018 = vmatpush.bf16.msra.mxu2 %v6980_v17  ;;  %v6988_v26 = vld [vmem:[#allocation48_spill] sm:$0xff] }
 0x871   :  { %3037 = vmatpush.bf16.msrb.mxu0 %v6979_v51 }
 0x875   :  { %3038 = vmatpush.bf16.msrb.mxu0 %v6981_v50 }
 0x879   :  { %3039 = vmatpush.bf16.msrb.mxu0 %v6982_v18 }
 0x87d   :  { %3040 = vmatpush.bf16.msrb.mxu0 %v6983_v45 }
 0x881   :  { %3041 = vmatpush.bf16.msrb.mxu0 %v6984_v38 }
 0x885   :  { %3042 = vmatpush.bf16.msrb.mxu0 %v6985_v7 }
 0x889   :  { %3043 = vmatpush.bf16.msrb.mxu0 %v6986_v42 }
 0x88c   :  { %v2652_v41 = vpop.f32.mrf.mxu0 }
 0x88d   :  { %3044 = vmatpush.bf16.msrb.mxu0 %v6987_v19  ;;  %v2653_v29 = vadd.f32 %v2652_v41, %v6988_v26  ;;  %v2665_v51 = vpop.f32.mrf.mxu1 }
 0x88e   :  { %v2666_v46 = vadd.f32 %v2665_v51, %v4963_v55 }
 0x88f   :  { %v2670_v17 = vadd.f32 %v2653_v29, %v5759_v44 }
 0x891   :  { %v3877_v12 = vmul.f32 -1.442695, %v2670_v17 }
 0x892   :  { %v2639_v50 = vpop.f32.mrf.mxu3 }
 0x893   :  { %v2640_v18 = vadd.f32 %v2639_v50, %v6989_v16  ;;  %v5847_v33 = vpop.f32.mrf.mxu2  ;;  %4145 = vpow2.f32 %v3877_v12 }
 0x894   :  { %v2654_v45 = vpop.f32.mrf.mxu0 }
 0x895   :  { %v2669_v38 = vadd.f32 %v2640_v18, %v5755_v10  ;;  %v2667_v7 = vpop.f32.mrf.mxu1 }
 0x897   :  { %v3876_v42 = vmul.f32 -1.442695, %v2669_v38 }
 0x899   :  { %4147 = vpow2.f32 %v3876_v42  ;;  %v4146_v22 = vpop.eup %4145 }
 0x89a   :  { %v2641_v19 = vpop.f32.mrf.mxu3  ;;  %v2678_v44 = vadd.f32 1.0, %v4146_v22 }
 0x89b   :  { %v2727_v59 = vpop.f32.mrf.mxu2 }
 0x89c   :  { %v5850_v41 = vpop.f32.mrf.mxu0  ;;  %vm2699_vm13 = vweird.f32 %v2678_v44 }
 0x89f   :  { %v4148_v26 = vpop.eup %4147 }
 0x8a0   :  { %v2677_v29 = vadd.f32 1.0, %v4148_v26 }
 0x8a2   :  { %4149 = vrcp.f32 %v2677_v29  ;;  %v2690_v7 = vand.u32 2147483648, %v2677_v29  ;;  %v2688_v59 = vand.u32 2147483647, %v2677_v29  ;;  %vm2684_vm9 = vweird.f32 %v2677_v29 }
 0x8a3   :  { %4151 = vrcp.f32 %v2678_v44  ;;  %v5852_v17 = vpop.f32.mrf.mxu2 }
 0x8a4   :  { %v2753_v50 = vpop.f32.mrf.mxu0  ;;  %v2691_v26 = vor.u32 1.1754944e-38, %v2690_v7  ;;  %vm2689_vm11 = vcmp.eq.f32.partialorder %v2688_v59, 8.507059e+37 }
 0x8a8   :  { %v4150_v45 = vpop.eup %4149 }
 0x8a9   :  { %v4152_v16 = vpop.eup %4151  ;;  %v2680_v10 = vmul.f32 %v4150_v45, %v2677_v29  ;;  %vm2685_vm8 = vweird.f32 %v4150_v45  ;;  %v2703_v29 = vand.u32 2147483647, %v2678_v44 }
 0x8aa   :  { %v2695_v38 = vmul.f32 %v4152_v16, %v2678_v44  ;;  %vm2686_vm10 = vmor %vm2684_vm9, %vm2685_vm8  ;;  %vm2700_vm12 = vweird.f32 %v4152_v16 }
 0x8ab   :  { %v2681_v18 = vsub.f32 1.0, %v2680_v10  ;;  %v2779_v12 = vpop.f32.mrf.mxu2  ;;  %vm2701_vm14 = vmor %vm2699_vm13, %vm2700_vm12  ;;  %vm2704_vm15 = vcmp.eq.f32.partialorder %v2703_v29, 8.507059e+37  ;;  %v7000_v29 = vld [vmem:[#allocation90_spill] sm:$0xff] }
 0x8ac   :  { %v2696_v22 = vsub.f32 1.0, %v2695_v38 }
 0x8ad   :  { %v2682_v42 = vmul.f32 %v4150_v45, %v2681_v18  ;;  %v5854_v19 = vpop.f32.mrf.mxu0 }
 0x8ae   :  { %v2697_v5 = vmul.f32 %v4152_v16, %v2696_v22  ;;  %v6994_v22 = vld [vmem:[#allocation79_spill] sm:$0xff] }
 0x8af   :  { %v2683_v30 = vadd.f32 %v4150_v45, %v2682_v42  ;;  %v2705_v42 = vand.u32 2147483648, %v2678_v44 }
 0x8b0   :  { %v2698_v39 = vadd.f32 %v4152_v16, %v2697_v5 }
 0x8b1   :  { %v2687_v15 = vsel %vm2686_vm10, %v4150_v45, %v2683_v30 }
 0x8b2   :  { %v2692_v50 = vsel %vm2689_vm11, %v2691_v26, %v2687_v15  ;;  %v2702_v30 = vsel %vm2701_vm14, %v4152_v16, %v2698_v39  ;;  %v2706_v15 = vor.u32 1.1754944e-38, %v2705_v42  ;;  %v6990_v39 = vld [vmem:[#allocation73_spill] sm:$0xff]  ;;  %v6995_v26 = vld [vmem:[#allocation80_spill] sm:$0xff]  ;;  %v6999_v42 = vld [vmem:[#allocation86_spill] sm:$0xff] }
 0x8b3   :  { %v2709_v10 = vmul.f32 %v2692_v50, %v5765_v11  ;;  %v5858_v12 = vpop.f32.mrf.mxu2  ;;  %v6993_v16 = vld [vmem:[#allocation77_spill] sm:$0xff]  ;;  %v6996_v50 = vld [vmem:[#allocation82_spill] sm:$0xff] }
 0x8b4   :  { %v2707_v11 = vsel %vm2704_vm15, %v2706_v15, %v2702_v30  ;;  %v7002_v30 = vld [vmem:[#allocation98_spill] sm:$0xff]  ;;  %v7004_v15 = vld [vmem:[#allocation100_spill] sm:$0xff] }
 0x8b5   :  { %v2710_v18 = vadd.f32 %v2709_v10, %v2666_v46  ;;  %v2805_v37 = vpop.f32.mrf.mxu0  ;;  %v6991_v46 = vld [vmem:[#allocation74_spill] sm:$0xff]  ;;  %v6997_v10 = vld [vmem:[#allocation83_spill] sm:$0xff] }
 0x8b7   :  { %4153 = vtanh.f32 %v2710_v18  ;;  %v6998_v18 = vld [vmem:[#allocation85_spill] sm:$0xff] }
 0x8bb   :  { %v2831_v38 = vpop.f32.mrf.mxu2 }
 0x8bc   :  { %v7001_v38 = vld [vmem:[#allocation93_spill] sm:$0xff] }
 0x8bd   :  { %v4154_v45 = vpop.eup %4153 }
 0x8be   :  { %v2712_v51 = vsub.f32 %v5694_v36, %v4154_v45  ;;  %v6992_v36 = vld [vmem:[#allocation76_spill] sm:$0xff] }
 0x8c0   :  { %v2713_v7 = vmul.f32 %v2712_v51, %v2707_v11  ;;  %v7005_v51 = vld [vmem:[#allocation13_spill] sm:$0xff]  ;;  %v7006_v11 = vld [vmem:[#allocation102_spill] sm:$0xff] }
 0x8c2   :  { %v5861_v59 = vadd.f32 %v4154_v45, %v2713_v7  ;;  %v7003_v45 = vld [vmem:[#allocation99_spill] sm:$0xff]  ;;  %v7007_v7 = vld [vmem:[#allocation17_spill] sm:$0xff] }
 0x8c4   :  { %v2715_v37 = vpack.c.bf16 %v5861_v59, %v5861_v59 }
 0x8c6   :  { %2737 = vmatmul.bf16.vlgmr.msra.gmra.mxu3 %v2715_v37  ;;  %2763 = vmatmul.bf16.vlgmr.msrb.gmra.mxu1 %v2715_v37 }
 0x8c7   :  { %2833 = vmatpush.bf16.msra.mxu3 %v6518_v3  ;;  %2859 = vmatpush.bf16.msrb.mxu1 %v6708_v40 }
 0x8cb   :  { %2834 = vmatpush.bf16.msra.mxu3 %v6990_v39  ;;  %2860 = vmatpush.bf16.msrb.mxu1 %v6991_v46 }
 0x8cd   :  { %v5867_v5 = vpop.f32.mrf.mxu0 }
 0x8cf   :  { %2835 = vmatpush.bf16.msra.mxu3 %v6992_v36  ;;  %2861 = vmatpush.bf16.msrb.mxu1 %v6993_v16 }
 0x8d3   :  { %2836 = vmatpush.bf16.msra.mxu3 %v6994_v22  ;;  %2862 = vmatpush.bf16.msrb.mxu1 %v6995_v26  ;;  %v2873_v26 = vld [vmem:[#allocation2 + $0x24] sm:$0x3f] }
 0x8d5   :  { %v2857_v44 = vpop.f32.mrf.mxu0 }
 0x8d6   :  { %2789 = vmatmul.bf16.vlgmr.msrb.gmra.mxu3 %v2715_v37  ;;  %2815 = vmatmul.bf16.vlgmr.msra.gmra.mxu1 %v2715_v37  ;;  %v7008_v44 = vld [vmem:[#allocation104_spill] sm:$0xff] }
 0x8d7   :  { %2837 = vmatpush.bf16.msra.mxu3 %v6996_v50  ;;  %2863 = vmatpush.bf16.msrb.mxu1 %v6997_v10 }
 0x8db   :  { %2838 = vmatpush.bf16.msra.mxu3 %v6998_v18  ;;  %2864 = vmatpush.bf16.msrb.mxu1 %v6999_v42  ;;  %v7009_v42 = vld [vmem:[#allocation21_spill] sm:$0xff] }
 0x8df   :  { %2839 = vmatpush.bf16.msra.mxu3 %v7000_v29  ;;  %2865 = vmatpush.bf16.msrb.mxu1 %v7001_v38  ;;  %v7010_v29 = vld [vmem:[#allocation107_spill] sm:$0xff]  ;;  %v7011_v38 = vld [vmem:[#allocation25_spill] sm:$0xff] }
 0x8e3   :  { %2840 = vmatpush.bf16.msra.mxu3 %v7002_v30  ;;  %2866 = vmatpush.bf16.msrb.mxu1 %v7003_v45  ;;  %v7012_v30 = vld [vmem:[#allocation110_spill] sm:$0xff]  ;;  %v7013_v45 = vld [vmem:[#allocation29_spill] sm:$0xff] }
 0x8e6   :  { %2841 = vmatmul.bf16.vlgmr.msra.gmra.mxu3 %v2715_v37  ;;  %2867 = vmatmul.bf16.vlgmr.msrb.gmra.mxu1 %v2715_v37  ;;  %v7016_v37 = vld [vmem:[#allocation115_spill] sm:$0xff] }
 0x8e7   :  { %2925 = vmatpush.bf16.msrb.mxu3 %v7004_v15  ;;  %2998 = vmatpush.bf16.msra.mxu1 %v7005_v51  ;;  %v7014_v15 = vld [vmem:[#allocation113_spill] sm:$0xff] }
 0x8e8   :  { %v7015_v51 = vld [vmem:[#allocation33_spill] sm:$0xff] }
 0x8eb   :  { %2926 = vmatpush.bf16.msrb.mxu3 %v7006_v11  ;;  %2999 = vmatpush.bf16.msra.mxu1 %v7007_v7  ;;  %v7017_v11 = vld [vmem:[#allocation37_spill] sm:$0xff] }
 0x8ec   :  { %v7018_v7 = vld [vmem:[#allocation121_spill] sm:$0xff] }
 0x8ef   :  { %2927 = vmatpush.bf16.msrb.mxu3 %v7008_v44  ;;  %3000 = vmatpush.bf16.msra.mxu1 %v7009_v42  ;;  %v7019_v44 = vld [vmem:[#allocation41_spill] sm:$0xff]  ;;  %v7020_v42 = vld [vmem:[#allocation14_spill] sm:$0xff] }
 0x8f3   :  { %2928 = vmatpush.bf16.msrb.mxu3 %v7010_v29  ;;  %3001 = vmatpush.bf16.msra.mxu1 %v7011_v38  ;;  %v7021_v29 = vld [vmem:[#allocation45_spill] sm:$0xff]  ;;  %v7022_v38 = vld [vmem:[#allocation18_spill] sm:$0xff] }
 0x8f7   :  { %2929 = vmatpush.bf16.msrb.mxu3 %v7012_v30  ;;  %3002 = vmatpush.bf16.msra.mxu1 %v7013_v45  ;;  %v7023_v30 = vld [vmem:[#allocation47_spill] sm:$0xff]  ;;  %v7024_v45 = vld [vmem:[#allocation22_spill] sm:$0xff] }
 0x8fb   :  { %2930 = vmatpush.bf16.msrb.mxu3 %v7014_v15  ;;  %3003 = vmatpush.bf16.msra.mxu1 %v7015_v51  ;;  %v7025_v15 = vld [vmem:[#allocation50_spill] sm:$0xff] }
 0x8fc   :  { %v7026_v51 = vld [vmem:[#allocation26_spill] sm:$0xff] }
 0x8ff   :  { %2931 = vmatpush.bf16.msrb.mxu3 %v7016_v37  ;;  %3004 = vmatpush.bf16.msra.mxu1 %v7017_v11  ;;  %v7027_v37 = vld [vmem:[#allocation54_spill] sm:$0xff] }
 0x900   :  { %v7028_v11 = vld [vmem:[#allocation30_spill] sm:$0xff] }
 0x903   :  { %2932 = vmatpush.bf16.msrb.mxu3 %v7018_v7  ;;  %3005 = vmatpush.bf16.msra.mxu1 %v7019_v44  ;;  %v7029_v7 = vld [vmem:[#allocation58_spill] sm:$0xff] }
 0x904   :  { %v7030_v44 = vld [vmem:[#allocation34_spill] sm:$0xff] }
 0x907   :  { %3024 = vmatpush.bf16.msra.mxu3 %v7020_v42  ;;  %3050 = vmatpush.bf16.msrb.mxu1 %v7021_v29  ;;  %v7031_v42 = vld [vmem:[#allocation61_spill] sm:$0xff]  ;;  %v7032_v29 = vld [vmem:[#allocation38_spill] sm:$0xff] }
 0x90b   :  { %3025 = vmatpush.bf16.msra.mxu3 %v7022_v38  ;;  %3051 = vmatpush.bf16.msrb.mxu1 %v7023_v30  ;;  %v7033_v38 = vld [vmem:[#allocation64_spill] sm:$0xff]  ;;  %v7034_v30 = vld [vmem:[#allocation42_spill] sm:$0xff] }
 0x90f   :  { %3026 = vmatpush.bf16.msra.mxu3 %v7024_v45  ;;  %3052 = vmatpush.bf16.msrb.mxu1 %v7025_v15  ;;  %v7035_v45 = vld [vmem:[#allocation67_spill] sm:$0xff] }
 0x913   :  { %3027 = vmatpush.bf16.msra.mxu3 %v7026_v51  ;;  %3053 = vmatpush.bf16.msrb.mxu1 %v7027_v37  ;;  %v7036_v51 = vld [vmem:[#allocation123_spill] sm:$0xff] }
 0x914   :  { %v2752_v37 = vadd.f32 %v5850_v41, %v7036_v51 }
 0x917   :  { %3028 = vmatpush.bf16.msra.mxu3 %v7028_v11  ;;  %3054 = vmatpush.bf16.msrb.mxu1 %v7029_v7  ;;  %v7037_v11 = vld [vmem:[#allocation120_spill] sm:$0xff] }
 0x918   :  { %v2726_v7 = vadd.f32 %v5847_v33, %v7037_v11  ;;  %v7039_v11 = vld [vmem:[#allocation49_spill] sm:$0xff] }
 0x91b   :  { %3029 = vmatpush.bf16.msra.mxu3 %v7030_v44  ;;  %3055 = vmatpush.bf16.msrb.mxu1 %v7031_v42 }
 0x91f   :  { %3030 = vmatpush.bf16.msra.mxu3 %v7032_v29  ;;  %3056 = vmatpush.bf16.msrb.mxu1 %v7033_v38 }
 0x923   :  { %3031 = vmatpush.bf16.msra.mxu3 %v7034_v30  ;;  %3057 = vmatpush.bf16.msrb.mxu1 %v7035_v45  ;;  %v7038_v45 = vld [vmem:[#allocation53_spill] sm:$0xff] }
 0x924   :  { %v2804_v16 = vadd.f32 %v5854_v19, %v7038_v45 }
 0x943   :  { %v2764_v15 = vpop.f32.mrf.mxu1 }
 0x944   :  { %v2765_v18 = vadd.f32 %v2764_v15, %v2752_v37 }
 0x946   :  { %v2876_v44 = vrot.slane %v2765_v18, 6 }
 0x949   :  { %v2738_v10 = vpop.f32.mrf.mxu3 }
 0x94a   :  { %v2739_v50 = vadd.f32 %v2738_v10, %v2726_v7 }
 0x94b   :  { %v2766_v42 = vpop.f32.mrf.mxu1 }
 0x94c   :  { %v2877_v29 = vsel %vm233_vm0, %v2739_v50, %v2876_v44  ;;  %v2856_v50 = vadd.f32 %v5867_v5, %v7039_v11 }
 0x94d   :  { %v2879_v38 = vadd.f32 %v2877_v29, %v2873_v26 }
 0x94f   :  { %v3878_v22 = vmul.f32 -1.442695, %v2879_v38 }
 0x951   :  { %4155 = vpow2.f32 %v3878_v22  ;;  %v2740_v30 = vpop.f32.mrf.mxu3 }
 0x953   :  { %v2816_v36 = vpop.f32.mrf.mxu1 }
 0x954   :  { %v5922_v41 = vadd.f32 %v2816_v36, %v2804_v16  ;;  %v7040_v16 = vld [vmem:[#allocation137_spill] sm:$0xff] }
 0x955   :  { %v2778_v30 = vadd.f32 %v5852_v17, %v7040_v16 }
 0x957   :  { %v4156_v15 = vpop.eup %4155 }
 0x958   :  { %v2883_v37 = vadd.f32 1.0, %v4156_v15 }
 0x959   :  { %v2790_v33 = vpop.f32.mrf.mxu3 }
 0x95a   :  { %4157 = vrcp.f32 %v2883_v37  ;;  %v2895_v29 = vand.u32 2147483648, %v2883_v37  ;;  %v2893_v36 = vand.u32 2147483647, %v2883_v37  ;;  %vm2889_vm3 = vweird.f32 %v2883_v37 }
 0x95b   :  { %v2818_v18 = vpop.f32.mrf.mxu1  ;;  %v2791_v51 = vadd.f32 %v2790_v33, %v2778_v30 }
 0x95c   :  { %v7041_v18 = vld [vmem:[#allocation46_spill] sm:$0xff]  ;;  %vm2894_vm5 = vcmp.eq.f32.partialorder %v2893_v36, 8.507059e+37 }
 0x95d   :  { %v2830_v45 = vadd.f32 %v5858_v12, %v7041_v18 }
 0x960   :  { %v4158_v10 = vpop.eup %4157 }
 0x961   :  { %v2885_v7 = vmul.f32 %v4158_v10, %v2883_v37  ;;  %v2792_v42 = vpop.f32.mrf.mxu3  ;;  %vm2890_vm2 = vweird.f32 %v4158_v10 }
 0x962   :  { %vm2891_vm4 = vmor %vm2889_vm3, %vm2890_vm2  ;;  %v2896_v42 = vor.u32 1.1754944e-38, %v2895_v29 }
 0x963   :  { %v2886_v44 = vsub.f32 1.0, %v2885_v7  ;;  %v2868_v22 = vpop.f32.mrf.mxu1 }
 0x964   :  { %v5926_v38 = vadd.f32 %v2868_v22, %v2856_v50  ;;  %v2901_v22 = vrot.slane %v2873_v26, 4 }
 0x965   :  { %v2887_v19 = vmul.f32 %v4158_v10, %v2886_v44 }
 0x967   :  { %v2888_v15 = vadd.f32 %v4158_v10, %v2887_v19 }
 0x969   :  { %v2892_v5 = vsel %vm2891_vm4, %v4158_v10, %v2888_v15  ;;  %v2842_v7 = vpop.f32.mrf.mxu3 }
 0x96a   :  { %v2897_v11 = vsel %vm2894_vm5, %v2896_v42, %v2892_v5  ;;  %v5932_v50 = vadd.f32 %v2842_v7, %v2830_v45 }
 0x96b   :  { %v2899_v44 = vmul.f32 %v2897_v11, %v2791_v51  ;;  %v2870_v46 = vpop.f32.mrf.mxu1  ;;  %v2907_v16 = vrot.slane %v2897_v11, 2 }
 0x96d   :  { %v2903_v39 = vadd.f32 %v2901_v22, %v2899_v44 }
 0x96f   :  { %4159 = vtanh.f32 %v2903_v39 }
 0x971   :  { %v2844_v17 = vpop.f32.mrf.mxu3 }
 0x975   :  { %v4160_v19 = vpop.eup %4159 }
 0x976   :  { %v2905_v37 = vsub.f32 %v5768_v63, %v4160_v19 }
 0x978   :  { %v2909_v12 = vmul.f32 %v2907_v16, %v2905_v37 }
 0x97a   :  { %v5935_v18 = vadd.f32 %v4160_v19, %v2909_v12 }
 0x97c   :  { %v2911_v33 = vpack.c.bf16 %v5935_v18, %v5935_v18 }
 0x97e   :  { %2920 = vmatmul.bf16.vlgmr.msrb.gmra.mxu2 %v2911_v33  ;;  %2933 = vmatmul.bf16.vlgmr.msrb.gmra.mxu3 %v2911_v33 }
 0x97f   :  { %2946 = vmatmul.bf16.vlgmr.msra.gmra.mxu0 %v2911_v33  ;;  %3006 = vmatmul.bf16.vlgmr.msra.gmra.mxu1 %v2911_v33 }
 0x980   :  { %3076 = vmatpush.bf16.msrb.mxu3 %v6484_v25  ;;  %3102 = vmatpush.bf16.msra.mxu1 %v4629_v61  ;;  %v7043_v61 = vld [vmem:[#allocation101_spill] sm:$0xff] }
 0x981   :  { %3063 = vmatpush.bf16.msrb.mxu2 %v6485_v28  ;;  %3089 = vmatpush.bf16.msra.mxu0 %v6486_v6  ;;  %v7046_v25 = vld [vmem:[#allocation125_spill] sm:$0xff]  ;;  %v7047_v28 = vld [vmem:[#allocation106_spill] sm:$0xff]  ;;  %v7048_v6 = vld [vmem:[#allocation127_spill] sm:$0xff] }
 0x984   :  { %3077 = vmatpush.bf16.msrb.mxu3 %v6487_v56  ;;  %3103 = vmatpush.bf16.msra.mxu1 %v4647_v20  ;;  %v7045_v20 = vld [vmem:[#allocation103_spill] sm:$0xff]  ;;  %v7049_v56 = vld [vmem:[#allocation109_spill] sm:$0xff] }
 0x985   :  { %3064 = vmatpush.bf16.msrb.mxu2 %v6488_v49  ;;  %3090 = vmatpush.bf16.msra.mxu0 %v6489_v2  ;;  %v7050_v49 = vld [vmem:[#allocation129_spill] sm:$0xff]  ;;  %v7051_v2 = vld [vmem:[#allocation112_spill] sm:$0xff] }
 0x988   :  { %3078 = vmatpush.bf16.msrb.mxu3 %v6490_v57  ;;  %3104 = vmatpush.bf16.msra.mxu1 %v4663_v4  ;;  %v7042_v4 = vld [vmem:[#allocation118_spill] sm:$0xff]  ;;  %v7052_v57 = vld [vmem:[#allocation131_spill] sm:$0xff] }
 0x989   :  { %3065 = vmatpush.bf16.msrb.mxu2 %v6565_v34  ;;  %3091 = vmatpush.bf16.msra.mxu0 %v6566_v62  ;;  %v7056_v34 = vld [vmem:[#allocation119_spill] sm:$0xff] }
 0x98a   :  { %v7057_v62 = vld [vmem:[#allocation135_spill] sm:$0xff] }
 0x98c   :  { %3079 = vmatpush.bf16.msrb.mxu3 %v6567_v54  ;;  %3105 = vmatpush.bf16.msra.mxu1 %v6568_v32  ;;  %v7058_v54 = vld [vmem:[#allocation124_spill] sm:$0xff]  ;;  %v7059_v32 = vld [vmem:[#allocation126_spill] sm:$0xff] }
 0x98d   :  { %3066 = vmatpush.bf16.msrb.mxu2 %v6569_v35  ;;  %3092 = vmatpush.bf16.msra.mxu0 %v6570_v8  ;;  %v7060_v35 = vld [vmem:[#allocation128_spill] sm:$0xff]  ;;  %v7061_v8 = vld [vmem:[#allocation130_spill] sm:$0xff] }
 0x98e   :  { %3032 = vmatmul.bf16.vlgmr.msra.gmra.mxu3 %v2911_v33 }
 0x98f   :  { %3058 = vmatmul.bf16.vlgmr.msrb.gmra.mxu1 %v2911_v33 }
 0x990   :  { %3080 = vmatpush.bf16.msrb.mxu3 %v6571_v14  ;;  %3106 = vmatpush.bf16.msra.mxu1 %v6572_v13  ;;  %v7062_v14 = vld [vmem:[#allocation132_spill] sm:$0xff]  ;;  %v7063_v13 = vld [vmem:[#allocation134_spill] sm:$0xff] }
 0x991   :  { %3067 = vmatpush.bf16.msrb.mxu2 %v6497_v27  ;;  %3093 = vmatpush.bf16.msra.mxu0 %v6573_v9  ;;  %v7055_v27 = vld [vmem:[#allocation117_spill] sm:$0xff]  ;;  %v7064_v9 = vld [vmem:[#allocation136_spill] sm:$0xff] }
 0x994   :  { %3081 = vmatpush.bf16.msrb.mxu3 %v6574_v58  ;;  %3107 = vmatpush.bf16.msra.mxu1 %v6575_v23 }
 0x995   :  { %3068 = vmatpush.bf16.msrb.mxu2 %v6576_v31  ;;  %3094 = vmatpush.bf16.msra.mxu0 %v6501_v0  ;;  %v7053_v0 = vld [vmem:[#allocation114_spill] sm:$0xff] }
 0x998   :  { %3082 = vmatpush.bf16.msrb.mxu3 %v6502_v53  ;;  %3108 = vmatpush.bf16.msra.mxu1 %v4719_v43  ;;  %v7044_v43 = vld [vmem:[#allocation122_spill] sm:$0xff]  ;;  %v7054_v53 = vld [vmem:[#allocation133_spill] sm:$0xff] }
 0x999   :  { %3069 = vmatpush.bf16.msrb.mxu2 %v6577_v47  ;;  %3095 = vmatpush.bf16.msra.mxu0 %v6664_v24  ;;  %v7066_v24 = vld [vmem:[#allocation48_spill] sm:$0xff] }
 0x99c   :  { %3083 = vmatpush.bf16.msrb.mxu3 %v6579_v52  ;;  %3109 = vmatpush.bf16.msra.mxu1 %v6580_v48  ;;  %v7065_v52 = vld [vmem:[#allocation57_spill] sm:$0xff] }
 0x99d   :  { %3070 = vmatpush.bf16.msrb.mxu2 %v6758_v1  ;;  %3096 = vmatpush.bf16.msra.mxu0 %v6856_v60 }
 0x99f   :  { %3084 = vmatmul.bf16.vlgmr.msrb.gmra.mxu3 %v2911_v33  ;;  %3110 = vmatmul.bf16.vlgmr.msra.gmra.mxu1 %v2911_v33 }
 0x9a0   :  { %3128 = vmatpush.bf16.msra.mxu3 %v6757_v21  ;;  %3194 = vmatpush.bf16.msrb.mxu1 %v7042_v4 }
 0x9a4   :  { %3129 = vmatpush.bf16.msra.mxu3 %v7043_v61  ;;  %3195 = vmatpush.bf16.msrb.mxu1 %v7044_v43 }
 0x9a8   :  { %3130 = vmatpush.bf16.msra.mxu3 %v7045_v20  ;;  %3196 = vmatpush.bf16.msrb.mxu1 %v7046_v25 }
 0x9ac   :  { %3131 = vmatpush.bf16.msra.mxu3 %v7047_v28  ;;  %3197 = vmatpush.bf16.msrb.mxu1 %v7048_v6 }
 0x9b0   :  { %3132 = vmatpush.bf16.msra.mxu3 %v7049_v56  ;;  %3198 = vmatpush.bf16.msrb.mxu1 %v7050_v49 }
 0x9b4   :  { %3133 = vmatpush.bf16.msra.mxu3 %v7051_v2  ;;  %3199 = vmatpush.bf16.msrb.mxu1 %v7052_v57 }
 0x9b8   :  { %3134 = vmatpush.bf16.msra.mxu3 %v7053_v0  ;;  %3200 = vmatpush.bf16.msrb.mxu1 %v7054_v53 }
 0x9bc   :  { %3135 = vmatpush.bf16.msra.mxu3 %v7055_v27  ;;  %3201 = vmatpush.bf16.msrb.mxu1 %v7057_v62 }
 0x9bf   :  { %3136 = vmatmul.bf16.vlgmr.msra.gmra.mxu3 %v2911_v33 }
 0x9c0   :  { %3220 = vmatpush.bf16.msrb.mxu3 %v7056_v34 }
 0x9c4   :  { %3221 = vmatpush.bf16.msrb.mxu3 %v7058_v54 }
 0x9c8   :  { %3222 = vmatpush.bf16.msrb.mxu3 %v7059_v32 }
 0x9cc   :  { %3223 = vmatpush.bf16.msrb.mxu3 %v7060_v35 }
 0x9d0   :  { %3224 = vmatpush.bf16.msrb.mxu3 %v7061_v8 }
 0x9d4   :  { %3225 = vmatpush.bf16.msrb.mxu3 %v7062_v14  ;;  %v7067_v14 = vld [vmem:[#allocation73_spill] sm:$0xff] }
 0x9d8   :  { %3226 = vmatpush.bf16.msrb.mxu3 %v7063_v13  ;;  %v7068_v13 = vld [vmem:[#allocation74_spill] sm:$0xff] }
 0x9dc   :  { %3227 = vmatpush.bf16.msrb.mxu3 %v7064_v9  ;;  %v7069_v9 = vld [vmem:[#allocation76_spill] sm:$0xff] }
 0x9fc   :  { %v2947_v58 = vpop.f32.mrf.mxu0  ;;  %v5995_v23 = vpop.f32.mrf.mxu1 }
 0x9fd   :  { %v2948_v20 = vadd.f32 %v2947_v58, %v4963_v55 }
 0xa01   :  { %v2921_v31 = vpop.f32.mrf.mxu2  ;;  %v2934_v47 = vpop.f32.mrf.mxu3 }
 0xa02   :  { %v2922_v48 = vadd.f32 %v2921_v31, %v7065_v52  ;;  %v2935_v21 = vadd.f32 %v2934_v47, %v7066_v24  ;;  %v7071_v31 = vld [vmem:[#allocation79_spill] sm:$0xff]  ;;  %v7072_v47 = vld [vmem:[#allocation80_spill] sm:$0xff] }
 0xa04   :  { %v2951_v1 = vadd.f32 %v2922_v48, %v5922_v41  ;;  %v2952_v60 = vadd.f32 %v2935_v21, %v5932_v50  ;;  %v2949_v63 = vpop.f32.mrf.mxu0  ;;  %v3009_v39 = vpop.f32.mrf.mxu1  ;;  %v7073_v48 = vld [vmem:[#allocation82_spill] sm:$0xff]  ;;  %v7075_v21 = vld [vmem:[#allocation85_spill] sm:$0xff] }
 0xa05   :  { %v7078_v63 = vld [vmem:[#allocation93_spill] sm:$0xff]  ;;  %v7079_v39 = vld [vmem:[#allocation98_spill] sm:$0xff] }
 0xa06   :  { %v3879_v46 = vmul.f32 -1.442695, %v2951_v1  ;;  %v3880_v26 = vmul.f32 -1.442695, %v2952_v60  ;;  %v7076_v1 = vld [vmem:[#allocation86_spill] sm:$0xff] }
 0xa07   :  { %v7077_v60 = vld [vmem:[#allocation90_spill] sm:$0xff] }
 0xa08   :  { %4161 = vpow2.f32 %v3879_v46  ;;  %v7080_v46 = vld [vmem:[#allocation99_spill] sm:$0xff] }
 0xa09   :  { %4163 = vpow2.f32 %v3880_v26  ;;  %v2923_v51 = vpop.f32.mrf.mxu2  ;;  %v2936_v11 = vpop.f32.mrf.mxu3  ;;  %v7081_v26 = vld [vmem:[#allocation100_spill] sm:$0xff] }
 0xa0a   :  { %v7082_v51 = vld [vmem:[#allocation102_spill] sm:$0xff]  ;;  %v7083_v11 = vld [vmem:[#allocation104_spill] sm:$0xff] }
 0xa0c   :  { %v6001_v45 = vpop.f32.mrf.mxu1 }
 0xa0e   :  { %v4162_v10 = vpop.eup %4161 }
 0xa0f   :  { %v4164_v29 = vpop.eup %4163  ;;  %v2959_v36 = vadd.f32 1.0, %v4162_v10  ;;  %v7084_v10 = vld [vmem:[#allocation107_spill] sm:$0xff] }
 0xa10   :  { %v2960_v16 = vadd.f32 1.0, %v4164_v29  ;;  %v7085_v29 = vld [vmem:[#allocation110_spill] sm:$0xff] }
 0xa11   :  { %4165 = vrcp.f32 %v2959_v36  ;;  %v6003_v30 = vpop.f32.mrf.mxu3  ;;  %v2972_v44 = vand.u32 2147483648, %v2959_v36  ;;  %v2970_v19 = vand.u32 2147483647, %v2959_v36  ;;  %vm2966_vm7 = vweird.f32 %v2959_v36 }
 0xa12   :  { %4167 = vrcp.f32 %v2960_v16  ;;  %v2987_v57 = vand.u32 2147483648, %v2960_v16  ;;  %vm2981_vm10 = vweird.f32 %v2960_v16  ;;  %v2985_v0 = vand.u32 2147483647, %v2960_v16 }
 0xa13   :  { %v2973_v33 = vor.u32 1.1754944e-38, %v2972_v44  ;;  %vm2971_vm8 = vcmp.eq.f32.partialorder %v2970_v19, 8.507059e+37 }
 0xa14   :  { %v3061_v41 = vpop.f32.mrf.mxu1  ;;  %v2988_v62 = vor.u32 1.1754944e-38, %v2987_v57  ;;  %vm2986_vm12 = vcmp.eq.f32.partialorder %v2985_v0, 8.507059e+37 }
 0xa15   :  { %v7088_v41 = vld [vmem:[#allocation121_spill] sm:$0xff] }
 0xa17   :  { %v4166_v15 = vpop.eup %4165 }
 0xa18   :  { %v4168_v42 = vpop.eup %4167  ;;  %v2962_v5 = vmul.f32 %v4166_v15, %v2959_v36  ;;  %vm2967_vm6 = vweird.f32 %v4166_v15  ;;  %v7086_v36 = vld [vmem:[#allocation113_spill] sm:$0xff] }
 0xa19   :  { %v3035_v7 = vpop.f32.mrf.mxu3  ;;  %v2977_v22 = vmul.f32 %v4168_v42, %v2960_v16  ;;  %vm2968_vm1 = vmor %vm2966_vm7, %vm2967_vm6  ;;  %vm2982_vm9 = vweird.f32 %v4168_v42  ;;  %v7087_v16 = vld [vmem:[#allocation115_spill] sm:$0xff] }
 0xa1a   :  { %v2963_v50 = vsub.f32 1.0, %v2962_v5  ;;  %vm2983_vm11 = vmor %vm2981_vm10, %vm2982_vm9 }
 0xa1b   :  { %v2978_v4 = vsub.f32 1.0, %v2977_v22 }
 0xa1c   :  { %v2964_v17 = vmul.f32 %v4166_v15, %v2963_v50  ;;  %v6005_v37 = vpop.f32.mrf.mxu1  ;;  %v7090_v50 = vld [vmem:[#allocation120_spill] sm:$0xff] }
 0xa1d   :  { %v2979_v6 = vmul.f32 %v4168_v42, %v2978_v4  ;;  %v3008_v44 = vadd.f32 %v5995_v23, %v7090_v50  ;;  %v4039_v50 = vld [vmem:[#allocation8 + $0x18] sm:$0xff] }
 0xa1e   :  { %v2965_v12 = vadd.f32 %v4166_v15, %v2964_v17 }
 0xa1f   :  { %v2980_v2 = vadd.f32 %v4168_v42, %v2979_v6 }
 0xa20   :  { %v2969_v61 = vsel %vm2968_vm1, %v4166_v15, %v2965_v12 }
 0xa21   :  { %v2974_v43 = vsel %vm2971_vm8, %v2973_v33, %v2969_v61  ;;  %v2984_v27 = vsel %vm2983_vm11, %v4168_v42, %v2980_v2  ;;  %v7089_v42 = vld [vmem:[#allocation123_spill] sm:$0xff]  ;;  %v3155_v33 = vld [vmem:[#allocation2 + $0x2a] sm:$0x3f] }
 0xa22   :  { %v2991_v25 = vmul.f32 %v2974_v43, %v5926_v38  ;;  %v6009_v28 = vpop.f32.mrf.mxu3  ;;  %v2989_v38 = vsel %vm2986_vm12, %v2988_v62, %v2984_v27  ;;  %v3034_v5 = vadd.f32 %v6003_v30, %v7089_v42 }
 0xa24   :  { %v2992_v56 = vadd.f32 %v2991_v25, %v2948_v20  ;;  %v3113_v49 = vpop.f32.mrf.mxu1  ;;  %v7091_v25 = vld [vmem:[#allocation53_spill] sm:$0xff] }
 0xa25   :  { %v3086_v6 = vadd.f32 %v6009_v28, %v7091_v25 }
 0xa26   :  { %4169 = vtanh.f32 %v2992_v56 }
 0xa2a   :  { %v3087_v53 = vpop.f32.mrf.mxu3 }
 0xa2c   :  { %v4170_v34 = vpop.eup %4169 }
 0xa2d   :  { %v2994_v54 = vsub.f32 %v5861_v59, %v4170_v34  ;;  %v7070_v59 = vld [vmem:[#allocation77_spill] sm:$0xff] }
 0xa2f   :  { %v2995_v32 = vmul.f32 %v2994_v54, %v2989_v38 }
 0xa31   :  { %v6012_v35 = vadd.f32 %v4170_v34, %v2995_v32  ;;  %v7092_v34 = vld [vmem:[#allocation49_spill] sm:$0xff] }
 0xa33   :  { %v2997_v8 = vpack.c.bf16 %v6012_v35, %v6012_v35 }
 0xa35   :  { %3019 = vmatmul.bf16.vlgmr.msra.gmra.mxu2 %v2997_v8  ;;  %3045 = vmatmul.bf16.vlgmr.msrb.gmra.mxu0 %v2997_v8 }
 0xa36   :  { %3115 = vmatpush.bf16.msra.mxu2 %v6518_v3  ;;  %3141 = vmatpush.bf16.msrb.mxu0 %v6708_v40  ;;  %v7074_v3 = vld [vmem:[#allocation83_spill] sm:$0xff] }
 0xa3a   :  { %3116 = vmatpush.bf16.msra.mxu2 %v7067_v14  ;;  %3142 = vmatpush.bf16.msrb.mxu0 %v7068_v13  ;;  %v7093_v13 = vld [vmem:[#allocation137_spill] sm:$0xff] }
 0xa3e   :  { %3117 = vmatpush.bf16.msra.mxu2 %v7069_v9  ;;  %3143 = vmatpush.bf16.msrb.mxu0 %v7070_v59  ;;  %v3060_v9 = vadd.f32 %v6001_v45, %v7093_v13 }
 0xa42   :  { %v3137_v58 = vpop.f32.mrf.mxu3  ;;  %3118 = vmatpush.bf16.msra.mxu2 %v7071_v31  ;;  %3144 = vmatpush.bf16.msrb.mxu0 %v7072_v47  ;;  %v7094_v31 = vld [vmem:[#allocation46_spill] sm:$0xff] }
 0xa43   :  { %v3138_v62 = vadd.f32 %v3137_v58, %v7092_v34  ;;  %v3112_v47 = vadd.f32 %v6005_v37, %v7094_v31 }
 0xa45   :  { %3071 = vmatmul.bf16.vlgmr.msrb.gmra.mxu2 %v2997_v8  ;;  %3097 = vmatmul.bf16.vlgmr.msra.gmra.mxu0 %v2997_v8 }
 0xa46   :  { %3119 = vmatpush.bf16.msra.mxu2 %v7073_v48  ;;  %3145 = vmatpush.bf16.msrb.mxu0 %v7074_v3 }
 0xa4a   :  { %v3139_v40 = vpop.f32.mrf.mxu3  ;;  %3120 = vmatpush.bf16.msra.mxu2 %v7075_v21  ;;  %3146 = vmatpush.bf16.msrb.mxu0 %v7076_v1 }
 0xa4e   :  { %3121 = vmatpush.bf16.msra.mxu2 %v7077_v60  ;;  %3147 = vmatpush.bf16.msrb.mxu0 %v7078_v63  ;;  %v3183_v63 = vrot.slane %v3155_v33, 4 }
 0xa52   :  { %3122 = vmatpush.bf16.msra.mxu2 %v7079_v39  ;;  %3148 = vmatpush.bf16.msrb.mxu0 %v7080_v46 }
 0xa55   :  { %3123 = vmatmul.bf16.vlgmr.msra.gmra.mxu2 %v2997_v8  ;;  %3149 = vmatmul.bf16.vlgmr.msrb.gmra.mxu0 %v2997_v8 }
 0xa56   :  { %3207 = vmatpush.bf16.msrb.mxu2 %v7081_v26 }
 0xa5a   :  { %3208 = vmatpush.bf16.msrb.mxu2 %v7082_v51 }
 0xa5e   :  { %3209 = vmatpush.bf16.msrb.mxu2 %v7083_v11 }
 0xa62   :  { %3210 = vmatpush.bf16.msrb.mxu2 %v7084_v10 }
 0xa66   :  { %3211 = vmatpush.bf16.msrb.mxu2 %v7085_v29 }
 0xa6a   :  { %3212 = vmatpush.bf16.msrb.mxu2 %v7086_v36  ;;  %v4043_v36 = vld [vmem:[#allocation8 + $0x38] sm:$0xff] }
 0xa6b   :  { %3348 = vmatpush.bf16.msra.mxu0 %v4043_v36 }
 0xa6e   :  { %3213 = vmatpush.bf16.msrb.mxu2 %v7087_v16  ;;  %v4042_v16 = vld [vmem:[#allocation8 + $0x30] sm:$0xff] }
 0xa6f   :  { %3349 = vmatpush.bf16.msra.mxu0 %v4042_v16 }
 0xa72   :  { %3214 = vmatpush.bf16.msrb.mxu2 %v7088_v41  ;;  %v4041_v41 = vld [vmem:[#allocation8 + $0x28] sm:$0xff] }
 0xa73   :  { %3350 = vmatpush.bf16.msra.mxu0 %v4041_v41 }
 0xab2   :  { %v3046_v15 = vpop.f32.mrf.mxu0 }
 0xab3   :  { %v3047_v7 = vadd.f32 %v3046_v15, %v3034_v5  ;;  %v4040_v5 = vld [vmem:[#allocation8 + $0x20] sm:$0xff] }
 0xab4   :  { %3351 = vmatpush.bf16.msra.mxu0 %v4040_v5 }
 0xab5   :  { %v3158_v17 = vrot.slane %v3047_v7, 6 }
 0xab8   :  { %v3020_v22 = vpop.f32.mrf.mxu2  ;;  %3352 = vmatpush.bf16.msra.mxu0 %v4039_v50 }
 0xab9   :  { %v3021_v19 = vadd.f32 %v3020_v22, %v3008_v44 }
 0xaba   :  { %v3048_v12 = vpop.f32.mrf.mxu0 }
 0xabb   :  { %v3159_v4 = vsel %vm233_vm0, %v3021_v19, %v3158_v17 }
 0xabc   :  { %v3161_v61 = vadd.f32 %v3159_v4, %v3155_v33  ;;  %v4038_v33 = vld [vmem:[#allocation8 + $0x10] sm:$0xff] }
 0xabd   :  { %3353 = vmatpush.bf16.msra.mxu0 %v4038_v33 }
 0xabe   :  { %v3881_v43 = vmul.f32 -1.442695, %v3161_v61 }
 0xac0   :  { %4171 = vpow2.f32 %v3881_v43  ;;  %v3022_v20 = vpop.f32.mrf.mxu2  ;;  %v4037_v43 = vld [vmem:[#allocation8 + $0x8] sm:$0xff] }
 0xac1   :  { %3354 = vmatpush.bf16.msra.mxu0 %v4037_v43 }
 0xac2   :  { %v3098_v56 = vpop.f32.mrf.mxu0 }
 0xac3   :  { %v3099_v30 = vadd.f32 %v3098_v56, %v3086_v6  ;;  %v4036_v6 = vld [vmem:[#allocation8] sm:$0xff] }
 0xac5   :  { %3355 = vmatpush.bf16.msra.mxu0 %v4036_v6 }
 0xac6   :  { %v4172_v49 = vpop.eup %4171 }
 0xac7   :  { %v3165_v2 = vadd.f32 1.0, %v4172_v49 }
 0xac8   :  { %v3072_v57 = vpop.f32.mrf.mxu2 }
 0xac9   :  { %4173 = vrcp.f32 %v3165_v2  ;;  %v3177_v32 = vand.u32 2147483648, %v3165_v2  ;;  %v3175_v28 = vand.u32 2147483647, %v3165_v2  ;;  %vm3171_vm13 = vweird.f32 %v3165_v2 }
 0xaca   :  { %v3100_v23 = vpop.f32.mrf.mxu0  ;;  %v3073_v3 = vadd.f32 %v3072_v57, %v3060_v9 }
 0xacb   :  { %v3178_v48 = vor.u32 1.1754944e-38, %v3177_v32  ;;  %vm3176_vm15 = vcmp.eq.f32.partialorder %v3175_v28, 8.507059e+37 }
 0xacf   :  { %v4174_v0 = vpop.eup %4173 }
 0xad0   :  { %v3167_v53 = vmul.f32 %v4174_v0, %v3165_v2  ;;  %v3074_v27 = vpop.f32.mrf.mxu2  ;;  %vm3172_vm0 = vweird.f32 %v4174_v0 }
 0xad1   :  { %vm3173_vm14 = vmor %vm3171_vm13, %vm3172_vm0 }
 0xad2   :  { %v3168_v54 = vsub.f32 1.0, %v3167_v53  ;;  %v3150_v38 = vpop.f32.mrf.mxu0 }
 0xad3   :  { %v6048_v8 = vadd.f32 %v3150_v38, %v3138_v62 }
 0xad4   :  { %v3169_v14 = vmul.f32 %v4174_v0, %v3168_v54 }
 0xad6   :  { %v3170_v59 = vadd.f32 %v4174_v0, %v3169_v14 }
 0xad8   :  { %v3174_v58 = vsel %vm3173_vm14, %v4174_v0, %v3170_v59  ;;  %v3124_v40 = vpop.f32.mrf.mxu2 }
 0xad9   :  { %v3179_v21 = vsel %vm3176_vm15, %v3178_v48, %v3174_v58  ;;  %v3125_v1 = vadd.f32 %v3124_v40, %v3112_v47 }
 0xada   :  { %v3181_v60 = vmul.f32 %v3179_v21, %v3073_v3  ;;  %v3152_v39 = vpop.f32.mrf.mxu0  ;;  %v3189_v11 = vrot.slane %v3179_v21, 2 }
 0xadc   :  { %v3185_v46 = vadd.f32 %v3183_v63, %v3181_v60 }
 0xade   :  { %4175 = vtanh.f32 %v3185_v46 }
 0xae0   :  { %v3126_v26 = vpop.f32.mrf.mxu2 }
 0xae4   :  { %v4176_v45 = vpop.eup %4175 }
 0xae5   :  { %v3187_v51 = vsub.f32 %v5935_v18, %v4176_v45 }
 0xae7   :  { %v3191_v10 = vmul.f32 %v3189_v11, %v3187_v51 }
 0xae9   :  { %v3192_v37 = vadd.f32 %v4176_v45, %v3191_v10 }
 0xaeb   :  { %v3193_v29 = vpack.c.bf16 %v3192_v37, %v3192_v37 }
 0xaed   :  { %3202 = vmatmul.bf16.vlgmr.msrb.gmra.mxu1 %v3193_v29  ;;  %3215 = vmatmul.bf16.vlgmr.msrb.gmra.mxu2 %v3193_v29 }
 0xaee   :  { %3228 = vmatmul.bf16.vlgmr.msrb.gmra.mxu3 %v3193_v29 }
 0xb6a   :  { %v3203_v15 = vpop.f32.mrf.mxu1 }
 0xb6b   :  { %v3204_v42 = vadd.f32 %v3203_v15, %v7065_v52 }
 0xb6d   :  { %v3233_v7 = vadd.f32 %v3204_v42, %v3099_v30 }
 0xb6f   :  { %v3882_v18 = vmul.f32 -1.442695, %v3233_v7 }
 0xb70   :  { %v3216_v44 = vpop.f32.mrf.mxu2 }
 0xb71   :  { %4177 = vpow2.f32 %v3882_v18  ;;  %v3217_v22 = vadd.f32 %v3216_v44, %v7066_v24  ;;  %v3229_v17 = vpop.f32.mrf.mxu3 }
 0xb72   :  { %v3205_v19 = vpop.f32.mrf.mxu1  ;;  %v3230_v14 = vadd.f32 %v3229_v17, %v4963_v55 }
 0xb73   :  { %v3234_v12 = vadd.f32 %v3217_v22, %v3125_v1 }
 0xb75   :  { %v3883_v4 = vmul.f32 -1.442695, %v3234_v12 }
 0xb77   :  { %v4178_v61 = vpop.eup %4177  ;;  %4179 = vpow2.f32 %v3883_v4 }
 0xb78   :  { %v3241_v52 = vadd.f32 1.0, %v4178_v61  ;;  %v3218_v20 = vpop.f32.mrf.mxu2 }
 0xb79   :  { %v3231_v25 = vpop.f32.mrf.mxu3 }
 0xb7a   :  { %4181 = vrcp.f32 %v3241_v52  ;;  %v3254_v57 = vand.u32 2147483648, %v3241_v52  ;;  %v3252_v0 = vand.u32 2147483647, %v3241_v52  ;;  %vm3248_vm3 = vweird.f32 %v3241_v52 }
 0xb7c   :  { %v3255_v62 = vor.u32 1.1754944e-38, %v3254_v57  ;;  %vm3253_vm5 = vcmp.eq.f32.partialorder %v3252_v0, 8.507059e+37 }
 0xb7d   :  { %v4180_v56 = vpop.eup %4179 }
 0xb7e   :  { %v3242_v30 = vadd.f32 1.0, %v4180_v56 }
 0xb80   :  { %v4182_v24 = vpop.eup %4181  ;;  %4183 = vrcp.f32 %v3242_v30  ;;  %v3269_v31 = vand.u32 2147483648, %v3242_v30  ;;  %vm3263_vm7 = vweird.f32 %v3242_v30  ;;  %v3267_v47 = vand.u32 2147483647, %v3242_v30 }
 0xb81   :  { %v3244_v49 = vmul.f32 %v4182_v24, %v3241_v52  ;;  %vm3249_vm2 = vweird.f32 %v4182_v24 }
 0xb82   :  { %vm3250_vm4 = vmor %vm3248_vm3, %vm3249_vm2  ;;  %v3270_v58 = vor.u32 1.1754944e-38, %v3269_v31  ;;  %vm3268_vm8 = vcmp.eq.f32.partialorder %v3267_v47, 8.507059e+37 }
 0xb83   :  { %v3245_v2 = vsub.f32 1.0, %v3244_v49 }
 0xb85   :  { %v3246_v23 = vmul.f32 %v4182_v24, %v3245_v2 }
 0xb86   :  { %v4184_v53 = vpop.eup %4183 }
 0xb87   :  { %v3259_v27 = vmul.f32 %v4184_v53, %v3242_v30  ;;  %v3247_v34 = vadd.f32 %v4182_v24, %v3246_v23  ;;  %vm3264_vm6 = vweird.f32 %v4184_v53 }
 0xb88   :  { %vm3265_vm1 = vmor %vm3263_vm7, %vm3264_vm6 }
 0xb89   :  { %v3260_v54 = vsub.f32 1.0, %v3259_v27  ;;  %v3251_v38 = vsel %vm3250_vm4, %v4182_v24, %v3247_v34 }
 0xb8a   :  { %v3256_v32 = vsel %vm3253_vm5, %v3255_v62, %v3251_v38 }
 0xb8b   :  { %v3273_v28 = vmul.f32 %v3256_v32, %v6048_v8  ;;  %v3261_v13 = vmul.f32 %v4184_v53, %v3260_v54  ;;  %v4058_v8 = vld [vmem:[%s6074_s8] ss:$0 sm:$0xff] }
 0xb8d   :  { %v3274_v9 = vadd.f32 %v3273_v28, %v3230_v14  ;;  %v3262_v59 = vadd.f32 %v4184_v53, %v3261_v13 }
 0xb8f   :  { %4185 = vtanh.f32 %v3274_v9  ;;  %v3266_v48 = vsel %vm3265_vm1, %v4184_v53, %v3262_v59 }
 0xb90   :  { %v3271_v21 = vsel %vm3268_vm8, %v3270_v58, %v3266_v48 }
 0xb95   :  { %v4186_v3 = vpop.eup %4185 }
 0xb96   :  { %v3276_v40 = vsub.f32 %v6012_v35, %v4186_v3 }
 0xb98   :  { %v3277_v1 = vmul.f32 %v3276_v40, %v3271_v21 }
 0xb9a   :  { %v3278_v55 = vadd.f32 %v4186_v3, %v3277_v1 }
 0xb9c   :  { %v3279_v60 = vpack.c.bf16 %v3278_v55, %v3278_v55 }
 0xb9e   :  { %3356 = vmatmul.bf16.vlgmr.msra.gmra.mxu0 %v3279_v60 }
 0xc1b   :  { %v3357_v63 = vpop.f32.mrf.mxu0 }
 0xc1c   :  { %v3358_v39 = vadd.f32 %v4058_v8, %v3357_v63 }
 0xc1e   :  { %3361 = vst [vmem:[#allocation9] sm:$0x3] %v3358_v39 }
 0xc1f   :  { %3372 = dma.vmem_to_hbm [thread:$0]  %s3368_s27, 32, %s3370_s28, [#allocation5]  }
 0xc23   :  { %v3359_v35 = vpop.f32.mrf.mxu0 }
 0xc24   :  { %4287 = dma.done.wait [#allocation5], 32  }
 0xc25   :  { %4288 = vsyncadd [#allocation5], 4294967264 }
 0xc26   :  { %3377 = vsyncpa [#allocation4], 1 }
 0xc27   :  { %3378 = vsyncpa [#allocation7], 1 }
 0xc28   :  { %3379 = vsyncpa [#allocation5], 1 }

</bundles_post_ra>
